<compile_context>
chip_gen: v7x
topology: tpu7x:2x2x1
jax: 0.10.0
libtpu: 0.0.40
codegen_flags: <defaults>
</compile_context>

<pallas_src>
import jax
import jax.numpy as jnp
import numpy as np
from jax import lax
from jax.experimental import pallas as pl
from jax.experimental.pallas import tpu as pltpu

_NEG = -1e9      # "minus infinity" for padded tag columns
_LANE = 128
_SUBLANE = 8


def _round_up(x, m):
    return ((x + m - 1) // m) * m


# ---------------------------------------------------------------------------
# Fused kernel: BiLSTM encode -> emit projection -> CRF NLL, one batch tile.
# ---------------------------------------------------------------------------
def _bilstm_crf_kernel(x_ref, len_ref, tags_ref,
                       wif_ref, whf_ref, bf_ref,
                       wib_ref, whb_ref, bb_ref,
                       wof_ref, wob_ref, bo_ref, trans_ref,
                       loss_ref,
                       gxf_ref, gxb_ref, hf_ref, hb_ref, emit_ref):
    L, TB, E = x_ref.shape
    Hp = whf_ref.shape[0]
    Kp = trans_ref.shape[0]

    # ---- hoisted input-to-hidden matmuls: one big MXU pass per direction ----
    x2d = x_ref[...].reshape(L * TB, E)
    gxf_ref[...] = (jnp.dot(x2d, wif_ref[...], preferred_element_type=jnp.float32)
                    + bf_ref[...]).reshape(L, TB, 4 * Hp)
    gxb_ref[...] = (jnp.dot(x2d, wib_ref[...], preferred_element_type=jnp.float32)
                    + bb_ref[...]).reshape(L, TB, 4 * Hp)

    lengths = len_ref[...]                       # (TB, 1) int32, loaded once
    whf = whf_ref[...]
    whb = whb_ref[...]
    zeros = jnp.zeros((TB, Hp), jnp.float32)

    # Packed-sequence semantics rely on h0 = c0 = 0 plus masked non-updates:
    # the reverse pass sees the zero initial state at each sequence's last
    # real token.  This silently breaks for a nonzero initial state.
    def lstm_step(t, h, c, gx_ref, whh, h_out_ref):
        gates = jnp.dot(h, whh, preferred_element_type=jnp.float32) + gx_ref[t]
        i_g = jax.nn.sigmoid(gates[:, 0 * Hp:1 * Hp])
        f_g = jax.nn.sigmoid(gates[:, 1 * Hp:2 * Hp])
        g_g = jnp.tanh(gates[:, 2 * Hp:3 * Hp])
        o_g = jax.nn.sigmoid(gates[:, 3 * Hp:4 * Hp])
        c_new = f_g * c + i_g * g_g
        h_new = o_g * jnp.tanh(c_new)
        m_t = lengths > t                        # (TB, 1) bool, no per-step load
        h2 = jnp.where(m_t, h_new, h)
        c2 = jnp.where(m_t, c_new, c)
        h_out_ref[t] = h2 * m_t.astype(jnp.float32)   # padded steps -> 0
        return h2, c2

    def fwd_body(t, carry):
        return lstm_step(t, carry[0], carry[1], gxf_ref, whf, hf_ref)

    lax.fori_loop(0, L, fwd_body, (zeros, zeros))

    def bwd_body(i, carry):
        return lstm_step(L - 1 - i, carry[0], carry[1], gxb_ref, whb, hb_ref)

    lax.fori_loop(0, L, bwd_body, (zeros, zeros))

    # ---- batched hidden -> emit projection (single MXU pass, no per-t loop) --
    emit2d = (jnp.dot(hf_ref[...].reshape(L * TB, Hp), wof_ref[...],
                      preferred_element_type=jnp.float32)
              + jnp.dot(hb_ref[...].reshape(L * TB, Hp), wob_ref[...],
                        preferred_element_type=jnp.float32)
              + bo_ref[...])
    emit_ref[...] = emit2d.reshape(L, TB, Kp)    # stays in VMEM, never hits HBM
    # nn.Dropout on emit scores: evaluated in eval mode (identity).
    # TODO(synk): training-mode dropout RNG not implemented.

    # ---- CRF gold-path score -------------------------------------------------
    trans = trans_ref[...]                                        # (Kp, Kp)
    tags_lb = jnp.transpose(tags_ref[...].astype(jnp.float32))    # (L, TB)
    iota_k = lax.broadcasted_iota(jnp.int32, (L, TB, Kp), 2).astype(jnp.float32)
    onehot = (iota_k == tags_lb[:, :, None]).astype(jnp.float32)  # (L, TB, Kp)

    emit_gold = jnp.transpose(jnp.sum(emit_ref[...] * onehot, axis=2))   # (TB, L)

    prev_oh = onehot[:L - 1].reshape((L - 1) * TB, Kp)
    tg = jnp.dot(prev_oh, trans, preferred_element_type=jnp.float32)
    trans_gold = jnp.transpose(
        jnp.sum(tg.reshape(L - 1, TB, Kp) * onehot[1:], axis=2))         # (TB, L-1)

    mask_bt = (lax.broadcasted_iota(jnp.int32, (TB, L), 1)
               < lengths).astype(jnp.float32)                            # (TB, L)
    mask_bt1 = ((lax.broadcasted_iota(jnp.int32, (TB, L - 1), 1) + 1)
                < lengths).astype(jnp.float32)                           # (TB, L-1)

    total_score = (jnp.sum(emit_gold * mask_bt, axis=1, keepdims=True)
                   + jnp.sum(trans_gold * mask_bt1, axis=1, keepdims=True))  # (TB,1)

    # ---- CRF forward recursion (log partition function) ----------------------
    trans_e = trans[None, :, :]                  # broadcast hoisted out of loop
    d0 = emit_ref[0]                             # (TB, Kp)

    def crf_body(t, d):
        e_t = emit_ref[t]                                         # (TB, Kp)
        scores = d[:, :, None] + trans_e + e_t[:, None, :]        # (TB, Kp, Kp)
        mx = jnp.max(scores, axis=1)                              # (TB, Kp)
        d_new = mx + jnp.log(jnp.sum(jnp.exp(scores - mx[:, None, :]), axis=1))
        return jnp.where(lengths > t, d_new, d)

    d = lax.fori_loop(1, L, crf_body, d0)
    max_d = jnp.max(d, axis=1, keepdims=True)                     # (TB, 1)
    log_z = max_d + jnp.log(jnp.sum(jnp.exp(d - max_d), axis=1, keepdims=True))

    # loss = -(total_score - logZ)
    loss_ref[...] = log_z - total_score


# ---------------------------------------------------------------------------
# Parameter init (deterministic, shapes follow the nn.Module __init__).
# ---------------------------------------------------------------------------
def init_params(key, vocab_size, embed_size, hidden_size, num_tags):
    ks = jax.random.split(key, 12)

    def rnd(k, shape, scale=0.1):
        return (scale * jax.random.normal(k, shape)).astype(jnp.float32)

    return dict(
        embedding=rnd(ks[0], (vocab_size, embed_size), 1.0),
        w_ih_f=rnd(ks[1], (4 * hidden_size, embed_size)),
        w_hh_f=rnd(ks[2], (4 * hidden_size, hidden_size)),
        b_ih_f=rnd(ks[3], (4 * hidden_size,)),
        b_hh_f=rnd(ks[4], (4 * hidden_size,)),
        w_ih_b=rnd(ks[5], (4 * hidden_size, embed_size)),
        w_hh_b=rnd(ks[6], (4 * hidden_size, hidden_size)),
        b_ih_b=rnd(ks[7], (4 * hidden_size,)),
        b_hh_b=rnd(ks[8], (4 * hidden_size,)),
        w_out=rnd(ks[9], (num_tags, 2 * hidden_size)),
        b_out=rnd(ks[10], (num_tags,)),
        transition=rnd(ks[11], (num_tags, num_tags), 1.0),
    )


def _pack_lstm_dir(w_ih, w_hh, bias, E, H, E_pad, H_pad):
    """PyTorch-layout (4H,E)/(4H,H)/(4H,) params -> padded lane-aligned
    (E_pad,4H_pad)/(H_pad,4H_pad)/(1,4H_pad) with every gate block starting at
    a multiple of H_pad (128-lane aligned in-kernel gate slices).  Zero padding
    keeps the padded hidden dims exactly zero through the recurrence."""
    wi = jnp.zeros((E_pad, 4 * H_pad), jnp.float32)
    wh = jnp.zeros((H_pad, 4 * H_pad), jnp.float32)
    b = jnp.zeros((1, 4 * H_pad), jnp.float32)
    for g in range(4):
        wi = wi.at[:E, g * H_pad:g * H_pad + H].set(w_ih[g * H:(g + 1) * H, :].T)
        wh = wh.at[:H, g * H_pad:g * H_pad + H].set(w_hh[g * H:(g + 1) * H, :].T)
        b = b.at[0, g * H_pad:g * H_pad + H].set(bias[g * H:(g + 1) * H])
    return wi, wh, b


# ---------------------------------------------------------------------------
# Wrapper: padding / layout prep (glue) + one fused pallas_call.
# ---------------------------------------------------------------------------
def bilstm_crf_forward(params, sentences, tags, sen_lengths, batch_tile=8):
    """sentences, tags: int32 (B, L); sen_lengths: (B,). Returns loss (B,)."""
    B, L = sentences.shape
    E = params["embedding"].shape[1]
    H = params["w_hh_f"].shape[1]
    K = params["w_out"].shape[0]

    TB = _round_up(max(int(batch_tile), _SUBLANE), _SUBLANE)
    B_pad = _round_up(B, TB)
    E_pad = _round_up(E, _LANE)
    H_pad = _round_up(H, _LANE)
    K_pad = _round_up(K, _LANE)

    # Pad parameters to aligned shapes (once per call here; in a training loop
    # this would be done once and cached).  NOTE: weights are kept in f32 so
    # the reference check is tight; on v6e/v7x they could be cast to bf16 with
    # f32 accumulation for ~2x MXU throughput.
    emb_tab = jnp.pad(params["embedding"], ((0, 0), (0, E_pad - E)))
    wif, whf, bf = _pack_lstm_dir(params["w_ih_f"], params["w_hh_f"],
                                  params["b_ih_f"] + params["b_hh_f"],
                                  E, H, E_pad, H_pad)
    wib, whb, bb = _pack_lstm_dir(params["w_ih_b"], params["w_hh_b"],
                                  params["b_ih_b"] + params["b_hh_b"],
                                  E, H, E_pad, H_pad)
    wo = params["w_out"]                                          # (K, 2H)
    wof = jnp.zeros((H_pad, K_pad), jnp.float32).at[:H, :K].set(wo[:, :H].T)
    wob = jnp.zeros((H_pad, K_pad), jnp.float32).at[:H, :K].set(wo[:, H:].T)
    # Padded tag columns get a large negative emit bias so they never win in
    # the CRF logsumexp; padded transition entries can stay 0.
    bo = jnp.full((1, K_pad), _NEG, jnp.float32).at[0, :K].set(params["b_out"])
    trans = jnp.zeros((K_pad, K_pad), jnp.float32).at[:K, :K].set(
        params["transition"])

    # Pad / lay out the batch.
    lengths = jnp.zeros((B_pad,), jnp.int32).at[:B].set(
        jnp.asarray(sen_lengths, jnp.int32)).reshape(B_pad, 1)
    sent_pad = jnp.zeros((B_pad, L), jnp.int32).at[:B].set(sentences.astype(jnp.int32))
    tags_pad = jnp.zeros((B_pad, L), jnp.int32).at[:B].set(tags.astype(jnp.int32))

    # Embedding lookup (glue), time-major (L, B_pad, E_pad) like the PyTorch code.
    emb = jnp.take(emb_tab, sent_pad.T, axis=0)
    # TODO(synk): the embedding gather could be fused into the kernel with a
    # scalar-prefetched pl.Element row gather to avoid one HBM round trip.

    def resident(a):
        nd = a.ndim
        return pl.BlockSpec(a.shape, lambda i, _nd=nd: (0,) * _nd)

    inputs = (emb, lengths, tags_pad,
              wif, whf, bf, wib, whb, bb, wof, wob, bo, trans)
    in_specs = [
        pl.BlockSpec((L, TB, E_pad), lambda i: (0, i, 0)),        # embeddings
        pl.BlockSpec((TB, 1), lambda i: (i, 0)),                  # lengths
        pl.BlockSpec((TB, L), lambda i: (i, 0)),                  # tags
    ] + [resident(a) for a in inputs[3:]]

    loss_pad = pl.pallas_call(
        _bilstm_crf_kernel,
        out_shape=jax.ShapeDtypeStruct((B_pad, 1), jnp.float32),
        grid=(B_pad // TB,),
        in_specs=in_specs,
        out_specs=pl.BlockSpec((TB, 1), lambda i: (i, 0)),
        scratch_shapes=[
            pltpu.VMEM((L, TB, 4 * H_pad), jnp.float32),   # fwd input gates
            pltpu.VMEM((L, TB, 4 * H_pad), jnp.float32),   # bwd input gates
            pltpu.VMEM((L, TB, H_pad), jnp.float32),       # fwd hidden states
            pltpu.VMEM((L, TB, H_pad), jnp.float32),       # bwd hidden states
            pltpu.VMEM((L, TB, K_pad), jnp.float32),       # emit scores
        ],
        compiler_params=pltpu.CompilerParams(
            dimension_semantics=("parallel",),
            vmem_limit_bytes=32 * 1024 * 1024,
        ),
    )(*inputs)

    return loss_pad[:B, 0]


# ---------------------------------------------------------------------------
# Pure-JAX reference (correctness check).
# ---------------------------------------------------------------------------
def reference_forward(params, sentences, tags, sen_lengths):
    B, L = sentences.shape
    lengths = jnp.asarray(sen_lengths, jnp.int32)
    mask = (jnp.arange(L)[None, :] < lengths[:, None]).astype(jnp.float32)
    emb = params["embedding"][sentences]                          # (B, L, E)
    H = params["w_hh_f"].shape[1]

    def lstm_dir(wih, whh, b, reverse):
        def cell(carry, xm):
            h, c = carry
            x_t, m_t = xm
            gates = x_t @ wih.T + h @ whh.T + b
            i_g = jax.nn.sigmoid(gates[:, :H])
            f_g = jax.nn.sigmoid(gates[:, H:2 * H])
            g_g = jnp.tanh(gates[:, 2 * H:3 * H])
            o_g = jax.nn.sigmoid(gates[:, 3 * H:])
            c_new = f_g * c + i_g * g_g
            h_new = o_g * jnp.tanh(c_new)
            m = m_t[:, None]
            h2 = jnp.where(m > 0, h_new, h)
            c2 = jnp.where(m > 0, c_new, c)
            return (h2, c2), h2 * m

        xs = (jnp.transpose(emb, (1, 0, 2)), mask.T)
        init = (jnp.zeros((B, H), jnp.float32), jnp.zeros((B, H), jnp.float32))
        _, hs = lax.scan(cell, init, xs, reverse=reverse)
        return hs                                                 # (L, B, H)

    hf = lstm_dir(params["w_ih_f"], params["w_hh_f"],
                  params["b_ih_f"] + params["b_hh_f"], reverse=False)
    hb = lstm_dir(params["w_ih_b"], params["w_hh_b"],
                  params["b_ih_b"] + params["b_hh_b"], reverse=True)
    hidden = jnp.concatenate([hf, hb], axis=-1)                   # (L, B, 2H)
    emit = hidden @ params["w_out"].T + params["b_out"]           # (L, B, K)
    emit = jnp.transpose(emit, (1, 0, 2))                         # (B, L, K)

    emit_gold = jnp.take_along_axis(emit, tags[:, :, None], axis=2)[:, :, 0]
    trans_gold = params["transition"][tags[:, :-1], tags[:, 1:]]
    score = emit_gold.at[:, 1:].add(trans_gold)
    total_score = jnp.sum(score * mask, axis=1)

    d = emit[:, 0, :]
    for t in range(1, L):
        s = d[:, :, None] + params["transition"][None] + emit[:, t][:, None, :]
        d_new = jax.scipy.special.logsumexp(s, axis=1)
        d = jnp.where(mask[:, t][:, None] > 0, d_new, d)
    log_z = jax.scipy.special.logsumexp(d, axis=1)
    return log_z - total_score


if __name__ == "__main__":
    VOCAB, EMBED, HIDDEN, NUM_TAGS = 40, 32, 32, 8
    B, L = 2, 8
    PAD = 0

    key = jax.random.PRNGKey(0)
    k_params, k_sent, k_tags = jax.random.split(key, 3)
    params = init_params(k_params, VOCAB, EMBED, HIDDEN, NUM_TAGS)

    sen_lengths = jnp.array([8, 5], dtype=jnp.int32)              # decreasing order
    sent = jax.random.randint(k_sent, (B, L), 1, VOCAB).astype(jnp.int32)
    pos = jnp.arange(L)[None, :]
    sent = jnp.where(pos < sen_lengths[:, None], sent, PAD)       # pad the tail
    tags = jax.random.randint(k_tags, (B, L), 0, NUM_TAGS).astype(jnp.int32)

    loss = jax.jit(bilstm_crf_forward)(params, sent, tags, sen_lengths)
    loss = jax.block_until_ready(loss)

    ref = jax.block_until_ready(
        reference_forward(params, sent, tags, sen_lengths))
    np.testing.assert_allclose(np.asarray(loss), np.asarray(ref),
                               rtol=2e-3, atol=2e-3)

    print("KERNEL_OK")
</pallas_src>

<mosaic_0001>
module attributes {stable_mosaic.version = 11 : i64} {
  func.func @_bilstm_crf_kernel(%arg0: i32, %arg1: memref<8x8x128xf32, #tpu.memory_space<vmem>>, %arg2: memref<8x1xi32, #tpu.memory_space<vmem>>, %arg3: memref<8x8xi32, #tpu.memory_space<vmem>>, %arg4: memref<128x512xf32, #tpu.memory_space<vmem>>, %arg5: memref<128x512xf32, #tpu.memory_space<vmem>>, %arg6: memref<1x512xf32, #tpu.memory_space<vmem>>, %arg7: memref<128x512xf32, #tpu.memory_space<vmem>>, %arg8: memref<128x512xf32, #tpu.memory_space<vmem>>, %arg9: memref<1x512xf32, #tpu.memory_space<vmem>>, %arg10: memref<128x128xf32, #tpu.memory_space<vmem>>, %arg11: memref<128x128xf32, #tpu.memory_space<vmem>>, %arg12: memref<1x128xf32, #tpu.memory_space<vmem>>, %arg13: memref<128x128xf32, #tpu.memory_space<vmem>>, %arg14: memref<8x1xf32, #tpu.memory_space<vmem>>, %arg15: memref<8x8x512xf32, #tpu.memory_space<vmem>>, %arg16: memref<8x8x512xf32, #tpu.memory_space<vmem>>, %arg17: memref<8x8x128xf32, #tpu.memory_space<vmem>>, %arg18: memref<8x8x128xf32, #tpu.memory_space<vmem>>, %arg19: memref<8x8x128xf32, #tpu.memory_space<vmem>>) attributes {dimension_semantics = [#tpu.dimension_semantics<parallel>], iteration_bounds = array<i64: 1>, scalar_prefetch = 0 : i64, scratch_operands = 5 : i64, tpu.core_type = #tpu.core_type<tc>, window_params = [{transform_indices = @transform_0, window_bounds = array<i64: 8, 8, 128>}, {transform_indices = @transform_1, window_bounds = array<i64: 8, 1>}, {transform_indices = @transform_2, window_bounds = array<i64: 8, 8>}, {pipeline_mode = #tpu.pipeline_mode<synchronous>, transform_indices = @transform_3, window_bounds = array<i64: 128, 512>}, {pipeline_mode = #tpu.pipeline_mode<synchronous>, transform_indices = @transform_4, window_bounds = array<i64: 128, 512>}, {pipeline_mode = #tpu.pipeline_mode<synchronous>, transform_indices = @transform_5, window_bounds = array<i64: 1, 512>}, {pipeline_mode = #tpu.pipeline_mode<synchronous>, transform_indices = @transform_6, window_bounds = array<i64: 128, 512>}, {pipeline_mode = #tpu.pipeline_mode<synchronous>, transform_indices = @transform_7, window_bounds = array<i64: 128, 512>}, {pipeline_mode = #tpu.pipeline_mode<synchronous>, transform_indices = @transform_8, window_bounds = array<i64: 1, 512>}, {pipeline_mode = #tpu.pipeline_mode<synchronous>, transform_indices = @transform_9, window_bounds = array<i64: 128, 128>}, {pipeline_mode = #tpu.pipeline_mode<synchronous>, transform_indices = @transform_10, window_bounds = array<i64: 128, 128>}, {pipeline_mode = #tpu.pipeline_mode<synchronous>, transform_indices = @transform_11, window_bounds = array<i64: 1, 128>}, {pipeline_mode = #tpu.pipeline_mode<synchronous>, transform_indices = @transform_12, window_bounds = array<i64: 128, 128>}, {transform_indices = @transform_13, window_bounds = array<i64: 8, 1>}]} {
    %c0 = arith.constant 0 : index
    %c0_0 = arith.constant 0 : index
    %c0_1 = arith.constant 0 : index
    %0 = vector.load %arg1[%c0, %c0_0, %c0_1] : memref<8x8x128xf32, #tpu.memory_space<vmem>>, vector<8x8x128xf32>
    %1 = vector.shape_cast %0 : vector<8x8x128xf32> to vector<64x128xf32>
    %c0_2 = arith.constant 0 : index
    %c0_3 = arith.constant 0 : index
    %2 = vector.load %arg4[%c0_2, %c0_3] : memref<128x512xf32, #tpu.memory_space<vmem>>, vector<128x512xf32>
    %cst = arith.constant dense<0.000000e+00> : vector<64x512xf32>
    %3 = tpu.matmul %1, %2, %cst {dimension_numbers = #tpu.dot_dimension_numbers<[1], [0], [0], [1], [0, 0, 1, 1], [], []>} : vector<64x128xf32>, vector<128x512xf32>, vector<64x512xf32> -> vector<64x512xf32>
    %c0_4 = arith.constant 0 : index
    %c0_5 = arith.constant 0 : index
    %4 = vector.load %arg6[%c0_4, %c0_5] : memref<1x512xf32, #tpu.memory_space<vmem>>, vector<1x512xf32>
    %5 = vector.broadcast %4 : vector<1x512xf32> to vector<64x512xf32>
    %6 = arith.addf %3, %5 : vector<64x512xf32>
    %7 = vector.shape_cast %6 : vector<64x512xf32> to vector<8x8x512xf32>
    %c0_6 = arith.constant 0 : index
    %c0_7 = arith.constant 0 : index
    %c0_8 = arith.constant 0 : index
    %8 = vector.load %arg15[%c0_6, %c0_7, %c0_8] : memref<8x8x512xf32, #tpu.memory_space<vmem>>, vector<8x8x512xf32>
    tpu.vector_store %arg15[%c0_6, %c0_7, %c0_8], %7 {strides = array<i32>} : memref<8x8x512xf32, #tpu.memory_space<vmem>>, vector<8x8x512xf32>,
    %c0_9 = arith.constant 0 : index
    %c0_10 = arith.constant 0 : index
    %9 = vector.load %arg7[%c0_9, %c0_10] : memref<128x512xf32, #tpu.memory_space<vmem>>, vector<128x512xf32>
    %cst_11 = arith.constant dense<0.000000e+00> : vector<64x512xf32>
    %10 = tpu.matmul %1, %9, %cst_11 {dimension_numbers = #tpu.dot_dimension_numbers<[1], [0], [0], [1], [0, 0, 1, 1], [], []>} : vector<64x128xf32>, vector<128x512xf32>, vector<64x512xf32> -> vector<64x512xf32>
    %c0_12 = arith.constant 0 : index
    %c0_13 = arith.constant 0 : index
    %11 = vector.load %arg9[%c0_12, %c0_13] : memref<1x512xf32, #tpu.memory_space<vmem>>, vector<1x512xf32>
    %12 = vector.broadcast %11 : vector<1x512xf32> to vector<64x512xf32>
    %13 = arith.addf %10, %12 : vector<64x512xf32>
    %14 = vector.shape_cast %13 : vector<64x512xf32> to vector<8x8x512xf32>
    %c0_14 = arith.constant 0 : index
    %c0_15 = arith.constant 0 : index
    %c0_16 = arith.constant 0 : index
    %15 = vector.load %arg16[%c0_14, %c0_15, %c0_16] : memref<8x8x512xf32, #tpu.memory_space<vmem>>, vector<8x8x512xf32>
    tpu.vector_store %arg16[%c0_14, %c0_15, %c0_16], %14 {strides = array<i32>} : memref<8x8x512xf32, #tpu.memory_space<vmem>>, vector<8x8x512xf32>,
    %c0_17 = arith.constant 0 : index
    %c0_18 = arith.constant 0 : index
    %16 = vector.load %arg2[%c0_17, %c0_18] : memref<8x1xi32, #tpu.memory_space<vmem>>, vector<8x1xi32>
    %c0_19 = arith.constant 0 : index
    %c0_20 = arith.constant 0 : index
    %17 = vector.load %arg5[%c0_19, %c0_20] : memref<128x512xf32, #tpu.memory_space<vmem>>, vector<128x512xf32>
    %c0_21 = arith.constant 0 : index
    %c0_22 = arith.constant 0 : index
    %18 = vector.load %arg8[%c0_21, %c0_22] : memref<128x512xf32, #tpu.memory_space<vmem>>, vector<128x512xf32>
    %cst_23 = arith.constant 0.000000e+00 : f32
    %19 = vector.broadcast %cst_23 : f32 to vector<8x128xf32>
    %c0_i32 = arith.constant 0 : i32
    %c8_i32 = arith.constant 8 : i32
    %20 = arith.addi %c0_i32, %c8_i32 : i32
    %c1_i32 = arith.constant 1 : i32
    %21:2 = scf.for %arg20 = %c0_i32 to %20 step %c1_i32 iter_args(%arg21 = %19, %arg22 = %19) -> (vector<8x128xf32>, vector<8x128xf32>)  : i32 {
      %cst_69 = arith.constant dense<0.000000e+00> : vector<8x512xf32>
      %96 = tpu.matmul %arg21, %17, %cst_69 {dimension_numbers = #tpu.dot_dimension_numbers<[1], [0], [0], [1], [0, 0, 1, 1], [], []>} : vector<8x128xf32>, vector<128x512xf32>, vector<8x512xf32> -> vector<8x512xf32>
      %97 = arith.index_cast %arg20 : i32 to index
      %c0_70 = arith.constant 0 : index
      %c0_71 = arith.constant 0 : index
      %98 = vector.load %arg15[%97, %c0_70, %c0_71] : memref<8x8x512xf32, #tpu.memory_space<vmem>>, vector<1x8x512xf32>
      %99 = vector.shape_cast %98 : vector<1x8x512xf32> to vector<8x512xf32>
      %100 = arith.addf %96, %99 : vector<8x512xf32>
      %101 = vector.extract_strided_slice %100 {offsets = [0, 0], sizes = [8, 128], strides = [1, 1]} : vector<8x512xf32> to vector<8x128xf32>
      %102 = arith.negf %101 : vector<8x128xf32>
      %103 = math.exp %102 : vector<8x128xf32>
      %cst_72 = arith.constant 1.000000e+00 : f32
      %104 = vector.broadcast %cst_72 : f32 to vector<8x128xf32>
      %105 = arith.addf %104, %103 : vector<8x128xf32>
      %106 = arith.divf %104, %105 : vector<8x128xf32>
      %107 = vector.extract_strided_slice %100 {offsets = [0, 128], sizes = [8, 128], strides = [1, 1]} : vector<8x512xf32> to vector<8x128xf32>
      %108 = arith.negf %107 : vector<8x128xf32>
      %109 = math.exp %108 : vector<8x128xf32>
      %cst_73 = arith.constant 1.000000e+00 : f32
      %110 = vector.broadcast %cst_73 : f32 to vector<8x128xf32>
      %111 = arith.addf %110, %109 : vector<8x128xf32>
      %112 = arith.divf %110, %111 : vector<8x128xf32>
      %113 = vector.extract_strided_slice %100 {offsets = [0, 256], sizes = [8, 128], strides = [1, 1]} : vector<8x512xf32> to vector<8x128xf32>
      %114 = math.tanh %113 : vector<8x128xf32>
      %115 = vector.extract_strided_slice %100 {offsets = [0, 384], sizes = [8, 128], strides = [1, 1]} : vector<8x512xf32> to vector<8x128xf32>
      %116 = arith.negf %115 : vector<8x128xf32>
      %117 = math.exp %116 : vector<8x128xf32>
      %cst_74 = arith.constant 1.000000e+00 : f32
      %118 = vector.broadcast %cst_74 : f32 to vector<8x128xf32>
      %119 = arith.addf %118, %117 : vector<8x128xf32>
      %120 = arith.divf %118, %119 : vector<8x128xf32>
      %121 = arith.mulf %112, %arg22 : vector<8x128xf32>
      %122 = arith.mulf %106, %114 : vector<8x128xf32>
      %123 = arith.addf %121, %122 : vector<8x128xf32>
      %124 = math.tanh %123 : vector<8x128xf32>
      %125 = arith.mulf %120, %124 : vector<8x128xf32>
      %126 = vector.broadcast %arg20 : i32 to vector<8x1xi32>
      %127 = arith.cmpi sgt, %16, %126 : vector<8x1xi32>
      %128 = vector.shape_cast %127 : vector<8x1xi1> to vector<8x1xi1>
      %129 = vector.broadcast %128 : vector<8x1xi1> to vector<8x128xi1>
      %130 = arith.select %129, %125, %arg21 : vector<8x128xi1>, vector<8x128xf32>
      %131 = vector.shape_cast %127 : vector<8x1xi1> to vector<8x1xi1>
      %132 = vector.broadcast %131 : vector<8x1xi1> to vector<8x128xi1>
      %133 = arith.select %132, %123, %arg22 : vector<8x128xi1>, vector<8x128xf32>
      %134 = arith.extui %127 : vector<8x1xi1> to vector<8x1xi32>
      %135 = arith.sitofp %134 : vector<8x1xi32> to vector<8x1xf32>
      %136 = vector.broadcast %135 : vector<8x1xf32> to vector<8x128xf32>
      %137 = arith.mulf %130, %136 : vector<8x128xf32>
      %138 = arith.index_cast %arg20 : i32 to index
      %c0_75 = arith.constant 0 : index
      %c0_76 = arith.constant 0 : index
      %139 = vector.load %arg17[%138, %c0_75, %c0_76] : memref<8x8x128xf32, #tpu.memory_space<vmem>>, vector<1x8x128xf32>
      %140 = vector.shape_cast %139 : vector<1x8x128xf32> to vector<8x128xf32>
      %141 = vector.shape_cast %137 : vector<8x128xf32> to vector<1x8x128xf32>
      tpu.vector_store %arg17[%138, %c0_75, %c0_76], %141 {strides = array<i32>} : memref<8x8x128xf32, #tpu.memory_space<vmem>>, vector<1x8x128xf32>,
      scf.yield %130, %133 : vector<8x128xf32>, vector<8x128xf32>
    }
    %c8_i32_24 = arith.constant 8 : i32
    %c0_i32_25 = arith.constant 0 : i32
    %c8_i32_26 = arith.constant 8 : i32
    %22 = arith.addi %c0_i32_25, %c8_i32_26 : i32
    %c1_i32_27 = arith.constant 1 : i32
    %23:2 = scf.for %arg20 = %c0_i32_25 to %22 step %c1_i32_27 iter_args(%arg21 = %19, %arg22 = %19) -> (vector<8x128xf32>, vector<8x128xf32>)  : i32 {
      %c7_i32_69 = arith.constant 7 : i32
      %96 = arith.subi %c7_i32_69, %arg20 : i32
      %cst_70 = arith.constant dense<0.000000e+00> : vector<8x512xf32>
      %97 = tpu.matmul %arg21, %18, %cst_70 {dimension_numbers = #tpu.dot_dimension_numbers<[1], [0], [0], [1], [0, 0, 1, 1], [], []>} : vector<8x128xf32>, vector<128x512xf32>, vector<8x512xf32> -> vector<8x512xf32>
      %98 = arith.index_cast %96 : i32 to index
      %c0_71 = arith.constant 0 : index
      %c0_72 = arith.constant 0 : index
      %99 = vector.load %arg16[%98, %c0_71, %c0_72] : memref<8x8x512xf32, #tpu.memory_space<vmem>>, vector<1x8x512xf32>
      %100 = vector.shape_cast %99 : vector<1x8x512xf32> to vector<8x512xf32>
      %101 = arith.addf %97, %100 : vector<8x512xf32>
      %102 = vector.extract_strided_slice %101 {offsets = [0, 0], sizes = [8, 128], strides = [1, 1]} : vector<8x512xf32> to vector<8x128xf32>
      %103 = arith.negf %102 : vector<8x128xf32>
      %104 = math.exp %103 : vector<8x128xf32>
      %cst_73 = arith.constant 1.000000e+00 : f32
      %105 = vector.broadcast %cst_73 : f32 to vector<8x128xf32>
      %106 = arith.addf %105, %104 : vector<8x128xf32>
      %107 = arith.divf %105, %106 : vector<8x128xf32>
      %108 = vector.extract_strided_slice %101 {offsets = [0, 128], sizes = [8, 128], strides = [1, 1]} : vector<8x512xf32> to vector<8x128xf32>
      %109 = arith.negf %108 : vector<8x128xf32>
      %110 = math.exp %109 : vector<8x128xf32>
      %cst_74 = arith.constant 1.000000e+00 : f32
      %111 = vector.broadcast %cst_74 : f32 to vector<8x128xf32>
      %112 = arith.addf %111, %110 : vector<8x128xf32>
      %113 = arith.divf %111, %112 : vector<8x128xf32>
      %114 = vector.extract_strided_slice %101 {offsets = [0, 256], sizes = [8, 128], strides = [1, 1]} : vector<8x512xf32> to vector<8x128xf32>
      %115 = math.tanh %114 : vector<8x128xf32>
      %116 = vector.extract_strided_slice %101 {offsets = [0, 384], sizes = [8, 128], strides = [1, 1]} : vector<8x512xf32> to vector<8x128xf32>
      %117 = arith.negf %116 : vector<8x128xf32>
      %118 = math.exp %117 : vector<8x128xf32>
      %cst_75 = arith.constant 1.000000e+00 : f32
      %119 = vector.broadcast %cst_75 : f32 to vector<8x128xf32>
      %120 = arith.addf %119, %118 : vector<8x128xf32>
      %121 = arith.divf %119, %120 : vector<8x128xf32>
      %122 = arith.mulf %113, %arg22 : vector<8x128xf32>
      %123 = arith.mulf %107, %115 : vector<8x128xf32>
      %124 = arith.addf %122, %123 : vector<8x128xf32>
      %125 = math.tanh %124 : vector<8x128xf32>
      %126 = arith.mulf %121, %125 : vector<8x128xf32>
      %127 = vector.broadcast %96 : i32 to vector<8x1xi32>
      %128 = arith.cmpi sgt, %16, %127 : vector<8x1xi32>
      %129 = vector.shape_cast %128 : vector<8x1xi1> to vector<8x1xi1>
      %130 = vector.broadcast %129 : vector<8x1xi1> to vector<8x128xi1>
      %131 = arith.select %130, %126, %arg21 : vector<8x128xi1>, vector<8x128xf32>
      %132 = vector.shape_cast %128 : vector<8x1xi1> to vector<8x1xi1>
      %133 = vector.broadcast %132 : vector<8x1xi1> to vector<8x128xi1>
      %134 = arith.select %133, %124, %arg22 : vector<8x128xi1>, vector<8x128xf32>
      %135 = arith.extui %128 : vector<8x1xi1> to vector<8x1xi32>
      %136 = arith.sitofp %135 : vector<8x1xi32> to vector<8x1xf32>
      %137 = vector.broadcast %136 : vector<8x1xf32> to vector<8x128xf32>
      %138 = arith.mulf %131, %137 : vector<8x128xf32>
      %139 = arith.index_cast %96 : i32 to index
      %c0_76 = arith.constant 0 : index
      %c0_77 = arith.constant 0 : index
      %140 = vector.load %arg18[%139, %c0_76, %c0_77] : memref<8x8x128xf32, #tpu.memory_space<vmem>>, vector<1x8x128xf32>
      %141 = vector.shape_cast %140 : vector<1x8x128xf32> to vector<8x128xf32>
      %142 = vector.shape_cast %138 : vector<8x128xf32> to vector<1x8x128xf32>
      tpu.vector_store %arg18[%139, %c0_76, %c0_77], %142 {strides = array<i32>} : memref<8x8x128xf32, #tpu.memory_space<vmem>>, vector<1x8x128xf32>,
      scf.yield %131, %134 : vector<8x128xf32>, vector<8x128xf32>
    }
    %c8_i32_28 = arith.constant 8 : i32
    %c0_29 = arith.constant 0 : index
    %c0_30 = arith.constant 0 : index
    %c0_31 = arith.constant 0 : index
    %24 = vector.load %arg17[%c0_29, %c0_30, %c0_31] : memref<8x8x128xf32, #tpu.memory_space<vmem>>, vector<8x8x128xf32>
    %25 = vector.shape_cast %24 : vector<8x8x128xf32> to vector<64x128xf32>
    %c0_32 = arith.constant 0 : index
    %c0_33 = arith.constant 0 : index
    %26 = vector.load %arg10[%c0_32, %c0_33] : memref<128x128xf32, #tpu.memory_space<vmem>>, vector<128x128xf32>
    %cst_34 = arith.constant dense<0.000000e+00> : vector<64x128xf32>
    %27 = tpu.matmul %25, %26, %cst_34 {dimension_numbers = #tpu.dot_dimension_numbers<[1], [0], [0], [1], [0, 0, 1, 1], [], []>} : vector<64x128xf32>, vector<128x128xf32>, vector<64x128xf32> -> vector<64x128xf32>
    %c0_35 = arith.constant 0 : index
    %c0_36 = arith.constant 0 : index
    %c0_37 = arith.constant 0 : index
    %28 = vector.load %arg18[%c0_35, %c0_36, %c0_37] : memref<8x8x128xf32, #tpu.memory_space<vmem>>, vector<8x8x128xf32>
    %29 = vector.shape_cast %28 : vector<8x8x128xf32> to vector<64x128xf32>
    %c0_38 = arith.constant 0 : index
    %c0_39 = arith.constant 0 : index
    %30 = vector.load %arg11[%c0_38, %c0_39] : memref<128x128xf32, #tpu.memory_space<vmem>>, vector<128x128xf32>
    %cst_40 = arith.constant dense<0.000000e+00> : vector<64x128xf32>
    %31 = tpu.matmul %29, %30, %cst_40 {dimension_numbers = #tpu.dot_dimension_numbers<[1], [0], [0], [1], [0, 0, 1, 1], [], []>} : vector<64x128xf32>, vector<128x128xf32>, vector<64x128xf32> -> vector<64x128xf32>
    %32 = arith.addf %27, %31 : vector<64x128xf32>
    %c0_41 = arith.constant 0 : index
    %c0_42 = arith.constant 0 : index
    %33 = vector.load %arg12[%c0_41, %c0_42] : memref<1x128xf32, #tpu.memory_space<vmem>>, vector<1x128xf32>
    %34 = vector.broadcast %33 : vector<1x128xf32> to vector<64x128xf32>
    %35 = arith.addf %32, %34 : vector<64x128xf32>
    %36 = vector.shape_cast %35 : vector<64x128xf32> to vector<8x8x128xf32>
    %c0_43 = arith.constant 0 : index
    %c0_44 = arith.constant 0 : index
    %c0_45 = arith.constant 0 : index
    %37 = vector.load %arg19[%c0_43, %c0_44, %c0_45] : memref<8x8x128xf32, #tpu.memory_space<vmem>>, vector<8x8x128xf32>
    tpu.vector_store %arg19[%c0_43, %c0_44, %c0_45], %36 {strides = array<i32>} : memref<8x8x128xf32, #tpu.memory_space<vmem>>, vector<8x8x128xf32>,
    %c0_46 = arith.constant 0 : index
    %c0_47 = arith.constant 0 : index
    %38 = vector.load %arg13[%c0_46, %c0_47] : memref<128x128xf32, #tpu.memory_space<vmem>>, vector<128x128xf32>
    %c0_48 = arith.constant 0 : index
    %c0_49 = arith.constant 0 : index
    %39 = vector.load %arg3[%c0_48, %c0_49] : memref<8x8xi32, #tpu.memory_space<vmem>>, vector<8x8xi32>
    %40 = arith.sitofp %39 : vector<8x8xi32> to vector<8x8xf32>
    %41 = tpu.transpose %40, [1, 0] : vector<8x8xf32> -> vector<8x8xf32>
    %42 = tpu.iota {dimensions = array<i32: 2>} : vector<8x8x128xi32>
    %43 = arith.sitofp %42 : vector<8x8x128xi32> to vector<8x8x128xf32>
    %44 = vector.shape_cast %41 : vector<8x8xf32> to vector<8x8x1xf32>
    %45 = vector.broadcast %44 : vector<8x8x1xf32> to vector<8x8x128xf32>
    %46 = arith.cmpf oeq, %43, %45 : vector<8x8x128xf32>
    %47 = arith.extui %46 : vector<8x8x128xi1> to vector<8x8x128xi32>
    %48 = arith.sitofp %47 : vector<8x8x128xi32> to vector<8x8x128xf32>
    %c0_50 = arith.constant 0 : index
    %c0_51 = arith.constant 0 : index
    %c0_52 = arith.constant 0 : index
    %49 = vector.load %arg19[%c0_50, %c0_51, %c0_52] : memref<8x8x128xf32, #tpu.memory_space<vmem>>, vector<8x8x128xf32>
    %50 = arith.mulf %49, %48 : vector<8x8x128xf32>
    %cst_53 = arith.constant dense<0.000000e+00> : vector<8x8xf32>
    %51 = vector.multi_reduction <add>, %50, %cst_53 [2] : vector<8x8x128xf32> to vector<8x8xf32>
    %52 = tpu.transpose %51, [1, 0] : vector<8x8xf32> -> vector<8x8xf32>
    %53 = vector.extract_strided_slice %48 {offsets = [0, 0, 0], sizes = [7, 8, 128], strides = [1, 1, 1]} : vector<8x8x128xf32> to vector<7x8x128xf32>
    %54 = vector.shape_cast %53 : vector<7x8x128xf32> to vector<56x128xf32>
    %cst_54 = arith.constant dense<0.000000e+00> : vector<56x128xf32>
    %55 = tpu.matmul %54, %38, %cst_54 {dimension_numbers = #tpu.dot_dimension_numbers<[1], [0], [0], [1], [0, 0, 1, 1], [], []>} : vector<56x128xf32>, vector<128x128xf32>, vector<56x128xf32> -> vector<56x128xf32>
    %56 = vector.shape_cast %55 : vector<56x128xf32> to vector<7x8x128xf32>
    %57 = vector.extract_strided_slice %48 {offsets = [1, 0, 0], sizes = [7, 8, 128], strides = [1, 1, 1]} : vector<8x8x128xf32> to vector<7x8x128xf32>
    %58 = arith.mulf %56, %57 : vector<7x8x128xf32>
    %cst_55 = arith.constant dense<0.000000e+00> : vector<7x8xf32>
    %59 = vector.multi_reduction <add>, %58, %cst_55 [2] : vector<7x8x128xf32> to vector<7x8xf32>
    %60 = tpu.transpose %59, [1, 0] : vector<7x8xf32> -> vector<8x7xf32>
    %61 = tpu.iota {dimensions = array<i32: 1>} : vector<8x8xi32>
    %62 = vector.broadcast %16 : vector<8x1xi32> to vector<8x8xi32>
    %63 = arith.cmpi slt, %61, %62 : vector<8x8xi32>
    %64 = arith.extui %63 : vector<8x8xi1> to vector<8x8xi32>
    %65 = arith.sitofp %64 : vector<8x8xi32> to vector<8x8xf32>
    %66 = tpu.iota {dimensions = array<i32: 1>} : vector<8x7xi32>
    %c1_i32_56 = arith.constant 1 : i32
    %67 = vector.broadcast %c1_i32_56 : i32 to vector<8x7xi32>
    %68 = arith.addi %66, %67 : vector<8x7xi32>
    %69 = vector.broadcast %16 : vector<8x1xi32> to vector<8x7xi32>
    %70 = arith.cmpi slt, %68, %69 : vector<8x7xi32>
    %71 = arith.extui %70 : vector<8x7xi1> to vector<8x7xi32>
    %72 = arith.sitofp %71 : vector<8x7xi32> to vector<8x7xf32>
    %73 = arith.mulf %52, %65 : vector<8x8xf32>
    %cst_57 = arith.constant dense<0.000000e+00> : vector<8xf32>
    %74 = vector.multi_reduction <add>, %73, %cst_57 [1] : vector<8x8xf32> to vector<8xf32>
    %75 = vector.shape_cast %74 : vector<8xf32> to vector<8x1xf32>
    %76 = arith.mulf %60, %72 : vector<8x7xf32>
    %cst_58 = arith.constant dense<0.000000e+00> : vector<8xf32>
    %77 = vector.multi_reduction <add>, %76, %cst_58 [1] : vector<8x7xf32> to vector<8xf32>
    %78 = vector.shape_cast %77 : vector<8xf32> to vector<8x1xf32>
    %79 = arith.addf %75, %78 : vector<8x1xf32>
    %80 = vector.shape_cast %38 : vector<128x128xf32> to vector<1x128x128xf32>
    %c0_59 = arith.constant 0 : index
    %c0_60 = arith.constant 0 : index
    %c0_61 = arith.constant 0 : index
    %81 = vector.load %arg19[%c0_59, %c0_60, %c0_61] : memref<8x8x128xf32, #tpu.memory_space<vmem>>, vector<1x8x128xf32>
    %82 = vector.shape_cast %81 : vector<1x8x128xf32> to vector<8x128xf32>
    %c1_i32_62 = arith.constant 1 : i32
    %c7_i32 = arith.constant 7 : i32
    %83 = arith.addi %c1_i32_62, %c7_i32 : i32
    %c1_i32_63 = arith.constant 1 : i32
    %84 = scf.for %arg20 = %c1_i32_62 to %83 step %c1_i32_63 iter_args(%arg21 = %82) -> (vector<8x128xf32>)  : i32 {
      %96 = arith.index_cast %arg20 : i32 to index
      %c0_69 = arith.constant 0 : index
      %c0_70 = arith.constant 0 : index
      %97 = vector.load %arg19[%96, %c0_69, %c0_70] : memref<8x8x128xf32, #tpu.memory_space<vmem>>, vector<1x8x128xf32>
      %98 = vector.shape_cast %97 : vector<1x8x128xf32> to vector<8x128xf32>
      %99 = vector.shape_cast %arg21 : vector<8x128xf32> to vector<8x128x1xf32>
      %100 = vector.broadcast %99 : vector<8x128x1xf32> to vector<8x128x128xf32>
      %101 = vector.broadcast %80 : vector<1x128x128xf32> to vector<8x128x128xf32>
      %102 = arith.addf %100, %101 : vector<8x128x128xf32>
      %103 = vector.shape_cast %98 : vector<8x128xf32> to vector<8x1x128xf32>
      %104 = vector.broadcast %103 : vector<8x1x128xf32> to vector<8x128x128xf32>
      %105 = arith.addf %102, %104 : vector<8x128x128xf32>
      %cst_71 = arith.constant dense<0xFF800000> : vector<8x128xf32>
      %106 = vector.multi_reduction <maximumf>, %105, %cst_71 [1] : vector<8x128x128xf32> to vector<8x128xf32>
      %107 = vector.shape_cast %106 : vector<8x128xf32> to vector<8x1x128xf32>
      %108 = vector.broadcast %107 : vector<8x1x128xf32> to vector<8x128x128xf32>
      %109 = arith.subf %105, %108 : vector<8x128x128xf32>
      %110 = math.exp %109 : vector<8x128x128xf32>
      %cst_72 = arith.constant dense<0.000000e+00> : vector<8x128xf32>
      %111 = vector.multi_reduction <add>, %110, %cst_72 [1] : vector<8x128x128xf32> to vector<8x128xf32>
      %112 = math.log %111 : vector<8x128xf32>
      %113 = arith.addf %106, %112 : vector<8x128xf32>
      %114 = vector.broadcast %arg20 : i32 to vector<8x1xi32>
      %115 = arith.cmpi sgt, %16, %114 : vector<8x1xi32>
      %116 = vector.shape_cast %115 : vector<8x1xi1> to vector<8x1xi1>
      %117 = vector.broadcast %116 : vector<8x1xi1> to vector<8x128xi1>
      %118 = arith.select %117, %113, %arg21 : vector<8x128xi1>, vector<8x128xf32>
      scf.yield %118 : vector<8x128xf32>
    }
    %c7_i32_64 = arith.constant 7 : i32
    %cst_65 = arith.constant dense<0xFF800000> : vector<8xf32>
    %85 = vector.multi_reduction <maximumf>, %84, %cst_65 [1] : vector<8x128xf32> to vector<8xf32>
    %86 = vector.shape_cast %85 : vector<8xf32> to vector<8x1xf32>
    %87 = vector.broadcast %86 : vector<8x1xf32> to vector<8x128xf32>
    %88 = arith.subf %84, %87 : vector<8x128xf32>
    %89 = math.exp %88 : vector<8x128xf32>
    %cst_66 = arith.constant dense<0.000000e+00> : vector<8xf32>
    %90 = vector.multi_reduction <add>, %89, %cst_66 [1] : vector<8x128xf32> to vector<8xf32>
    %91 = vector.shape_cast %90 : vector<8xf32> to vector<8x1xf32>
    %92 = math.log %91 : vector<8x1xf32>
    %93 = arith.addf %86, %92 : vector<8x1xf32>
    %94 = arith.subf %93, %79 : vector<8x1xf32>
    %c0_67 = arith.constant 0 : index
    %c0_68 = arith.constant 0 : index
    %95 = vector.load %arg14[%c0_67, %c0_68] : memref<8x1xf32, #tpu.memory_space<vmem>>, vector<8x1xf32>
    tpu.vector_store %arg14[%c0_67, %c0_68], %94 {strides = array<i32>} : memref<8x1xf32, #tpu.memory_space<vmem>>, vector<8x1xf32>,
    return
  }
  func.func @transform_0(%arg0: i32) -> (i32, i32, i32) {
    %c0_i32 = arith.constant 0 : i32
    %c0_i32_0 = arith.constant 0 : i32
    %c0_i32_1 = arith.constant 0 : i32
    return %c0_i32, %arg0, %c0_i32_0 : i32, i32, i32
  }
  func.func @transform_1(%arg0: i32) -> (i32, i32) {
    %c0_i32 = arith.constant 0 : i32
    %c0_i32_0 = arith.constant 0 : i32
    return %arg0, %c0_i32 : i32, i32
  }
  func.func @transform_2(%arg0: i32) -> (i32, i32) {
    %c0_i32 = arith.constant 0 : i32
    %c0_i32_0 = arith.constant 0 : i32
    return %arg0, %c0_i32 : i32, i32
  }
  func.func @transform_3(%arg0: i32) -> (i32, i32) {
    %c0_i32 = arith.constant 0 : i32
    %c0_i32_0 = arith.constant 0 : i32
    %c0_i32_1 = arith.constant 0 : i32
    return %c0_i32, %c0_i32_0 : i32, i32
  }
  func.func @transform_4(%arg0: i32) -> (i32, i32) {
    %c0_i32 = arith.constant 0 : i32
    %c0_i32_0 = arith.constant 0 : i32
    %c0_i32_1 = arith.constant 0 : i32
    return %c0_i32, %c0_i32_0 : i32, i32
  }
  func.func @transform_5(%arg0: i32) -> (i32, i32) {
    %c0_i32 = arith.constant 0 : i32
    %c0_i32_0 = arith.constant 0 : i32
    %c0_i32_1 = arith.constant 0 : i32
    return %c0_i32, %c0_i32_0 : i32, i32
  }
  func.func @transform_6(%arg0: i32) -> (i32, i32) {
    %c0_i32 = arith.constant 0 : i32
    %c0_i32_0 = arith.constant 0 : i32
    %c0_i32_1 = arith.constant 0 : i32
    return %c0_i32, %c0_i32_0 : i32, i32
  }
  func.func @transform_7(%arg0: i32) -> (i32, i32) {
    %c0_i32 = arith.constant 0 : i32
    %c0_i32_0 = arith.constant 0 : i32
    %c0_i32_1 = arith.constant 0 : i32
    return %c0_i32, %c0_i32_0 : i32, i32
  }
  func.func @transform_8(%arg0: i32) -> (i32, i32) {
    %c0_i32 = arith.constant 0 : i32
    %c0_i32_0 = arith.constant 0 : i32
    %c0_i32_1 = arith.constant 0 : i32
    return %c0_i32, %c0_i32_0 : i32, i32
  }
  func.func @transform_9(%arg0: i32) -> (i32, i32) {
    %c0_i32 = arith.constant 0 : i32
    %c0_i32_0 = arith.constant 0 : i32
    %c0_i32_1 = arith.constant 0 : i32
    return %c0_i32, %c0_i32_0 : i32, i32
  }
  func.func @transform_10(%arg0: i32) -> (i32, i32) {
    %c0_i32 = arith.constant 0 : i32
    %c0_i32_0 = arith.constant 0 : i32
    %c0_i32_1 = arith.constant 0 : i32
    return %c0_i32, %c0_i32_0 : i32, i32
  }
  func.func @transform_11(%arg0: i32) -> (i32, i32) {
    %c0_i32 = arith.constant 0 : i32
    %c0_i32_0 = arith.constant 0 : i32
    %c0_i32_1 = arith.constant 0 : i32
    return %c0_i32, %c0_i32_0 : i32, i32
  }
  func.func @transform_12(%arg0: i32) -> (i32, i32) {
    %c0_i32 = arith.constant 0 : i32
    %c0_i32_0 = arith.constant 0 : i32
    %c0_i32_1 = arith.constant 0 : i32
    return %c0_i32, %c0_i32_0 : i32, i32
  }
  func.func @transform_13(%arg0: i32) -> (i32, i32) {
    %c0_i32 = arith.constant 0 : i32
    %c0_i32_0 = arith.constant 0 : i32
    return %arg0, %c0_i32 : i32, i32
  }
}

</mosaic_0001>

<bundles_post_ra>
// kernel: bilstm_crf_forward.1
= control target key start
LH: loop header
LB: loop body
LE: loop exit
PB: predicated region body
PF: predicated region fallthrough
CT: control target
= control target key end

     0   :  { %v8003_v3 = vmov 0.0   ;;  %s7989_s2 = inlined_call_operand.vmem [shape: s32[8,8], index: 2, kind: input, shape index: {}]   ;;  %s7990_s3 = inlined_call_operand.vmem [shape: f32[128,512], index: 3, kind: input, shape index: {}]   ;;  %s7991_s9 = inlined_call_operand.vmem [shape: f32[128,128], index: 9, kind: input, shape index: {}]   ;;  %s7992_s10 = inlined_call_operand.vmem [shape: f32[128,128], index: 10, kind: input, shape index: {}]   ;;  %s7993_s11 = inlined_call_operand.vmem [shape: f32[1,128], index: 11, kind: input, shape index: {}]   ;;  %s7994_s12 = inlined_call_operand.vmem [shape: f32[128,128], index: 12, kind: input, shape index: {}]   ;;  %s7995_s13 = inlined_call_operand.vmem [shape: f32[8,1], index: 13, kind: output, shape index: {}]   ;;  %s7996_s6 = inlined_call_operand.vmem [shape: f32[128,512], index: 6, kind: input, shape index: {}]   ;;  %s7997_s0 = inlined_call_operand.vmem [shape: f32[8,8,128], index: 0, kind: input, shape index: {}]   ;;  %s7998_s1 = inlined_call_operand.vmem [shape: s32[8,1], index: 1, kind: input, shape index: {}]   ;;  %s7999_s4 = inlined_call_operand.vmem [shape: f32[128,512], index: 4, kind: input, shape index: {}]   ;;  %s8000_s7 = inlined_call_operand.vmem [shape: f32[128,512], index: 7, kind: input, shape index: {}]   ;;  %s8001_s5 = inlined_call_operand.vmem [shape: f32[1,512], index: 5, kind: input, shape index: {}]   ;;  %s8002_s8 = inlined_call_operand.vmem [shape: f32[1,512], index: 8, kind: input, shape index: {}]  }
   0x1   :  { %v53_v0 = vld [vmem:[%s7990_s3 + $0x8] sm:$0xff]  ;;  %v55_v2 = vld [vmem:[%s7990_s3 + $0x18] sm:$0xff]  ;;  %202 = vmatprep.mubr.f32.mxu0 %v8003_v3  ;;  %315 = vmatprep.mubr.f32.mxu1 %v8003_v3  ;;  %v52_v6 = vld [vmem:[%s7990_s3] sm:$0xff] }
   0x2   :  { %v57_v1 = vld [vmem:[%s7990_s3 + $0x28] sm:$0xff]  ;;  %v59_v5 = vld [vmem:[%s7990_s3 + $0x38] sm:$0xff]  ;;  %v56_v7 = vld [vmem:[%s7990_s3 + $0x20] sm:$0xff] }
   0x3   :  { %v3984_v4 = vpack.c.bf16 %v57_v1, %v53_v0  ;;  %v4016_v8 = vpack.c.bf16 %v59_v5, %v55_v2  ;;  %v3986_v9 = vpack.c.bf16 %v56_v7, %v52_v6  ;;  %v54_v10 = vld [vmem:[%s7990_s3 + $0x10] sm:$0xff]  ;;  %v61_v12 = vld [vmem:[%s7990_s3 + $0x48] sm:$0xff]  ;;  %v63_v15 = vld [vmem:[%s7990_s3 + $0x58] sm:$0xff] }
   0x4   :  { %v58_v11 = vld [vmem:[%s7990_s3 + $0x30] sm:$0xff]  ;;  %v65_v14 = vld [vmem:[%s7990_s3 + $0x68] sm:$0xff]  ;;  %v67_v16 = vld [vmem:[%s7990_s3 + $0x78] sm:$0xff] }
   0x5   :  { %3985 = vmatprep.subr.bf16.mxu0 %v3984_v4  ;;  %v4018_v13 = vpack.c.bf16 %v58_v11, %v54_v10  ;;  %4017 = vmatprep.subr.bf16.mxu1 %v4016_v8  ;;  %v3988_v17 = vpack.c.bf16 %v65_v14, %v61_v12  ;;  %v4020_v18 = vpack.c.bf16 %v67_v16, %v63_v15  ;;  %v60_v19 = vld [vmem:[%s7990_s3 + $0x40] sm:$0xff]  ;;  %v62_v21 = vld [vmem:[%s7990_s3 + $0x50] sm:$0xff]  ;;  %v69_v24 = vld [vmem:[%s7990_s3 + $0x88] sm:$0xff] }
   0x6   :  { %3987 = vmatpush1.bf16.msra.mxu0 %v3986_v9  ;;  %v64_v20 = vld [vmem:[%s7990_s3 + $0x60] sm:$0xff]  ;;  %v66_v23 = vld [vmem:[%s7990_s3 + $0x70] sm:$0xff]  ;;  %v73_v25 = vld [vmem:[%s7990_s3 + $0xa8] sm:$0xff] }
   0x7   :  { %4019 = vmatpush1.bf16.msra.mxu1 %v4018_v13  ;;  %v3990_v22 = vpack.c.bf16 %v64_v20, %v60_v19  ;;  %3989 = vmatprep.subr.bf16.mxu0 %v3988_v17  ;;  %v4022_v26 = vpack.c.bf16 %v66_v23, %v62_v21  ;;  %v3992_v27 = vpack.c.bf16 %v73_v25, %v69_v24  ;;  %v71_v28 = vld [vmem:[%s7990_s3 + $0x98] sm:$0xff]  ;;  %v68_v30 = vld [vmem:[%s7990_s3 + $0x80] sm:$0xff]  ;;  %v70_v33 = vld [vmem:[%s7990_s3 + $0x90] sm:$0xff] }
   0x8   :  { %4021 = vmatprep.subr.bf16.mxu1 %v4020_v18  ;;  %v75_v29 = vld [vmem:[%s7990_s3 + $0xb8] sm:$0xff]  ;;  %v72_v32 = vld [vmem:[%s7990_s3 + $0xa0] sm:$0xff]  ;;  %v74_v34 = vld [vmem:[%s7990_s3 + $0xb0] sm:$0xff] }
   0x9   :  { %v4024_v31 = vpack.c.bf16 %v75_v29, %v71_v28  ;;  %v3994_v35 = vpack.c.bf16 %v72_v32, %v68_v30  ;;  %v77_v36 = vld [vmem:[%s7990_s3 + $0xc8] sm:$0xff]  ;;  %v79_v38 = vld [vmem:[%s7990_s3 + $0xd8] sm:$0xff]  ;;  %v4026_v39 = vpack.c.bf16 %v74_v34, %v70_v33  ;;  %v76_v42 = vld [vmem:[%s7990_s3 + $0xc0] sm:$0xff] }
   0xa   :  { %3991 = vmatpush1.bf16.msra.mxu0 %v3990_v22  ;;  %v81_v37 = vld [vmem:[%s7990_s3 + $0xe8] sm:$0xff]  ;;  %v83_v41 = vld [vmem:[%s7990_s3 + $0xf8] sm:$0xff]  ;;  %v80_v43 = vld [vmem:[%s7990_s3 + $0xe0] sm:$0xff] }
   0xb   :  { %4023 = vmatpush1.bf16.msra.mxu1 %v4022_v26  ;;  %3993 = vmatprep.subr.bf16.mxu0 %v3992_v27  ;;  %v3996_v40 = vpack.c.bf16 %v81_v37, %v77_v36  ;;  %v4028_v44 = vpack.c.bf16 %v83_v41, %v79_v38  ;;  %v78_v45 = vld [vmem:[%s7990_s3 + $0xd0] sm:$0xff]  ;;  %v85_v47 = vld [vmem:[%s7990_s3 + $0x108] sm:$0xff]  ;;  %v87_v49 = vld [vmem:[%s7990_s3 + $0x118] sm:$0xff]  ;;  %v3998_v51 = vpack.c.bf16 %v80_v43, %v76_v42 }
   0xc   :  { %4025 = vmatprep.subr.bf16.mxu1 %v4024_v31  ;;  %v82_v46 = vld [vmem:[%s7990_s3 + $0xf0] sm:$0xff]  ;;  %v89_v48 = vld [vmem:[%s7990_s3 + $0x128] sm:$0xff]  ;;  %v91_v50 = vld [vmem:[%s7990_s3 + $0x138] sm:$0xff] }
   0xd   :  { %v4030_v52 = vpack.c.bf16 %v82_v46, %v78_v45  ;;  %v4000_v53 = vpack.c.bf16 %v89_v48, %v85_v47  ;;  %v84_v54 = vld [vmem:[%s7990_s3 + $0x100] sm:$0xff]  ;;  %v86_v56 = vld [vmem:[%s7990_s3 + $0x110] sm:$0xff]  ;;  %v4032_v57 = vpack.c.bf16 %v91_v50, %v87_v49  ;;  %v93_v59 = vld [vmem:[%s7990_s3 + $0x148] sm:$0xff] }
   0xe   :  { %3995 = vmatpush1.bf16.msra.mxu0 %v3994_v35  ;;  %v88_v55 = vld [vmem:[%s7990_s3 + $0x120] sm:$0xff]  ;;  %v90_v58 = vld [vmem:[%s7990_s3 + $0x130] sm:$0xff]  ;;  %v97_v60 = vld [vmem:[%s7990_s3 + $0x168] sm:$0xff] }
   0xf   :  { %4027 = vmatpush1.bf16.msra.mxu1 %v4026_v39  ;;  %3997 = vmatprep.subr.bf16.mxu0 %v3996_v40  ;;  %v95_v61 = vld [vmem:[%s7990_s3 + $0x158] sm:$0xff]  ;;  %v4002_v63 = vpack.c.bf16 %v88_v55, %v84_v54  ;;  %v4034_v0 = vpack.c.bf16 %v90_v58, %v86_v56  ;;  %v4004_v1 = vpack.c.bf16 %v97_v60, %v93_v59  ;;  %v92_v2 = vld [vmem:[%s7990_s3 + $0x140] sm:$0xff]  ;;  %v94_v5 = vld [vmem:[%s7990_s3 + $0x150] sm:$0xff] }
  0x10   :  { %4029 = vmatprep.subr.bf16.mxu1 %v4028_v44  ;;  %v99_v62 = vld [vmem:[%s7990_s3 + $0x178] sm:$0xff]  ;;  %v96_v4 = vld [vmem:[%s7990_s3 + $0x160] sm:$0xff]  ;;  %v98_v7 = vld [vmem:[%s7990_s3 + $0x170] sm:$0xff] }
  0x11   :  { %v4036_v6 = vpack.c.bf16 %v99_v62, %v95_v61  ;;  %v101_v8 = vld [vmem:[%s7990_s3 + $0x188] sm:$0xff]  ;;  %v103_v10 = vld [vmem:[%s7990_s3 + $0x198] sm:$0xff]  ;;  %v4006_v12 = vpack.c.bf16 %v96_v4, %v92_v2  ;;  %v4038_v13 = vpack.c.bf16 %v98_v7, %v94_v5  ;;  %v100_v15 = vld [vmem:[%s7990_s3 + $0x180] sm:$0xff] }
  0x12   :  { %3999 = vmatpush1.bf16.msra.mxu0 %v3998_v51  ;;  %v105_v9 = vld [vmem:[%s7990_s3 + $0x1a8] sm:$0xff]  ;;  %v107_v11 = vld [vmem:[%s7990_s3 + $0x1b8] sm:$0xff]  ;;  %v104_v16 = vld [vmem:[%s7990_s3 + $0x1a0] sm:$0xff] }
  0x13   :  { %4031 = vmatpush1.bf16.msra.mxu1 %v4030_v52  ;;  %4001 = vmatprep.subr.bf16.mxu0 %v4000_v53  ;;  %v4008_v14 = vpack.c.bf16 %v105_v9, %v101_v8  ;;  %v102_v17 = vld [vmem:[%s7990_s3 + $0x190] sm:$0xff]  ;;  %v4040_v18 = vpack.c.bf16 %v107_v11, %v103_v10  ;;  %v109_v20 = vld [vmem:[%s7990_s3 + $0x1c8] sm:$0xff]  ;;  %v111_v22 = vld [vmem:[%s7990_s3 + $0x1d8] sm:$0xff]  ;;  %v4010_v24 = vpack.c.bf16 %v104_v16, %v100_v15 }
  0x14   :  { %4033 = vmatprep.subr.bf16.mxu1 %v4032_v57  ;;  %v106_v19 = vld [vmem:[%s7990_s3 + $0x1b0] sm:$0xff]  ;;  %v113_v21 = vld [vmem:[%s7990_s3 + $0x1e8] sm:$0xff]  ;;  %v115_v23 = vld [vmem:[%s7990_s3 + $0x1f8] sm:$0xff] }
  0x15   :  { %v4042_v25 = vpack.c.bf16 %v106_v19, %v102_v17  ;;  %v4012_v26 = vpack.c.bf16 %v113_v21, %v109_v20  ;;  %v108_v27 = vld [vmem:[%s7990_s3 + $0x1c0] sm:$0xff]  ;;  %v110_v29 = vld [vmem:[%s7990_s3 + $0x1d0] sm:$0xff]  ;;  %v4044_v30 = vpack.c.bf16 %v115_v23, %v111_v22  ;;  %v397_v32 = vld [vmem:[%s7996_s6 + $0x8] sm:$0xff] }
  0x16   :  { %4003 = vmatpush1.bf16.msra.mxu0 %v4002_v63  ;;  %v112_v28 = vld [vmem:[%s7990_s3 + $0x1e0] sm:$0xff]  ;;  %v114_v31 = vld [vmem:[%s7990_s3 + $0x1f0] sm:$0xff]  ;;  %v401_v33 = vld [vmem:[%s7996_s6 + $0x28] sm:$0xff] }
  0x17   :  { %4035 = vmatpush1.bf16.msra.mxu1 %v4034_v0  ;;  %4005 = vmatprep.subr.bf16.mxu0 %v4004_v1  ;;  %v399_v34 = vld [vmem:[%s7996_s6 + $0x18] sm:$0xff]  ;;  %v4014_v36 = vpack.c.bf16 %v112_v28, %v108_v27  ;;  %v4046_v37 = vpack.c.bf16 %v114_v31, %v110_v29  ;;  %v4048_v38 = vpack.c.bf16 %v401_v33, %v397_v32  ;;  %v396_v39 = vld [vmem:[%s7996_s6] sm:$0xff]  ;;  %v398_v42 = vld [vmem:[%s7996_s6 + $0x10] sm:$0xff] }
  0x18   :  { %4037 = vmatprep.subr.bf16.mxu1 %v4036_v6  ;;  %v403_v35 = vld [vmem:[%s7996_s6 + $0x38] sm:$0xff]  ;;  %v400_v40 = vld [vmem:[%s7996_s6 + $0x20] sm:$0xff]  ;;  %v402_v43 = vld [vmem:[%s7996_s6 + $0x30] sm:$0xff] }
  0x19   :  { %v4080_v41 = vpack.c.bf16 %v403_v35, %v399_v34  ;;  %v405_v44 = vld [vmem:[%s7996_s6 + $0x48] sm:$0xff]  ;;  %v5096_v46 = vld [vmem:[%s7997_s0] sm:$0xff]  ;;  %v4050_v47 = vpack.c.bf16 %v400_v40, %v396_v39  ;;  %v407_v48 = vld [vmem:[%s7996_s6 + $0x58] sm:$0xff]  ;;  %v4082_v50 = vpack.c.bf16 %v402_v43, %v398_v42 }
  0x1a   :  { %4007 = vmatpush1.bf16.msra.mxu0 %v4006_v12  ;;  %v409_v45 = vld [vmem:[%s7996_s6 + $0x68] sm:$0xff]  ;;  %v411_v49 = vld [vmem:[%s7996_s6 + $0x78] sm:$0xff]  ;;  %v404_v51 = vld [vmem:[%s7996_s6 + $0x40] sm:$0xff] }
  0x1b   :  { %4039 = vmatpush1.bf16.msra.mxu1 %v4038_v13  ;;  %4009 = vmatprep.subr.bf16.mxu0 %v4008_v14  ;;  %v408_v52 = vld [vmem:[%s7996_s6 + $0x60] sm:$0xff]  ;;  %v4052_v53 = vpack.c.bf16 %v409_v45, %v405_v44  ;;  %v406_v54 = vld [vmem:[%s7996_s6 + $0x50] sm:$0xff]  ;;  %v4084_v56 = vpack.c.bf16 %v411_v49, %v407_v48  ;;  %v413_v57 = vld [vmem:[%s7996_s6 + $0x88] sm:$0xff] }
  0x1c   :  { %4041 = vmatprep.subr.bf16.mxu1 %v4040_v18  ;;  %v410_v55 = vld [vmem:[%s7996_s6 + $0x70] sm:$0xff]  ;;  %v417_v58 = vld [vmem:[%s7996_s6 + $0xa8] sm:$0xff]  ;;  %v4054_v60 = vpack.c.bf16 %v408_v52, %v404_v51  ;;  %v415_v61 = vld [vmem:[%s7996_s6 + $0x98] sm:$0xff] }
  0x1d   :  { %v5127_v59 = vld [vmem:[%s7997_s0 + $0x8] sm:$0xff]  ;;  %v419_v62 = vld [vmem:[%s7996_s6 + $0xb8] sm:$0xff]  ;;  %v4086_v63 = vpack.c.bf16 %v410_v55, %v406_v54  ;;  %v412_v0 = vld [vmem:[%s7996_s6 + $0x80] sm:$0xff]  ;;  %v4056_v2 = vpack.c.bf16 %v417_v58, %v413_v57 }
  0x1e   :  { %4011 = vmatpush1.bf16.msra.mxu0 %v4010_v24  ;;  %v416_v1 = vld [vmem:[%s7996_s6 + $0xa0] sm:$0xff]  ;;  %v414_v4 = vld [vmem:[%s7996_s6 + $0x90] sm:$0xff]  ;;  %v4088_v6 = vpack.c.bf16 %v419_v62, %v415_v61  ;;  %v421_v7 = vld [vmem:[%s7996_s6 + $0xc8] sm:$0xff] }
  0x1f   :  { %4043 = vmatpush1.bf16.msra.mxu1 %v4042_v25  ;;  %4013 = vmatprep.subr.bf16.mxu0 %v4012_v26  ;;  %v418_v5 = vld [vmem:[%s7996_s6 + $0xb0] sm:$0xff]  ;;  %v425_v8 = vld [vmem:[%s7996_s6 + $0xe8] sm:$0xff]  ;;  %v4058_v10 = vpack.c.bf16 %v416_v1, %v412_v0  ;;  %v423_v11 = vld [vmem:[%s7996_s6 + $0xd8] sm:$0xff] }
  0x20   :  { %4045 = vmatprep.subr.bf16.mxu1 %v4044_v30  ;;  %v5160_v9 = vld [vmem:[%s7997_s0 + $0x10] sm:$0xff]  ;;  %v427_v12 = vld [vmem:[%s7996_s6 + $0xf8] sm:$0xff]  ;;  %v4090_v13 = vpack.c.bf16 %v418_v5, %v414_v4  ;;  %v420_v14 = vld [vmem:[%s7996_s6 + $0xc0] sm:$0xff]  ;;  %v4060_v16 = vpack.c.bf16 %v425_v8, %v421_v7 }
  0x21   :  { %v424_v15 = vld [vmem:[%s7996_s6 + $0xe0] sm:$0xff]  ;;  %v422_v17 = vld [vmem:[%s7996_s6 + $0xd0] sm:$0xff]  ;;  %v4092_v19 = vpack.c.bf16 %v427_v12, %v423_v11  ;;  %v429_v20 = vld [vmem:[%s7996_s6 + $0x108] sm:$0xff] }
  0x22   :  { %4015 = vmatpush1.bf16.msra.mxu0 %v4014_v36  ;;  %v426_v18 = vld [vmem:[%s7996_s6 + $0xf0] sm:$0xff]  ;;  %v433_v21 = vld [vmem:[%s7996_s6 + $0x128] sm:$0xff]  ;;  %v5193_v22 = vld [vmem:[%s7997_s0 + $0x18] sm:$0xff]  ;;  %v4062_v23 = vpack.c.bf16 %v424_v15, %v420_v14 }
  0x23   :  { %4047 = vmatpush1.bf16.msra.mxu1 %v4046_v37  ;;  %4049 = vmatprep.subr.bf16.mxu0 %v4048_v38  ;;  %v431_v24 = vld [vmem:[%s7996_s6 + $0x118] sm:$0xff]  ;;  %v4094_v26 = vpack.c.bf16 %v426_v18, %v422_v17  ;;  %v428_v27 = vld [vmem:[%s7996_s6 + $0x100] sm:$0xff]  ;;  %v4064_v29 = vpack.c.bf16 %v433_v21, %v429_v20  ;;  %v430_v30 = vld [vmem:[%s7996_s6 + $0x110] sm:$0xff] }
  0x24   :  { %4081 = vmatprep.subr.bf16.mxu1 %v4080_v41  ;;  %v435_v25 = vld [vmem:[%s7996_s6 + $0x138] sm:$0xff]  ;;  %v432_v28 = vld [vmem:[%s7996_s6 + $0x120] sm:$0xff]  ;;  %v434_v31 = vld [vmem:[%s7996_s6 + $0x130] sm:$0xff] }
  0x25   :  { %203 = vmatmul.mubr.f32.vlgmr.msra.gmra.mrb[0].mxu0 %v5096_v46  ;;  %v4096_v32 = vpack.c.bf16 %v435_v25, %v431_v24  ;;  %v437_v33 = vld [vmem:[%s7996_s6 + $0x148] sm:$0xff]  ;;  %v5226_v35 = vld [vmem:[%s7997_s0 + $0x20] sm:$0xff]  ;;  %v4066_v36 = vpack.c.bf16 %v432_v28, %v428_v27  ;;  %v439_v37 = vld [vmem:[%s7996_s6 + $0x158] sm:$0xff]  ;;  %v4098_v39 = vpack.c.bf16 %v434_v31, %v430_v30 }
  0x26   :  { %316 = vmatmul.mubr.f32.vlgmr.msra.gmra.mrb[0].mxu1 %v5096_v46  ;;  %4051 = vmatpush1.bf16.msra.mxu0 %v4050_v47  ;;  %v441_v34 = vld [vmem:[%s7996_s6 + $0x168] sm:$0xff]  ;;  %v443_v38 = vld [vmem:[%s7996_s6 + $0x178] sm:$0xff]  ;;  %v436_v40 = vld [vmem:[%s7996_s6 + $0x140] sm:$0xff] }
  0x27   :  { %4083 = vmatpush1.bf16.msra.mxu1 %v4082_v50  ;;  %208 = vmatprep.mubr.f32.mxu0 %v8003_v3  ;;  %v440_v41 = vld [vmem:[%s7996_s6 + $0x160] sm:$0xff]  ;;  %v4068_v42 = vpack.c.bf16 %v441_v34, %v437_v33  ;;  %v438_v43 = vld [vmem:[%s7996_s6 + $0x150] sm:$0xff]  ;;  %v4100_v45 = vpack.c.bf16 %v443_v38, %v439_v37  ;;  %v445_v47 = vld [vmem:[%s7996_s6 + $0x188] sm:$0xff] }
  0x28   :  { %321 = vmatprep.mubr.f32.mxu1 %v8003_v3  ;;  %4053 = vmatprep.subr.bf16.mxu0 %v4052_v53  ;;  %v442_v44 = vld [vmem:[%s7996_s6 + $0x170] sm:$0xff]  ;;  %v449_v48 = vld [vmem:[%s7996_s6 + $0x1a8] sm:$0xff]  ;;  %v4070_v50 = vpack.c.bf16 %v440_v41, %v436_v40  ;;  %v447_v51 = vld [vmem:[%s7996_s6 + $0x198] sm:$0xff] }
  0x29   :  { %209 = vmatmul.mubr.f32.gmra.mrb[2].mxu0 %v5127_v59  ;;  %4085 = vmatprep.subr.bf16.mxu1 %v4084_v56  ;;  %v5259_v49 = vld [vmem:[%s7997_s0 + $0x28] sm:$0xff]  ;;  %v451_v52 = vld [vmem:[%s7996_s6 + $0x1b8] sm:$0xff]  ;;  %v4102_v53 = vpack.c.bf16 %v442_v44, %v438_v43  ;;  %v444_v54 = vld [vmem:[%s7996_s6 + $0x180] sm:$0xff]  ;;  %v4072_v56 = vpack.c.bf16 %v449_v48, %v445_v47 }
  0x2a   :  { %322 = vmatmul.mubr.f32.gmra.mrb[2].mxu1 %v5127_v59  ;;  %4055 = vmatpush1.bf16.msra.mxu0 %v4054_v60  ;;  %v448_v55 = vld [vmem:[%s7996_s6 + $0x1a0] sm:$0xff]  ;;  %v446_v57 = vld [vmem:[%s7996_s6 + $0x190] sm:$0xff]  ;;  %v4104_v60 = vpack.c.bf16 %v451_v52, %v447_v51  ;;  %v453_v61 = vld [vmem:[%s7996_s6 + $0x1c8] sm:$0xff] }
  0x2b   :  { %4087 = vmatpush1.bf16.msra.mxu1 %v4086_v63  ;;  %214 = vmatprep.mubr.f32.mxu0 %v8003_v3  ;;  %v450_v58 = vld [vmem:[%s7996_s6 + $0x1b0] sm:$0xff]  ;;  %v457_v62 = vld [vmem:[%s7996_s6 + $0x1e8] sm:$0xff]  ;;  %v4074_v0 = vpack.c.bf16 %v448_v55, %v444_v54  ;;  %v455_v1 = vld [vmem:[%s7996_s6 + $0x1d8] sm:$0xff] }
  0x2c   :  { %327 = vmatprep.mubr.f32.mxu1 %v8003_v3  ;;  %4057 = vmatprep.subr.bf16.mxu0 %v4056_v2  ;;  %v50_v63 = vld [vmem:[%s7997_s0 + $0x30] sm:$0xff]  ;;  %v459_v2 = vld [vmem:[%s7996_s6 + $0x1f8] sm:$0xff]  ;;  %v4106_v4 = vpack.c.bf16 %v450_v58, %v446_v57  ;;  %v452_v5 = vld [vmem:[%s7996_s6 + $0x1c0] sm:$0xff]  ;;  %v4076_v7 = vpack.c.bf16 %v457_v62, %v453_v61 }
  0x2d   :  { %215 = vmatmul.mubr.f32.gmra.mrb[4].mxu0 %v5160_v9  ;;  %4089 = vmatprep.subr.bf16.mxu1 %v4088_v6  ;;  %v456_v6 = vld [vmem:[%s7996_s6 + $0x1e0] sm:$0xff]  ;;  %v454_v8 = vld [vmem:[%s7996_s6 + $0x1d0] sm:$0xff]  ;;  %v4108_v11 = vpack.c.bf16 %v459_v2, %v455_v1  ;;  %v51_v12 = vld [vmem:[%s7997_s0 + $0x38] sm:$0xff] }
  0x2e   :  { %328 = vmatmul.mubr.f32.gmra.mrb[4].mxu1 %v5160_v9  ;;  %4059 = vmatpush1.bf16.msra.mxu0 %v4058_v10  ;;  %v458_v10 = vld [vmem:[%s7996_s6 + $0x1f0] sm:$0xff]  ;;  %v5373_v17 = vld [vmem:[%s7999_s4 + $0x20] sm:$0xff]  ;;  %v5378_v18 = vld [vmem:[%s7999_s4 + $0x28] sm:$0xff] }
  0x2f   :  { %4091 = vmatpush1.bf16.msra.mxu1 %v4090_v13  ;;  %220 = vmatprep.mubr.f32.mxu0 %v8003_v3  ;;  %v4078_v13 = vpack.c.bf16 %v456_v6, %v452_v5  ;;  %v4110_v14 = vpack.c.bf16 %v458_v10, %v454_v8  ;;  %v5363_v15 = vld [vmem:[%s7999_s4 + $0x10] sm:$0xff]  ;;  %8140 = vst [vmem:[#allocation11_spill] sm:$0xff] %v5373_v17  ;;  %v5388_v20 = vld [vmem:[%s7999_s4 + $0x38] sm:$0xff]  ;;  %v5393_v21 = vld [vmem:[%s7999_s4 + $0x40] sm:$0xff] }
  0x30   :  { %333 = vmatprep.mubr.f32.mxu1 %v8003_v3  ;;  %4061 = vmatprep.subr.bf16.mxu0 %v4060_v16  ;;  %8138 = vst [vmem:[#allocation9_spill] sm:$0xff] %v5363_v15  ;;  %v5368_v16 = vld [vmem:[%s7999_s4 + $0x18] sm:$0xff]  ;;  %v5413_v25 = vld [vmem:[%s7999_s4 + $0x60] sm:$0xff]  ;;  %v5423_v27 = vld [vmem:[%s7999_s4 + $0x70] sm:$0xff] }
  0x31   :  { %221 = vmatmul.mubr.f32.gmra.mrb[6].mxu0 %v5193_v22  ;;  %4093 = vmatprep.subr.bf16.mxu1 %v4092_v19  ;;  %8139 = vst [vmem:[#allocation10_spill] sm:$0xff] %v5368_v16  ;;  %v5383_v19 = vld [vmem:[%s7999_s4 + $0x30] sm:$0xff]  ;;  %v5408_v24 = vld [vmem:[%s7999_s4 + $0x58] sm:$0xff]  ;;  %v5438_v30 = vld [vmem:[%s7999_s4 + $0x88] sm:$0xff] }
  0x32   :  { %334 = vmatmul.mubr.f32.gmra.mrb[6].mxu1 %v5193_v22  ;;  %4063 = vmatpush1.bf16.msra.mxu0 %v4062_v23  ;;  %v5403_v23 = vld [vmem:[%s7999_s4 + $0x50] sm:$0xff]  ;;  %v5428_v28 = vld [vmem:[%s7999_s4 + $0x78] sm:$0xff]  ;;  %v5453_v33 = vld [vmem:[%s7999_s4 + $0xa0] sm:$0xff] }
  0x33   :  { %4095 = vmatpush1.bf16.msra.mxu1 %v4094_v26  ;;  %226 = vmatprep.mubr.f32.mxu0 %v8003_v3  ;;  %v5418_v26 = vld [vmem:[%s7999_s4 + $0x68] sm:$0xff]  ;;  %v5443_v31 = vld [vmem:[%s7999_s4 + $0x90] sm:$0xff]  ;;  %v5473_v37 = vld [vmem:[%s7999_s4 + $0xc0] sm:$0xff] }
  0x34   :  { %339 = vmatprep.mubr.f32.mxu1 %v8003_v3  ;;  %4065 = vmatprep.subr.bf16.mxu0 %v4064_v29  ;;  %v5433_v29 = vld [vmem:[%s7999_s4 + $0x80] sm:$0xff]  ;;  %v5458_v34 = vld [vmem:[%s7999_s4 + $0xa8] sm:$0xff]  ;;  %v5488_v40 = vld [vmem:[%s7999_s4 + $0xd8] sm:$0xff] }
  0x35   :  { %227 = vmatmul.mubr.f32.gmra.mrb[8].mxu0 %v5226_v35  ;;  %4097 = vmatprep.subr.bf16.mxu1 %v4096_v32  ;;  %v5448_v32 = vld [vmem:[%s7999_s4 + $0x98] sm:$0xff]  ;;  %v5478_v38 = vld [vmem:[%s7999_s4 + $0xc8] sm:$0xff]  ;;  %v5493_v41 = vld [vmem:[%s7999_s4 + $0xe0] sm:$0xff] }
  0x36   :  { %340 = vmatmul.mubr.f32.gmra.mrb[8].mxu1 %v5226_v35  ;;  %4067 = vmatpush1.bf16.msra.mxu0 %v4066_v36  ;;  %v5468_v36 = vld [vmem:[%s7999_s4 + $0xb8] sm:$0xff]  ;;  %v5503_v43 = vld [vmem:[%s7999_s4 + $0xf0] sm:$0xff]  ;;  %v5518_v47 = vld [vmem:[%s7999_s4 + $0x108] sm:$0xff] }
  0x37   :  { %4099 = vmatpush1.bf16.msra.mxu1 %v4098_v39  ;;  %232 = vmatprep.mubr.f32.mxu0 %v8003_v3  ;;  %v5483_v39 = vld [vmem:[%s7999_s4 + $0xd0] sm:$0xff]  ;;  %v5508_v44 = vld [vmem:[%s7999_s4 + $0xf8] sm:$0xff]  ;;  %v5538_v51 = vld [vmem:[%s7999_s4 + $0x128] sm:$0xff] }
  0x38   :  { %345 = vmatprep.mubr.f32.mxu1 %v8003_v3  ;;  %4069 = vmatprep.subr.bf16.mxu0 %v4068_v42  ;;  %v5498_v42 = vld [vmem:[%s7999_s4 + $0xe8] sm:$0xff]  ;;  %v5523_v48 = vld [vmem:[%s7999_s4 + $0x110] sm:$0xff]  ;;  %v5553_v54 = vld [vmem:[%s7999_s4 + $0x140] sm:$0xff] }
  0x39   :  { %233 = vmatmul.mubr.f32.gmra.mrb[10].mxu0 %v5259_v49  ;;  %4101 = vmatprep.subr.bf16.mxu1 %v4100_v45  ;;  %v5513_v45 = vld [vmem:[%s7999_s4 + $0x100] sm:$0xff]  ;;  %v5543_v52 = vld [vmem:[%s7999_s4 + $0x130] sm:$0xff]  ;;  %8142 = vst [vmem:[#allocation13_spill] sm:$0xff] %v5553_v54  ;;  %v5558_v55 = vld [vmem:[%s7999_s4 + $0x148] sm:$0xff] }
  0x3a   :  { %346 = vmatmul.mubr.f32.gmra.mrb[10].mxu1 %v5259_v49  ;;  %4071 = vmatpush1.bf16.msra.mxu0 %v4070_v50  ;;  %v5533_v50 = vld [vmem:[%s7999_s4 + $0x120] sm:$0xff]  ;;  %8141 = vst [vmem:[#allocation12_spill] sm:$0xff] %v5543_v52  ;;  %v5568_v57 = vld [vmem:[%s7999_s4 + $0x158] sm:$0xff]  ;;  %v5583_v61 = vld [vmem:[%s7999_s4 + $0x170] sm:$0xff] }
  0x3b   :  { %4103 = vmatpush1.bf16.msra.mxu1 %v4102_v53  ;;  %238 = vmatprep.mubr.f32.mxu0 %v8003_v3  ;;  %v5548_v53 = vld [vmem:[%s7999_s4 + $0x138] sm:$0xff]  ;;  %8144 = vst [vmem:[#allocation15_spill] sm:$0xff] %v5568_v57  ;;  %v5573_v58 = vld [vmem:[%s7999_s4 + $0x160] sm:$0xff]  ;;  %8146 = vst [vmem:[#allocation17_spill] sm:$0xff] %v5583_v61 }
  0x3c   :  { %351 = vmatprep.mubr.f32.mxu1 %v8003_v3  ;;  %4073 = vmatprep.subr.bf16.mxu0 %v4072_v56  ;;  %v5563_v56 = vld [vmem:[%s7999_s4 + $0x150] sm:$0xff]  ;;  %8145 = vst [vmem:[#allocation16_spill] sm:$0xff] %v5573_v58  ;;  %v5588_v62 = vld [vmem:[%s7999_s4 + $0x178] sm:$0xff]  ;;  %v5618_v5 = vld [vmem:[%s7999_s4 + $0x1a8] sm:$0xff] }
  0x3d   :  { %239 = vmatmul.mubr.f32.gmra.mrb[12].mxu0 %v50_v63  ;;  %4105 = vmatprep.subr.bf16.mxu1 %v4104_v60  ;;  %8143 = vst [vmem:[#allocation14_spill] sm:$0xff] %v5563_v56  ;;  %v5578_v60 = vld [vmem:[%s7999_s4 + $0x168] sm:$0xff]  ;;  %8147 = vst [vmem:[#allocation18_spill] sm:$0xff] %v5588_v62  ;;  %v5603_v1 = vld [vmem:[%s7999_s4 + $0x190] sm:$0xff] }
  0x3e   :  { %352 = vmatmul.mubr.f32.gmra.mrb[12].mxu1 %v50_v63  ;;  %4075 = vmatpush1.bf16.msra.mxu0 %v4074_v0  ;;  %v5598_v0 = vld [vmem:[%s7999_s4 + $0x188] sm:$0xff]  ;;  %8150 = vst [vmem:[#allocation21_spill] sm:$0xff] %v5603_v1  ;;  %v5608_v2 = vld [vmem:[%s7999_s4 + $0x198] sm:$0xff]  ;;  %8153 = vst [vmem:[#allocation24_spill] sm:$0xff] %v5618_v5 }
  0x3f   :  { %4107 = vmatpush1.bf16.msra.mxu1 %v4106_v4  ;;  %244 = vmatprep.mubr.f32.mxu0 %v8003_v3  ;;  %8149 = vst [vmem:[#allocation20_spill] sm:$0xff] %v5598_v0  ;;  %8151 = vst [vmem:[#allocation22_spill] sm:$0xff] %v5608_v2  ;;  %v5613_v4 = vld [vmem:[%s7999_s4 + $0x1a0] sm:$0xff]  ;;  %v5623_v6 = vld [vmem:[%s7999_s4 + $0x1b0] sm:$0xff] }
  0x40   :  { %357 = vmatprep.mubr.f32.mxu1 %v8003_v3  ;;  %4077 = vmatprep.subr.bf16.mxu0 %v4076_v7  ;;  %8152 = vst [vmem:[#allocation23_spill] sm:$0xff] %v5613_v4  ;;  %8154 = vst [vmem:[#allocation25_spill] sm:$0xff] %v5623_v6  ;;  %v5628_v7 = vld [vmem:[%s7999_s4 + $0x1b8] sm:$0xff]  ;;  %v5633_v8 = vld [vmem:[%s7999_s4 + $0x1c0] sm:$0xff] }
  0x41   :  { %245 = vmatmul.mubr.f32.gmra.mrb[14].mxu0 %v51_v12  ;;  %4109 = vmatprep.subr.bf16.mxu1 %v4108_v11  ;;  %8155 = vst [vmem:[#allocation26_spill] sm:$0xff] %v5628_v7  ;;  %8156 = vst [vmem:[#allocation27_spill] sm:$0xff] %v5633_v8  ;;  %v5638_v10 = vld [vmem:[%s7999_s4 + $0x1c8] sm:$0xff]  ;;  %v5643_v11 = vld [vmem:[%s7999_s4 + $0x1d0] sm:$0xff] }
  0x42   :  { %358 = vmatmul.mubr.f32.gmra.mrb[14].mxu1 %v51_v12  ;;  %4079 = vmatpush1.bf16.msra.mxu0 %v4078_v13  ;;  %8157 = vst [vmem:[#allocation28_spill] sm:$0xff] %v5638_v10  ;;  %8158 = vst [vmem:[#allocation29_spill] sm:$0xff] %v5643_v11  ;;  %v5653_v13 = vld [vmem:[%s7999_s4 + $0x1e0] sm:$0xff]  ;;  %v5668_v11 = vld [vmem:[%s7999_s4 + $0x1f8] sm:$0xff] }
  0x43   :  { %4111 = vmatpush1.bf16.msra.mxu1 %v4110_v14  ;;  %546 = vmatprep.mubr.f32.mxu0 %v8003_v3  ;;  %8160 = vst [vmem:[#allocation31_spill] sm:$0xff] %v5653_v13  ;;  %v5658_v14 = vld [vmem:[%s7999_s4 + $0x1e8] sm:$0xff]  ;;  %8163 = vst [vmem:[#allocation34_spill] sm:$0xff] %v5668_v11  ;;  %v5673_v8 = vld [vmem:[%s8000_s7] sm:$0xff] }
  0x44   :  { %659 = vmatprep.mubr.f32.mxu1 %v8003_v3  ;;  %8161 = vst [vmem:[#allocation32_spill] sm:$0xff] %v5658_v14  ;;  %8164 = vst [vmem:[#allocation35_spill] sm:$0xff] %v5673_v8  ;;  %v5678_v13 = vld [vmem:[%s8000_s7 + $0x8] sm:$0xff]  ;;  %v5693_v11 = vld [vmem:[%s8000_s7 + $0x20] sm:$0xff] }
  0x45   :  { %547 = vmatmul.mubr.f32.vlgmr.msra.gmra.mrb[16].mxu0 %v5096_v46  ;;  %8165 = vst [vmem:[#allocation36_spill] sm:$0xff] %v5678_v13  ;;  %8168 = vst [vmem:[#allocation39_spill] sm:$0xff] %v5693_v11  ;;  %v5698_v8 = vld [vmem:[%s8000_s7 + $0x28] sm:$0xff]  ;;  %v5703_v13 = vld [vmem:[%s8000_s7 + $0x30] sm:$0xff] }
  0x46   :  { %660 = vmatmul.mubr.f32.vlgmr.msra.gmra.mrb[16].mxu1 %v5096_v46  ;;  %552 = vmatprep.mubr.f32.mxu0 %v8003_v3  ;;  %v5348_v46 = vld [vmem:[%s7998_s1] sm:$0xff]  ;;  %8169 = vst [vmem:[#allocation40_spill] sm:$0xff] %v5698_v8  ;;  %8170 = vst [vmem:[#allocation41_spill] sm:$0xff] %v5703_v13  ;;  %v5718_v11 = vld [vmem:[%s8000_s7 + $0x48] sm:$0xff] }
  0x47   :  { %665 = vmatprep.mubr.f32.mxu1 %v8003_v3  ;;  %8136 = vst [vmem:[#allocation7_spill] sm:$0xff] %v5348_v46  ;;  %8173 = vst [vmem:[#allocation44_spill] sm:$0xff] %v5718_v11  ;;  %v5723_v8 = vld [vmem:[%s8000_s7 + $0x50] sm:$0xff]  ;;  %v5728_v13 = vld [vmem:[%s8000_s7 + $0x58] sm:$0xff] }
  0x48   :  { %8174 = vst [vmem:[#allocation45_spill] sm:$0xff] %v5723_v8  ;;  %8175 = vst [vmem:[#allocation46_spill] sm:$0xff] %v5728_v13  ;;  %v5743_v11 = vld [vmem:[%s8000_s7 + $0x70] sm:$0xff]  ;;  %v5748_v8 = vld [vmem:[%s8000_s7 + $0x78] sm:$0xff] }
  0x49   :  { %553 = vmatmul.mubr.f32.gmra.mrb[18].mxu0 %v5127_v59  ;;  %8178 = vst [vmem:[#allocation49_spill] sm:$0xff] %v5743_v11  ;;  %8179 = vst [vmem:[#allocation50_spill] sm:$0xff] %v5748_v8  ;;  %v5753_v13 = vld [vmem:[%s8000_s7 + $0x80] sm:$0xff]  ;;  %v5768_v11 = vld [vmem:[%s8000_s7 + $0x98] sm:$0xff] }
  0x4a   :  { %666 = vmatmul.mubr.f32.gmra.mrb[18].mxu1 %v5127_v59  ;;  %558 = vmatprep.mubr.f32.mxu0 %v8003_v3  ;;  %v5353_v59 = vld [vmem:[%s7999_s4] sm:$0xff]  ;;  %8180 = vst [vmem:[#allocation51_spill] sm:$0xff] %v5753_v13  ;;  %8183 = vst [vmem:[#allocation54_spill] sm:$0xff] %v5768_v11  ;;  %v5778_v13 = vld [vmem:[%s8000_s7 + $0xa8] sm:$0xff] }
  0x4b   :  { %671 = vmatprep.mubr.f32.mxu1 %v8003_v3  ;;  %v5773_v8 = vld [vmem:[%s8000_s7 + $0xa0] sm:$0xff]  ;;  %8185 = vst [vmem:[#allocation56_spill] sm:$0xff] %v5778_v13  ;;  %v5803_v13 = vld [vmem:[%s8000_s7 + $0xd0] sm:$0xff] }
  0x4c   :  { %8184 = vst [vmem:[#allocation55_spill] sm:$0xff] %v5773_v8  ;;  %v5793_v11 = vld [vmem:[%s8000_s7 + $0xc0] sm:$0xff]  ;;  %v5798_v8 = vld [vmem:[%s8000_s7 + $0xc8] sm:$0xff]  ;;  %8190 = vst [vmem:[#allocation61_spill] sm:$0xff] %v5803_v13 }
  0x4d   :  { %559 = vmatmul.mubr.f32.gmra.mrb[20].mxu0 %v5160_v9  ;;  %8188 = vst [vmem:[#allocation59_spill] sm:$0xff] %v5793_v11  ;;  %8189 = vst [vmem:[#allocation60_spill] sm:$0xff] %v5798_v8  ;;  %v5818_v11 = vld [vmem:[%s8000_s7 + $0xe8] sm:$0xff]  ;;  %v5823_v8 = vld [vmem:[%s8000_s7 + $0xf0] sm:$0xff] }
  0x4e   :  { %672 = vmatmul.mubr.f32.gmra.mrb[20].mxu1 %v5160_v9  ;;  %564 = vmatprep.mubr.f32.mxu0 %v8003_v3  ;;  %v5358_v9 = vld [vmem:[%s7999_s4 + $0x8] sm:$0xff]  ;;  %8193 = vst [vmem:[#allocation64_spill] sm:$0xff] %v5818_v11  ;;  %8194 = vst [vmem:[#allocation65_spill] sm:$0xff] %v5823_v8  ;;  %v5828_v13 = vld [vmem:[%s8000_s7 + $0xf8] sm:$0xff] }
  0x4f   :  { %677 = vmatprep.mubr.f32.mxu1 %v8003_v3  ;;  %8137 = vst [vmem:[#allocation8_spill] sm:$0xff] %v5358_v9  ;;  %8195 = vst [vmem:[#allocation66_spill] sm:$0xff] %v5828_v13  ;;  %v5843_v11 = vld [vmem:[%s8000_s7 + $0x110] sm:$0xff]  ;;  %v5848_v8 = vld [vmem:[%s8000_s7 + $0x118] sm:$0xff] }
  0x50   :  { %8198 = vst [vmem:[#allocation69_spill] sm:$0xff] %v5843_v11  ;;  %8199 = vst [vmem:[#allocation70_spill] sm:$0xff] %v5848_v8  ;;  %v5853_v13 = vld [vmem:[%s8000_s7 + $0x120] sm:$0xff]  ;;  %v5868_v11 = vld [vmem:[%s8000_s7 + $0x138] sm:$0xff] }
  0x51   :  { %565 = vmatmul.mubr.f32.gmra.mrb[22].mxu0 %v5193_v22  ;;  %8200 = vst [vmem:[#allocation71_spill] sm:$0xff] %v5853_v13  ;;  %8203 = vst [vmem:[#allocation74_spill] sm:$0xff] %v5868_v11  ;;  %v5873_v8 = vld [vmem:[%s8000_s7 + $0x140] sm:$0xff]  ;;  %v5878_v13 = vld [vmem:[%s8000_s7 + $0x148] sm:$0xff] }
  0x52   :  { %678 = vmatmul.mubr.f32.gmra.mrb[22].mxu1 %v5193_v22  ;;  %570 = vmatprep.mubr.f32.mxu0 %v8003_v3  ;;  %v5398_v22 = vld [vmem:[%s7999_s4 + $0x48] sm:$0xff]  ;;  %8204 = vst [vmem:[#allocation75_spill] sm:$0xff] %v5873_v8  ;;  %8205 = vst [vmem:[#allocation76_spill] sm:$0xff] %v5878_v13  ;;  %v5893_v11 = vld [vmem:[%s8000_s7 + $0x160] sm:$0xff] }
  0x53   :  { %683 = vmatprep.mubr.f32.mxu1 %v8003_v3  ;;  %8208 = vst [vmem:[#allocation79_spill] sm:$0xff] %v5893_v11  ;;  %v5898_v8 = vld [vmem:[%s8000_s7 + $0x168] sm:$0xff]  ;;  %v5903_v13 = vld [vmem:[%s8000_s7 + $0x170] sm:$0xff] }
  0x54   :  { %8209 = vst [vmem:[#allocation80_spill] sm:$0xff] %v5898_v8  ;;  %8210 = vst [vmem:[#allocation81_spill] sm:$0xff] %v5903_v13  ;;  %v5918_v11 = vld [vmem:[%s8000_s7 + $0x188] sm:$0xff]  ;;  %v5923_v8 = vld [vmem:[%s8000_s7 + $0x190] sm:$0xff] }
  0x55   :  { %571 = vmatmul.mubr.f32.gmra.mrb[24].mxu0 %v5226_v35  ;;  %8213 = vst [vmem:[#allocation84_spill] sm:$0xff] %v5918_v11  ;;  %8214 = vst [vmem:[#allocation85_spill] sm:$0xff] %v5923_v8  ;;  %v5928_v13 = vld [vmem:[%s8000_s7 + $0x198] sm:$0xff]  ;;  %v5943_v11 = vld [vmem:[%s8000_s7 + $0x1b0] sm:$0xff] }
  0x56   :  { %684 = vmatmul.mubr.f32.gmra.mrb[24].mxu1 %v5226_v35  ;;  %576 = vmatprep.mubr.f32.mxu0 %v8003_v3  ;;  %v5463_v35 = vld [vmem:[%s7999_s4 + $0xb0] sm:$0xff]  ;;  %8215 = vst [vmem:[#allocation86_spill] sm:$0xff] %v5928_v13  ;;  %8218 = vst [vmem:[#allocation89_spill] sm:$0xff] %v5943_v11  ;;  %v5948_v8 = vld [vmem:[%s8000_s7 + $0x1b8] sm:$0xff] }
  0x57   :  { %689 = vmatprep.mubr.f32.mxu1 %v8003_v3  ;;  %8219 = vst [vmem:[#allocation90_spill] sm:$0xff] %v5948_v8  ;;  %v5953_v13 = vld [vmem:[%s8000_s7 + $0x1c0] sm:$0xff]  ;;  %v5968_v11 = vld [vmem:[%s8000_s7 + $0x1d8] sm:$0xff] }
  0x58   :  { %8220 = vst [vmem:[#allocation91_spill] sm:$0xff] %v5953_v13  ;;  %8223 = vst [vmem:[#allocation94_spill] sm:$0xff] %v5968_v11  ;;  %v5973_v8 = vld [vmem:[%s8000_s7 + $0x1e0] sm:$0xff]  ;;  %v5978_v13 = vld [vmem:[%s8000_s7 + $0x1e8] sm:$0xff]  ;;  %v8005_v11 = vlaneseq }
  0x59   :  { %577 = vmatmul.mubr.f32.gmra.mrb[26].mxu0 %v5259_v49  ;;  %8224 = vst [vmem:[#allocation95_spill] sm:$0xff] %v5973_v8  ;;  %8225 = vst [vmem:[#allocation96_spill] sm:$0xff] %v5978_v13  ;;  %v116_v13 = vld [vmem:[%s8001_s5] sm:$0xf] }
  0x5a   :  { %690 = vmatmul.mubr.f32.gmra.mrb[26].mxu1 %v5259_v49  ;;  %582 = vmatprep.mubr.f32.mxu0 %v8003_v3  ;;  %v5528_v49 = vld [vmem:[%s7999_s4 + $0x118] sm:$0xff]  ;;  %v5991_v6 = vshrl.u32 %v8005_v11, 7 }
  0x5b   :  { %695 = vmatprep.mubr.f32.mxu1 %v8003_v3 }
  0x5c   :  { %8228 = vst [vmem:[#allocation99_spill] sm:$0xff] %v5991_v6  ;;  %v5994_v8 = vsub.s32 0, %v5991_v6  ;;  %v6000_v1 = vsub.s32 2, %v5991_v6  ;;  %v6006_v14 = vsub.s32 3, %v5991_v6 }
  0x5d   :  { %583 = vmatmul.mubr.f32.gmra.mrb[28].mxu0 %v50_v63 }
  0x5e   :  { %696 = vmatmul.mubr.f32.gmra.mrb[28].mxu1 %v50_v63  ;;  %588 = vmatprep.mubr.f32.mxu0 %v8003_v3  ;;  %v5593_v63 = vld [vmem:[%s7999_s4 + $0x180] sm:$0xff]  ;;  %8229 = vst [vmem:[#allocation100_spill] sm:$0xff] %v5994_v8  ;;  %8230 = vst [vmem:[#allocation101_spill] sm:$0xff] %v6000_v1  ;;  %v6012_v11 = vrot.slane %v116_v13, %v6000_v1  ;;  %v6018_v4 = vrot.slane %v116_v13, %v6006_v14 }
  0x5f   :  { %701 = vmatprep.mubr.f32.mxu1 %v8003_v3  ;;  %8148 = vst [vmem:[#allocation19_spill] sm:$0xff] %v5593_v63  ;;  %v5663_v3 = vld [vmem:[%s7999_s4 + $0x1f0] sm:$0xff]  ;;  %8232 = vst [vmem:[#allocation103_spill] sm:$0xff] %v6006_v14 }
  0x60   :  { %8162 = vst [vmem:[#allocation33_spill] sm:$0xff] %v5663_v3  ;;  %v5688_v3 = vld [vmem:[%s8000_s7 + $0x18] sm:$0xff] }
  0x61   :  { %589 = vmatmul.mubr.f32.gmra.mrb[30].mxu0 %v51_v12  ;;  %8167 = vst [vmem:[#allocation38_spill] sm:$0xff] %v5688_v3  ;;  %v5713_v3 = vld [vmem:[%s8000_s7 + $0x40] sm:$0xff] }
  0x62   :  { %702 = vmatmul.mubr.f32.gmra.mrb[30].mxu1 %v51_v12  ;;  %v5648_v12 = vld [vmem:[%s7999_s4 + $0x1d8] sm:$0xff]  ;;  %8172 = vst [vmem:[#allocation43_spill] sm:$0xff] %v5713_v3  ;;  %v5738_v3 = vld [vmem:[%s8000_s7 + $0x68] sm:$0xff] }
  0x63   :  { %8159 = vst [vmem:[#allocation30_spill] sm:$0xff] %v5648_v12  ;;  %v5683_v12 = vld [vmem:[%s8000_s7 + $0x10] sm:$0xff]  ;;  %8177 = vst [vmem:[#allocation48_spill] sm:$0xff] %v5738_v3 }
  0x64   :  { %8166 = vst [vmem:[#allocation37_spill] sm:$0xff] %v5683_v12  ;;  %v5708_v12 = vld [vmem:[%s8000_s7 + $0x38] sm:$0xff]  ;;  %v5763_v3 = vld [vmem:[%s8000_s7 + $0x90] sm:$0xff] }
  0x65   :  { %8171 = vst [vmem:[#allocation42_spill] sm:$0xff] %v5708_v12  ;;  %v5733_v12 = vld [vmem:[%s8000_s7 + $0x60] sm:$0xff]  ;;  %8182 = vst [vmem:[#allocation53_spill] sm:$0xff] %v5763_v3  ;;  %v5788_v3 = vld [vmem:[%s8000_s7 + $0xb8] sm:$0xff] }
  0x66   :  { %8176 = vst [vmem:[#allocation47_spill] sm:$0xff] %v5733_v12  ;;  %v5758_v12 = vld [vmem:[%s8000_s7 + $0x88] sm:$0xff]  ;;  %8187 = vst [vmem:[#allocation58_spill] sm:$0xff] %v5788_v3  ;;  %v5813_v3 = vld [vmem:[%s8000_s7 + $0xe0] sm:$0xff] }
  0x67   :  { %8181 = vst [vmem:[#allocation52_spill] sm:$0xff] %v5758_v12  ;;  %v5783_v12 = vld [vmem:[%s8000_s7 + $0xb0] sm:$0xff]  ;;  %8192 = vst [vmem:[#allocation63_spill] sm:$0xff] %v5813_v3  ;;  %v5838_v3 = vld [vmem:[%s8000_s7 + $0x108] sm:$0xff] }
  0x68   :  { %8186 = vst [vmem:[#allocation57_spill] sm:$0xff] %v5783_v12  ;;  %v5808_v12 = vld [vmem:[%s8000_s7 + $0xd8] sm:$0xff]  ;;  %8197 = vst [vmem:[#allocation68_spill] sm:$0xff] %v5838_v3  ;;  %v5863_v3 = vld [vmem:[%s8000_s7 + $0x130] sm:$0xff] }
  0x69   :  { %8191 = vst [vmem:[#allocation62_spill] sm:$0xff] %v5808_v12  ;;  %v5833_v12 = vld [vmem:[%s8000_s7 + $0x100] sm:$0xff]  ;;  %8202 = vst [vmem:[#allocation73_spill] sm:$0xff] %v5863_v3  ;;  %v5888_v3 = vld [vmem:[%s8000_s7 + $0x158] sm:$0xff] }
  0x6a   :  { %8196 = vst [vmem:[#allocation67_spill] sm:$0xff] %v5833_v12  ;;  %v5858_v12 = vld [vmem:[%s8000_s7 + $0x128] sm:$0xff]  ;;  %8207 = vst [vmem:[#allocation78_spill] sm:$0xff] %v5888_v3  ;;  %v5913_v3 = vld [vmem:[%s8000_s7 + $0x180] sm:$0xff] }
  0x6b   :  { %8201 = vst [vmem:[#allocation72_spill] sm:$0xff] %v5858_v12  ;;  %v5883_v12 = vld [vmem:[%s8000_s7 + $0x150] sm:$0xff]  ;;  %8212 = vst [vmem:[#allocation83_spill] sm:$0xff] %v5913_v3  ;;  %v5938_v3 = vld [vmem:[%s8000_s7 + $0x1a8] sm:$0xff] }
  0x6c   :  { %8206 = vst [vmem:[#allocation77_spill] sm:$0xff] %v5883_v12  ;;  %v5908_v12 = vld [vmem:[%s8000_s7 + $0x178] sm:$0xff]  ;;  %8217 = vst [vmem:[#allocation88_spill] sm:$0xff] %v5938_v3  ;;  %v5963_v3 = vld [vmem:[%s8000_s7 + $0x1d0] sm:$0xff] }
  0x6d   :  { %8211 = vst [vmem:[#allocation82_spill] sm:$0xff] %v5908_v12  ;;  %v5933_v12 = vld [vmem:[%s8000_s7 + $0x1a0] sm:$0xff]  ;;  %8222 = vst [vmem:[#allocation93_spill] sm:$0xff] %v5963_v3  ;;  %v5988_v3 = vld [vmem:[%s8000_s7 + $0x1f8] sm:$0xff] }
  0x6e   :  { %8216 = vst [vmem:[#allocation87_spill] sm:$0xff] %v5933_v12  ;;  %v5958_v12 = vld [vmem:[%s8000_s7 + $0x1c8] sm:$0xff]  ;;  %8227 = vst [vmem:[#allocation98_spill] sm:$0xff] %v5988_v3  ;;  %v6009_v3 = vrot.slane %v116_v13, %v5994_v8 }
  0x6f   :  { %8221 = vst [vmem:[#allocation92_spill] sm:$0xff] %v5958_v12  ;;  %v5983_v12 = vld [vmem:[%s8000_s7 + $0x1f0] sm:$0xff] }
  0x70   :  { %8226 = vst [vmem:[#allocation97_spill] sm:$0xff] %v5983_v12  ;;  %v6003_v12 = vsub.s32 1, %v5991_v6 }
  0x72   :  { %8231 = vst [vmem:[#allocation102_spill] sm:$0xff] %v6003_v12  ;;  %v6015_v10 = vrot.slane %v116_v13, %v6003_v12 }
  0xf8   :  { %v204_v63 = vpop.f32.mrb[0].mxu0 }
  0xf9   :  { %v205_v7 = vadd.f32 %v204_v63, %v6009_v3  ;;  %v317_v2 = vpop.f32.mrb[0].mxu1  ;;  %v206_v61 = vpop.f32.mrb[1].mxu0 }
  0xfa   :  { %v318_v6 = vadd.f32 %v317_v2, %v6012_v11  ;;  %v207_v56 = vadd.f32 %v206_v61, %v6015_v10  ;;  %v319_v5 = vpop.f32.mrb[1].mxu1 }
  0xfb   :  { %364 = vst [vmem:[#allocation2] sm:$0xff] %v205_v7  ;;  %v320_v0 = vadd.f32 %v319_v5, %v6018_v4 }
  0xfc   :  { %366 = vst [vmem:[#allocation2 + $0x10] sm:$0xff] %v318_v6  ;;  %365 = vst [vmem:[#allocation2 + $0x8] sm:$0xff] %v207_v56  ;;  %v210_v58 = vpop.f32.mrb[2].mxu0 }
  0xfd   :  { %367 = vst [vmem:[#allocation2 + $0x18] sm:$0xff] %v320_v0  ;;  %v211_v13 = vadd.f32 %v210_v58, %v6009_v3  ;;  %v323_v54 = vpop.f32.mrb[2].mxu1  ;;  %v212_v62 = vpop.f32.mrb[3].mxu0 }
  0xfe   :  { %v324_v63 = vadd.f32 %v323_v54, %v6012_v11  ;;  %v213_v57 = vadd.f32 %v212_v62, %v6015_v10  ;;  %v325_v52 = vpop.f32.mrb[3].mxu1 }
  0xff   :  { %368 = vst [vmem:[#allocation2 + $0x20] sm:$0xff] %v211_v13  ;;  %v326_v61 = vadd.f32 %v325_v52, %v6018_v4 }
 0x100   :  { %370 = vst [vmem:[#allocation2 + $0x30] sm:$0xff] %v324_v63  ;;  %369 = vst [vmem:[#allocation2 + $0x28] sm:$0xff] %v213_v57  ;;  %v216_v2 = vpop.f32.mrb[4].mxu0 }
 0x101   :  { %371 = vst [vmem:[#allocation2 + $0x38] sm:$0xff] %v326_v61  ;;  %v217_v56 = vadd.f32 %v216_v2, %v6009_v3  ;;  %v329_v5 = vpop.f32.mrb[4].mxu1  ;;  %v218_v0 = vpop.f32.mrb[5].mxu0 }
 0x102   :  { %v330_v58 = vadd.f32 %v329_v5, %v6012_v11  ;;  %v219_v6 = vadd.f32 %v218_v0, %v6015_v10  ;;  %v331_v7 = vpop.f32.mrb[5].mxu1 }
 0x103   :  { %372 = vst [vmem:[#allocation2 + $0x40] sm:$0xff] %v217_v56  ;;  %v332_v54 = vadd.f32 %v331_v7, %v6018_v4 }
 0x104   :  { %374 = vst [vmem:[#allocation2 + $0x50] sm:$0xff] %v330_v58  ;;  %373 = vst [vmem:[#allocation2 + $0x48] sm:$0xff] %v219_v6  ;;  %v222_v62 = vpop.f32.mrb[6].mxu0 }
 0x105   :  { %375 = vst [vmem:[#allocation2 + $0x58] sm:$0xff] %v332_v54  ;;  %v223_v52 = vadd.f32 %v222_v62, %v6009_v3  ;;  %v335_v57 = vpop.f32.mrb[6].mxu1  ;;  %v224_v13 = vpop.f32.mrb[7].mxu0 }
 0x106   :  { %v336_v63 = vadd.f32 %v335_v57, %v6012_v11  ;;  %v225_v61 = vadd.f32 %v224_v13, %v6015_v10  ;;  %v337_v2 = vpop.f32.mrb[7].mxu1 }
 0x107   :  { %376 = vst [vmem:[#allocation2 + $0x60] sm:$0xff] %v223_v52  ;;  %v338_v5 = vadd.f32 %v337_v2, %v6018_v4 }
 0x108   :  { %378 = vst [vmem:[#allocation2 + $0x70] sm:$0xff] %v336_v63  ;;  %377 = vst [vmem:[#allocation2 + $0x68] sm:$0xff] %v225_v61  ;;  %v228_v56 = vpop.f32.mrb[8].mxu0 }
 0x109   :  { %379 = vst [vmem:[#allocation2 + $0x78] sm:$0xff] %v338_v5  ;;  %v229_v0 = vadd.f32 %v228_v56, %v6009_v3  ;;  %v341_v58 = vpop.f32.mrb[8].mxu1  ;;  %v230_v6 = vpop.f32.mrb[9].mxu0 }
 0x10a   :  { %v342_v7 = vadd.f32 %v341_v58, %v6012_v11  ;;  %v231_v54 = vadd.f32 %v230_v6, %v6015_v10  ;;  %v343_v62 = vpop.f32.mrb[9].mxu1 }
 0x10b   :  { %380 = vst [vmem:[#allocation2 + $0x80] sm:$0xff] %v229_v0  ;;  %v344_v57 = vadd.f32 %v343_v62, %v6018_v4 }
 0x10c   :  { %382 = vst [vmem:[#allocation2 + $0x90] sm:$0xff] %v342_v7  ;;  %381 = vst [vmem:[#allocation2 + $0x88] sm:$0xff] %v231_v54  ;;  %v234_v52 = vpop.f32.mrb[10].mxu0 }
 0x10d   :  { %383 = vst [vmem:[#allocation2 + $0x98] sm:$0xff] %v344_v57  ;;  %v235_v13 = vadd.f32 %v234_v52, %v6009_v3  ;;  %v347_v63 = vpop.f32.mrb[10].mxu1  ;;  %v236_v61 = vpop.f32.mrb[11].mxu0 }
 0x10e   :  { %v348_v2 = vadd.f32 %v347_v63, %v6012_v11  ;;  %v237_v5 = vadd.f32 %v236_v61, %v6015_v10  ;;  %v349_v56 = vpop.f32.mrb[11].mxu1  ;;  %v460_v63 = vld [vmem:[%s8002_s8] sm:$0xf]  ;;  %s6103_s8 = smov 0  }
 0x10f   :  { %384 = vst [vmem:[#allocation2 + $0xa0] sm:$0xff] %v235_v13  ;;  %v350_v58 = vadd.f32 %v349_v56, %v6018_v4 }
 0x110   :  { %386 = vst [vmem:[#allocation2 + $0xb0] sm:$0xff] %v348_v2  ;;  %385 = vst [vmem:[#allocation2 + $0xa8] sm:$0xff] %v237_v5  ;;  %v240_v0 = vpop.f32.mrb[12].mxu0 }
 0x111   :  { %387 = vst [vmem:[#allocation2 + $0xb8] sm:$0xff] %v350_v58  ;;  %v241_v6 = vadd.f32 %v240_v0, %v6009_v3  ;;  %v353_v7 = vpop.f32.mrb[12].mxu1  ;;  %v242_v54 = vpop.f32.mrb[13].mxu0  ;;  %v6053_v58 = vrot.slane %v460_v63, %v5994_v8 }
 0x112   :  { %v354_v62 = vadd.f32 %v353_v7, %v6012_v11  ;;  %v243_v57 = vadd.f32 %v242_v54, %v6015_v10  ;;  %v355_v52 = vpop.f32.mrb[13].mxu1 }
 0x113   :  { %388 = vst [vmem:[#allocation2 + $0xc0] sm:$0xff] %v241_v6  ;;  %v356_v13 = vadd.f32 %v355_v52, %v6018_v4  ;;  %v6058_v6 = vrot.slane %v460_v63, %v6000_v1 }
 0x114   :  { %390 = vst [vmem:[#allocation2 + $0xd0] sm:$0xff] %v354_v62  ;;  %389 = vst [vmem:[#allocation2 + $0xc8] sm:$0xff] %v243_v57  ;;  %v246_v61 = vpop.f32.mrb[14].mxu0  ;;  %v6061_v62 = vrot.slane %v460_v63, %v6003_v12 }
 0x115   :  { %391 = vst [vmem:[#allocation2 + $0xd8] sm:$0xff] %v356_v13  ;;  %v247_v2 = vadd.f32 %v246_v61, %v6009_v3  ;;  %v359_v5 = vpop.f32.mrb[14].mxu1  ;;  %v248_v56 = vpop.f32.mrb[15].mxu0  ;;  %v6065_v3 = vrot.slane %v460_v63, %v6006_v14 }
 0x116   :  { %v360_v0 = vadd.f32 %v359_v5, %v6012_v11  ;;  %v249_v7 = vadd.f32 %v248_v56, %v6015_v10  ;;  %v361_v54 = vpop.f32.mrb[15].mxu1 }
 0x117   :  { %392 = vst [vmem:[#allocation2 + $0xe0] sm:$0xff] %v247_v2  ;;  %v362_v57 = vadd.f32 %v361_v54, %v6018_v4 }
 0x118   :  { %394 = vst [vmem:[#allocation2 + $0xf0] sm:$0xff] %v360_v0  ;;  %393 = vst [vmem:[#allocation2 + $0xe8] sm:$0xff] %v249_v7  ;;  %v548_v52 = vpop.f32.mrb[16].mxu0 }
 0x119   :  { %395 = vst [vmem:[#allocation2 + $0xf8] sm:$0xff] %v362_v57  ;;  %v549_v11 = vadd.f32 %v548_v52, %v6053_v58  ;;  %v661_v10 = vpop.f32.mrb[16].mxu1  ;;  %v550_v13 = vpop.f32.mrb[17].mxu0 }
 0x11a   :  { %v662_v61 = vadd.f32 %v661_v10, %v6058_v6  ;;  %v551_v5 = vadd.f32 %v550_v13, %v6061_v62  ;;  %v663_v56 = vpop.f32.mrb[17].mxu1 }
 0x11b   :  { %708 = vst [vmem:[#allocation3] sm:$0xff] %v549_v11  ;;  %v664_v2 = vadd.f32 %v663_v56, %v6065_v3 }
 0x11c   :  { %710 = vst [vmem:[#allocation3 + $0x10] sm:$0xff] %v662_v61  ;;  %709 = vst [vmem:[#allocation3 + $0x8] sm:$0xff] %v551_v5  ;;  %v554_v4 = vpop.f32.mrb[18].mxu0 }
 0x11d   :  { %711 = vst [vmem:[#allocation3 + $0x18] sm:$0xff] %v664_v2  ;;  %v555_v63 = vadd.f32 %v554_v4, %v6053_v58  ;;  %v667_v0 = vpop.f32.mrb[18].mxu1  ;;  %v556_v7 = vpop.f32.mrb[19].mxu0 }
 0x11e   :  { %v668_v54 = vadd.f32 %v667_v0, %v6058_v6  ;;  %v557_v57 = vadd.f32 %v556_v7, %v6061_v62  ;;  %v669_v52 = vpop.f32.mrb[19].mxu1 }
 0x11f   :  { %712 = vst [vmem:[#allocation3 + $0x20] sm:$0xff] %v555_v63  ;;  %v670_v10 = vadd.f32 %v669_v52, %v6065_v3 }
 0x120   :  { %714 = vst [vmem:[#allocation3 + $0x30] sm:$0xff] %v668_v54  ;;  %713 = vst [vmem:[#allocation3 + $0x28] sm:$0xff] %v557_v57  ;;  %v560_v11 = vpop.f32.mrb[20].mxu0 }
 0x121   :  { %715 = vst [vmem:[#allocation3 + $0x38] sm:$0xff] %v670_v10  ;;  %v561_v13 = vadd.f32 %v560_v11, %v6053_v58  ;;  %v673_v61 = vpop.f32.mrb[20].mxu1  ;;  %v562_v5 = vpop.f32.mrb[21].mxu0 }
 0x122   :  { %v674_v56 = vadd.f32 %v673_v61, %v6058_v6  ;;  %v563_v2 = vadd.f32 %v562_v5, %v6061_v62  ;;  %v675_v4 = vpop.f32.mrb[21].mxu1 }
 0x123   :  { %716 = vst [vmem:[#allocation3 + $0x40] sm:$0xff] %v561_v13  ;;  %v676_v0 = vadd.f32 %v675_v4, %v6065_v3 }
 0x124   :  { %718 = vst [vmem:[#allocation3 + $0x50] sm:$0xff] %v674_v56  ;;  %717 = vst [vmem:[#allocation3 + $0x48] sm:$0xff] %v563_v2  ;;  %v566_v63 = vpop.f32.mrb[22].mxu0 }
 0x125   :  { %719 = vst [vmem:[#allocation3 + $0x58] sm:$0xff] %v676_v0  ;;  %v567_v7 = vadd.f32 %v566_v63, %v6053_v58  ;;  %v679_v54 = vpop.f32.mrb[22].mxu1  ;;  %v568_v57 = vpop.f32.mrb[23].mxu0 }
 0x126   :  { %v680_v52 = vadd.f32 %v679_v54, %v6058_v6  ;;  %v569_v10 = vadd.f32 %v568_v57, %v6061_v62  ;;  %v681_v11 = vpop.f32.mrb[23].mxu1 }
 0x127   :  { %720 = vst [vmem:[#allocation3 + $0x60] sm:$0xff] %v567_v7  ;;  %v682_v61 = vadd.f32 %v681_v11, %v6065_v3 }
 0x128   :  { %722 = vst [vmem:[#allocation3 + $0x70] sm:$0xff] %v680_v52  ;;  %721 = vst [vmem:[#allocation3 + $0x68] sm:$0xff] %v569_v10  ;;  %v572_v13 = vpop.f32.mrb[24].mxu0 }
 0x129   :  { %723 = vst [vmem:[#allocation3 + $0x78] sm:$0xff] %v682_v61  ;;  %v573_v5 = vadd.f32 %v572_v13, %v6053_v58  ;;  %v685_v56 = vpop.f32.mrb[24].mxu1  ;;  %v574_v2 = vpop.f32.mrb[25].mxu0 }
 0x12a   :  { %v686_v4 = vadd.f32 %v685_v56, %v6058_v6  ;;  %v575_v0 = vadd.f32 %v574_v2, %v6061_v62  ;;  %v687_v63 = vpop.f32.mrb[25].mxu1 }
 0x12b   :  { %724 = vst [vmem:[#allocation3 + $0x80] sm:$0xff] %v573_v5  ;;  %v688_v54 = vadd.f32 %v687_v63, %v6065_v3 }
 0x12c   :  { %726 = vst [vmem:[#allocation3 + $0x90] sm:$0xff] %v686_v4  ;;  %725 = vst [vmem:[#allocation3 + $0x88] sm:$0xff] %v575_v0  ;;  %v578_v7 = vpop.f32.mrb[26].mxu0 }
 0x12d   :  { %727 = vst [vmem:[#allocation3 + $0x98] sm:$0xff] %v688_v54  ;;  %v579_v57 = vadd.f32 %v578_v7, %v6053_v58  ;;  %v691_v52 = vpop.f32.mrb[26].mxu1  ;;  %v580_v10 = vpop.f32.mrb[27].mxu0 }
 0x12e   :  { %v692_v11 = vadd.f32 %v691_v52, %v6058_v6  ;;  %v581_v61 = vadd.f32 %v580_v10, %v6061_v62  ;;  %v693_v13 = vpop.f32.mrb[27].mxu1 }
 0x12f   :  { %728 = vst [vmem:[#allocation3 + $0xa0] sm:$0xff] %v579_v57  ;;  %v694_v56 = vadd.f32 %v693_v13, %v6065_v3 }
 0x130   :  { %730 = vst [vmem:[#allocation3 + $0xb0] sm:$0xff] %v692_v11  ;;  %729 = vst [vmem:[#allocation3 + $0xa8] sm:$0xff] %v581_v61  ;;  %v584_v5 = vpop.f32.mrb[28].mxu0 }
 0x131   :  { %731 = vst [vmem:[#allocation3 + $0xb8] sm:$0xff] %v694_v56  ;;  %v585_v2 = vadd.f32 %v584_v5, %v6053_v58  ;;  %v697_v4 = vpop.f32.mrb[28].mxu1  ;;  %v586_v0 = vpop.f32.mrb[29].mxu0 }
 0x132   :  { %v698_v63 = vadd.f32 %v697_v4, %v6058_v6  ;;  %v587_v54 = vadd.f32 %v586_v0, %v6061_v62  ;;  %v699_v7 = vpop.f32.mrb[29].mxu1  ;;  %v6101_v0 = vmov 0.0  }
 0x133   :  { %732 = vst [vmem:[#allocation3 + $0xc0] sm:$0xff] %v585_v2  ;;  %v700_v52 = vadd.f32 %v699_v7, %v6065_v3  ;;  %v6099_v2 = vmov 0.0  }
 0x134   :  { %734 = vst [vmem:[#allocation3 + $0xd0] sm:$0xff] %v698_v63  ;;  %733 = vst [vmem:[#allocation3 + $0xc8] sm:$0xff] %v587_v54  ;;  %v590_v57 = vpop.f32.mrb[30].mxu0 }
 0x135   :  { %735 = vst [vmem:[#allocation3 + $0xd8] sm:$0xff] %v700_v52  ;;  %v591_v10 = vadd.f32 %v590_v57, %v6053_v58  ;;  %v703_v11 = vpop.f32.mrb[30].mxu1  ;;  %v592_v61 = vpop.f32.mrb[31].mxu0 }
 0x136   :  { %v704_v13 = vadd.f32 %v703_v11, %v6058_v6  ;;  %v593_v56 = vadd.f32 %v592_v61, %v6061_v62  ;;  %v705_v5 = vpop.f32.mrb[31].mxu1 }
 0x137   :  { %736 = vst [vmem:[#allocation3 + $0xe0] sm:$0xff] %v591_v10  ;;  %v706_v4 = vadd.f32 %v705_v5, %v6065_v3 }
 0x138   :  { %738 = vst [vmem:[#allocation3 + $0xf0] sm:$0xff] %v704_v13  ;;  %737 = vst [vmem:[#allocation3 + $0xe8] sm:$0xff] %v593_v56 }
 0x139   :  { %739 = vst [vmem:[#allocation3 + $0xf8] sm:$0xff] %v706_v4 }
 0x13a LB: > { %v8233_v9 = vld [vmem:[#allocation8_spill] sm:$0xff]  ;;  %v8234_v17 = vld [vmem:[#allocation11_spill] sm:$0xff]  ;;  %v4116_v62 = vpack.c.bf16 %v5418_v26, %v5398_v22  ;;  %v8235_v16 = vld [vmem:[#allocation10_spill] sm:$0xff]  ;;  %v4118_v54 = vpack.c.bf16 %v5413_v25, %v5393_v21  ;;  %v4148_v7 = vpack.c.bf16 %v5428_v28, %v5408_v24  ;;  %v4120_v52 = vpack.c.bf16 %v5458_v34, %v5438_v30  ;;  %s3770_s17 = sshll.u32 %s4766_s8, 5  ;;  %s3743_s19 = sshll.u32 %s4766_s8, 3  ;;  %s4766_s8 = sphi %s6103_s8, %s874_s8   ;;  %v4762_v0 = vphi %v6101_v0, %v1057_v0   ;;  %v4758_v2 = vphi %v6099_v2, %v1058_v2  }
 0x13b   : > { %v4112_v58 = vpack.c.bf16 %v5378_v18, %v8233_v9  ;;  %v4114_v6 = vpack.c.bf16 %v8234_v17, %v5353_v59  ;;  %v4144_v3 = vpack.c.bf16 %v5388_v20, %v8235_v16  ;;  %v8236_v15 = vld [vmem:[#allocation9_spill] sm:$0xff]  ;;  %v4150_v57 = vpack.c.bf16 %v5423_v27, %v5403_v23  ;;  %v8244_v9 = vld [vmem:[#allocation14_spill] sm:$0xff]  ;;  %v8249_v17 = vld [vmem:[#allocation23_spill] sm:$0xff]  ;;  %s879_s18 = scalar_lea.vmem [#allocation2], %s3770_s17  ;;  %s1067_s20 = scalar_lea.vmem [#allocation4], %s3743_s19 }
 0x13c   : > { %v4146_v63 = vpack.c.bf16 %v5383_v19, %v8236_v15  ;;  %v4152_v10 = vpack.c.bf16 %v5468_v36, %v5448_v32  ;;  %v4789_v11 = vmov 0.0   ;;  %v4122_v61 = vpack.c.bf16 %v5453_v33, %v5433_v29  ;;  %v8245_v15 = vld [vmem:[#allocation17_spill] sm:$0xff]  ;;  %v8247_v16 = vld [vmem:[#allocation26_spill] sm:$0xff] }
 0x13d   : > { %4113 = vmatprep.subr.bf16.mxu0 %v4112_v58  ;;  %4145 = vmatprep.subr.bf16.mxu1 %v4144_v3  ;;  %v4124_v13 = vpack.c.bf16 %v5498_v42, %v5478_v38  ;;  %v4154_v56 = vpack.c.bf16 %v5463_v35, %v5443_v31  ;;  %v4790_v5 = vmov 0   ;;  %v1050_v4 = vstv %s4766_s8  ;;  %s874_s8 = sadd.s32 1, %s4766_s8  }
 0x13e   : > { %4115 = vmatpush1.bf16.msra.mxu0 %v4114_v6  ;;  %4147 = vmatpush1.bf16.msra.mxu1 %v4146_v63  ;;  %v4156_v58 = vpack.c.bf16 %v5508_v44, %v5488_v40  ;;  %vm1051_vm0 = vcmp.gt.s32.totalorder %v5348_v46, %v1050_v4  ;;  %v4126_v6 = vpack.c.bf16 %v5493_v41, %v5473_v37  ;;  %v8241_v4 = vld [vmem:[#allocation16_spill] sm:$0xff]  ;;  %p871_p0 = scmp.ge.s32.totalorder %s874_s8, 8  }
 0x13f   : > { %4117 = vmatprep.subr.bf16.mxu0 %v4116_v62  ;;  %4149 = vmatprep.subr.bf16.mxu1 %v4148_v7  ;;  %v1052_v62 = vsel %vm1051_vm0, 1, %v4790_v5  ;;  %v4128_v3 = vpack.c.bf16 %v5538_v51, %v5518_v47  ;;  %v4158_v63 = vpack.c.bf16 %v5503_v43, %v5483_v39  ;;  %v4160_v7 = vpack.c.bf16 %v5548_v53, %v5528_v49  ;;  %s6198_s21 = smov (%p871_p0), 0  }
 0x140   : > { %948 = vmatprep.mubr.f32.mxu0 %v4789_v11  ;;  %1019 = vmatprep.mubr.f32.mxu1 %v4789_v11 }
 0x141   : > { %4411 = vset.pattern.permute.xlu0 %v4790_v5  ;;  %v8240_v5 = vld [vmem:[#allocation13_spill] sm:$0xff] }
 0x142   : > { %4119 = vmatpush1.bf16.msra.mxu0 %v4118_v54  ;;  %4151 = vmatpush1.bf16.msra.mxu1 %v4150_v57  ;;  %v3742_v54 = vsel %vm1051_vm0, 1.0, %v4789_v11  ;;  %v4132_v57 = vpack.c.bf16 %v5578_v60, %v5558_v55  ;;  %v8239_v11 = vld [vmem:[#allocation18_spill] sm:$0xff] }
 0x143   : > { %4121 = vmatprep.subr.bf16.mxu0 %v4120_v52  ;;  %4153 = vmatprep.subr.bf16.mxu1 %v4152_v10  ;;  %v4130_v52 = vpack.c.bf16 %v5533_v50, %v5513_v45  ;;  %v8237_v10 = vld [vmem:[#allocation12_spill] sm:$0xff] }
 0x144   : > { %1054 = vperm.xlu0 %4411, %v1052_v62   ;;  %v8243_v62 = vld [vmem:[#allocation24_spill] sm:$0xff] }
 0x146   : > { %4123 = vmatpush1.bf16.msra.mxu0 %v4122_v61  ;;  %4155 = vmatpush1.bf16.msra.mxu1 %v4154_v56  ;;  %v4162_v61 = vpack.c.bf16 %v8237_v10, %v5523_v48 }
 0x147   : > { %4125 = vmatprep.subr.bf16.mxu0 %v4124_v13  ;;  %4157 = vmatprep.subr.bf16.mxu1 %v4156_v58  ;;  %v8238_v13 = vld [vmem:[#allocation15_spill] sm:$0xff]  ;;  %v4134_v58 = vpack.c.bf16 %v8241_v4, %v8240_v5  ;;  %v8252_v5 = vld [vmem:[#allocation21_spill] sm:$0xff] }
 0x148   : > { %1062 = vperm.xlu0 %4411, %v3742_v54   ;;  %v4164_v56 = vpack.c.bf16 %v8239_v11, %v8238_v13  ;;  %v4166_v54 = vpack.c.bf16 %v8245_v15, %v8244_v9  ;;  %v8251_v11 = vld [vmem:[#allocation32_spill] sm:$0xff]  ;;  %v8253_v4 = vld [vmem:[#allocation25_spill] sm:$0xff]  ;;  %v8255_v9 = vld [vmem:[#allocation34_spill] sm:$0xff] }
 0x14a   : > { %4127 = vmatpush1.bf16.msra.mxu0 %v4126_v6  ;;  %4159 = vmatpush1.bf16.msra.mxu1 %v4158_v63  ;;  %v8242_v6 = vld [vmem:[#allocation20_spill] sm:$0xff]  ;;  %v8246_v63 = vld [vmem:[#allocation22_spill] sm:$0xff] }
 0x14b   : > { %4129 = vmatprep.subr.bf16.mxu0 %v4128_v3  ;;  %4161 = vmatprep.subr.bf16.mxu1 %v4160_v7  ;;  %v4136_v3 = vpack.c.bf16 %v8243_v62, %v8242_v6  ;;  %v4168_v10 = vpack.c.bf16 %v8247_v16, %v8246_v63  ;;  %v8248_v7 = vld [vmem:[#allocation19_spill] sm:$0xff]  ;;  %v8254_v6 = vld [vmem:[#allocation30_spill] sm:$0xff]  ;;  %v8259_v62 = vld [vmem:[#allocation33_spill] sm:$0xff] }
 0x14c   : > { %v4138_v13 = vpack.c.bf16 %v8249_v17, %v8248_v7  ;;  %v4172_v15 = vpack.c.bf16 %v8255_v9, %v8254_v6  ;;  %v8257_v16 = vld [vmem:[#allocation31_spill] sm:$0xff]  ;;  %v8258_v17 = vld [vmem:[#allocation29_spill] sm:$0xff]  ;;  %v881_v63 = vld [vmem:[%s879_s18 + $0x8] sm:$0xff] }
 0x14d   : > { %v882_v9 = vld [vmem:[%s879_s18 + $0x10] sm:$0xff] }
 0x14e   : > { %4131 = vmatpush1.bf16.msra.mxu0 %v4130_v52  ;;  %4163 = vmatpush1.bf16.msra.mxu1 %v4162_v61  ;;  %v8250_v52 = vld [vmem:[#allocation28_spill] sm:$0xff]  ;;  %v4170_v61 = vpack.c.bf16 %v8253_v4, %v8252_v5 }
 0x14f   : > { %4133 = vmatprep.subr.bf16.mxu0 %v4132_v57  ;;  %4165 = vmatprep.subr.bf16.mxu1 %v4164_v56  ;;  %v4140_v57 = vpack.c.bf16 %v8251_v11, %v8250_v52  ;;  %v8256_v56 = vld [vmem:[#allocation27_spill] sm:$0xff] }
 0x152   : > { %4135 = vmatpush1.bf16.msra.mxu0 %v4134_v58  ;;  %4167 = vmatpush1.bf16.msra.mxu1 %v4166_v54  ;;  %v4142_v58 = vpack.c.bf16 %v8257_v16, %v8256_v56  ;;  %v880_v54 = vld [vmem:[%s879_s18] sm:$0xff] }
 0x153   : > { %4137 = vmatprep.subr.bf16.mxu0 %v4136_v3  ;;  %4169 = vmatprep.subr.bf16.mxu1 %v4168_v10  ;;  %v4174_v3 = vpack.c.bf16 %v8259_v62, %v8258_v17 }
 0x156   : > { %4139 = vmatpush1.bf16.msra.mxu0 %v4138_v13  ;;  %4171 = vmatpush1.bf16.msra.mxu1 %v4170_v61  ;;  %v883_v61 = vld [vmem:[%s879_s18 + $0x18] sm:$0xff] }
 0x157   : > { %4141 = vmatprep.subr.bf16.mxu0 %v4140_v57  ;;  %4173 = vmatprep.subr.bf16.mxu1 %v4172_v15 }
 0x15a   : > { %4143 = vmatpush1.bf16.msra.mxu0 %v4142_v58  ;;  %4175 = vmatpush1.bf16.msra.mxu1 %v4174_v3 }
 0x15d   : > { %949 = vmatmul.mubr.f32.vlgmr.msra.gmra.mrb[0].mxu0 %v4762_v0  ;;  %1020 = vmatmul.mubr.f32.vlgmr.msra.gmra.mrb[0].mxu1 %v4762_v0 }
 0x230   : > { %v950_v10 = vpop.f32.mrb[0].mxu0  ;;  %v1021_v11 = vpop.f32.mrb[0].mxu1 }
 0x231   : > { %v951_v7 = vadd.f32 %v950_v10, %v880_v54  ;;  %v952_v13 = vpop.f32.mrb[1].mxu0  ;;  %v1023_v5 = vpop.f32.mrb[1].mxu1  ;;  %v1022_v56 = vadd.f32 %v1021_v11, %v882_v9 }
 0x232   : > { %v953_v52 = vadd.f32 %v952_v13, %v881_v63  ;;  %v1024_v6 = vadd.f32 %v1023_v5, %v883_v61 }
 0x233   : > { %v3739_v57 = vmul.f32 -1.442695, %v951_v7  ;;  %v1055_v7 = vpop.permute.xlu0 %1054 }
 0x234   : > { %v3740_v4 = vmul.f32 -1.442695, %v953_v52  ;;  %v3741_v15 = vmul.f32 -1.442695, %v1024_v6  ;;  %vm1056_vm1 = vcmp.eq.s32.totalorder %v1055_v7, 1 }
 0x235   : > { %4412 = vpow2.f32 %v3739_v57 }
 0x236   : > { %4414 = vpow2.f32 %v3740_v4 }
 0x237   : > { %4416 = vpow2.f32 %v3741_v15  ;;  %v1063_v6 = vpop.permute.xlu0 %1062  ;;  %v6194_v15 = vmov (%p871_p0), 0.0  }
 0x238   : > { %4418 = vtanh.f32 %v1022_v56  ;;  %v6196_v56 = vmov (%p871_p0), 0.0  }
 0x23f   : > { %v4413_v16 = vpop.eup %4412 }
 0x240   : > { %v4415_v58 = vpop.eup %4414  ;;  %v1029_v17 = vadd.f32 1.0, %v4413_v16 }
 0x241   : > { %v1035_v62 = vadd.f32 1.0, %v4415_v58  ;;  %v4417_v3 = vpop.eup %4416 }
 0x242   : > { %4420 = vrcp.f32 %v1029_v17  ;;  %v4419_v54 = vpop.eup %4418  ;;  %v1042_v10 = vadd.f32 1.0, %v4417_v3 }
 0x243   : > { %4422 = vrcp.f32 %v1035_v62 }
 0x244   : > { %4424 = vrcp.f32 %v1042_v10 }
 0x24c   : > { %v4421_v63 = vpop.eup %4420 }
 0x24d   : > { %v4423_v13 = vpop.eup %4422  ;;  %v1046_v52 = vmul.f32 %v4421_v63, %v4419_v54 }
 0x24e   : > { %v1045_v57 = vmul.f32 %v4758_v2, %v4423_v13  ;;  %v4425_v5 = vpop.eup %4424 }
 0x250   : > { %v1047_v11 = vadd.f32 %v1046_v52, %v1045_v57 }
 0x252   : > { %4426 = vtanh.f32 %v1047_v11  ;;  %v1058_v2 = vsel %vm1056_vm1, %v1047_v11, %v4758_v2  }
 0x25c   : > { %v4427_v4 = vpop.eup %4426  ;;  %873 = sbr.rel (!%p871_p0) target bundleno = 314 (0x13a), region = 98 }
 0x25d   : > { %v1049_v61 = vmul.f32 %v4427_v4, %v4425_v5 }
 0x25f   : > { %v1057_v0 = vsel %vm1056_vm1, %v1049_v61, %v4762_v0  }
 0x260   : > { %v1065_v9 = vmul.f32 %v1063_v6, %v1057_v0 }
 0x262   : > { %1068 = vst [vmem:[%s1067_s20] sm:$0xff] %v1065_v9 }
 0x263 LB: > { %v8260_v0 = vld [vmem:[#allocation36_spill] sm:$0xff]  ;;  %v8262_v59 = vld [vmem:[#allocation35_spill] sm:$0xff]  ;;  %v8266_v23 = vld [vmem:[#allocation38_spill] sm:$0xff]  ;;  %v4791_v44 = vmov 0.0   ;;  %s6230_s22 = ssub.s32 7, %s4778_s21  ;;  %v4792_v2 = vmov 0   ;;  %s4778_s21 = sphi %s6198_s21, %s1074_s21   ;;  %v4774_v56 = vphi %v6196_v56, %v1258_v56   ;;  %v4770_v15 = vphi %v6194_v15, %v1259_v15  }
 0x264   : > { %v8261_v16 = vld [vmem:[#allocation40_spill] sm:$0xff]  ;;  %v8263_v18 = vld [vmem:[#allocation39_spill] sm:$0xff]  ;;  %v8267_v24 = vld [vmem:[#allocation42_spill] sm:$0xff]  ;;  %1149 = vmatprep.mubr.f32.mxu0 %v4791_v44  ;;  %1220 = vmatprep.mubr.f32.mxu1 %v4791_v44  ;;  %v1251_v17 = vstv %s6230_s22  ;;  %s3771_s23 = sshll.u32 %s6230_s22, 5  ;;  %s3750_s1 = sshll.u32 %s6230_s22, 3 }
 0x265   : > { %v4176_v58 = vpack.c.bf16 %v8261_v16, %v8260_v0  ;;  %v4178_v19 = vpack.c.bf16 %v8263_v18, %v8262_v59  ;;  %v8264_v20 = vld [vmem:[#allocation44_spill] sm:$0xff]  ;;  %v4208_v25 = vpack.c.bf16 %v8267_v24, %v8266_v23  ;;  %v8268_v26 = vld [vmem:[#allocation37_spill] sm:$0xff]  ;;  %v8270_v29 = vld [vmem:[#allocation43_spill] sm:$0xff]  ;;  %4428 = vset.pattern.permute.xlu0 %v4792_v2  ;;  %vm1252_vm2 = vcmp.gt.s32.totalorder %v5348_v46, %v1251_v17  ;;  %s1080_s24 = scalar_lea.vmem [#allocation3], %s3771_s23  ;;  %s1268_s3 = scalar_lea.vmem [#allocation5], %s3750_s1 }
 0x266   : > { %v8265_v21 = vld [vmem:[#allocation48_spill] sm:$0xff]  ;;  %v8269_v27 = vld [vmem:[#allocation41_spill] sm:$0xff]  ;;  %v8271_v30 = vld [vmem:[#allocation47_spill] sm:$0xff]  ;;  %v1253_v13 = vsel %vm1252_vm2, 1, %v4792_v2  ;;  %v3749_v6 = vsel %vm1252_vm2, 1.0, %v4791_v44  ;;  %s1074_s21 = sadd.s32 1, %s4778_s21  }
 0x267   : > { %v4180_v22 = vpack.c.bf16 %v8265_v21, %v8264_v20  ;;  %4177 = vmatprep.subr.bf16.mxu0 %v4176_v58  ;;  %v4210_v28 = vpack.c.bf16 %v8269_v27, %v8268_v26  ;;  %v4182_v31 = vpack.c.bf16 %v8271_v30, %v8270_v29  ;;  %v8272_v32 = vld [vmem:[#allocation46_spill] sm:$0xff]  ;;  %v8274_v35 = vld [vmem:[#allocation52_spill] sm:$0xff]  ;;  %4209 = vmatprep.subr.bf16.mxu1 %v4208_v25  ;;  %v8276_v38 = vld [vmem:[#allocation45_spill] sm:$0xff]  ;;  %p1071_p1 = scmp.ge.s32.totalorder %s1074_s21, 8  }
 0x268   : > { %4179 = vmatpush1.bf16.msra.mxu0 %v4178_v19  ;;  %v8273_v33 = vld [vmem:[#allocation50_spill] sm:$0xff]  ;;  %v8275_v36 = vld [vmem:[#allocation56_spill] sm:$0xff]  ;;  %v8277_v39 = vld [vmem:[#allocation49_spill] sm:$0xff]  ;;  %1255 = vperm.xlu0 %4428, %v1253_v13   ;;  %vm4794_vm4 = vmmov (%p1071_p1), 0   ;;  %vm1756_vm13 = vcmask (%p1071_p1), 1041409   ;;  %vm1758_vm14 = vcmask (%p1071_p1), 1042434  }
 0x269   : > { %v4212_v34 = vpack.c.bf16 %v8273_v33, %v8272_v32  ;;  %4181 = vmatprep.subr.bf16.mxu0 %v4180_v22  ;;  %v4184_v37 = vpack.c.bf16 %v8275_v36, %v8274_v35  ;;  %4211 = vmatpush1.bf16.msra.mxu1 %v4210_v28  ;;  %v4214_v40 = vpack.c.bf16 %v8277_v39, %v8276_v38  ;;  %v8278_v41 = vld [vmem:[#allocation54_spill] sm:$0xff]  ;;  %v8280_v45 = vld [vmem:[#allocation51_spill] sm:$0xff]  ;;  %v8282_v49 = vld [vmem:[#allocation60_spill] sm:$0xff]  ;;  %vm1760_vm15 = vcmask (%p1071_p1), 1043459  }
 0x26a   : > { %v8279_v42 = vld [vmem:[#allocation58_spill] sm:$0xff]  ;;  %v8281_v47 = vld [vmem:[#allocation55_spill] sm:$0xff]  ;;  %v8283_v50 = vld [vmem:[#allocation64_spill] sm:$0xff]  ;;  %vm1762_vm0 = vcmask (%p1071_p1), 1044484   ;;  %vm1764_vm1 = vcmask (%p1071_p1), 1045509   ;;  %vm1766_vm2 = vcmask (%p1071_p1), 1046534  }
 0x26b   : > { %4213 = vmatprep.subr.bf16.mxu1 %v4212_v34  ;;  %v4216_v43 = vpack.c.bf16 %v8279_v42, %v8278_v41  ;;  %v4186_v48 = vpack.c.bf16 %v8281_v47, %v8280_v45  ;;  %v4188_v51 = vpack.c.bf16 %v8283_v50, %v8282_v49  ;;  %v8284_v53 = vld [vmem:[#allocation53_spill] sm:$0xff]  ;;  %v8286_v62 = vld [vmem:[#allocation62_spill] sm:$0xff]  ;;  %v8288_v63 = vld [vmem:[#allocation59_spill] sm:$0xff] }
 0x26c   : > { %4183 = vmatpush1.bf16.msra.mxu0 %v4182_v31  ;;  %v8285_v55 = vld [vmem:[#allocation57_spill] sm:$0xff]  ;;  %v8287_v3 = vld [vmem:[#allocation66_spill] sm:$0xff]  ;;  %v8289_v10 = vld [vmem:[#allocation63_spill] sm:$0xff]  ;;  %1263 = vperm.xlu0 %4428, %v3749_v6  }
 0x26d   : > { %4185 = vmatprep.subr.bf16.mxu0 %v4184_v37  ;;  %4215 = vmatpush1.bf16.msra.mxu1 %v4214_v40  ;;  %v4218_v60 = vpack.c.bf16 %v8285_v55, %v8284_v53  ;;  %v4220_v54 = vpack.c.bf16 %v8287_v3, %v8286_v62  ;;  %v4190_v7 = vpack.c.bf16 %v8289_v10, %v8288_v63  ;;  %v8290_v52 = vld [vmem:[#allocation68_spill] sm:$0xff]  ;;  %v8292_v5 = vld [vmem:[#allocation61_spill] sm:$0xff]  ;;  %v8294_v9 = vld [vmem:[#allocation70_spill] sm:$0xff] }
 0x26e   : > { %4217 = vmatprep.subr.bf16.mxu1 %v4216_v43  ;;  %v8291_v57 = vld [vmem:[#allocation72_spill] sm:$0xff]  ;;  %v8293_v4 = vld [vmem:[#allocation65_spill] sm:$0xff]  ;;  %v8295_v0 = vld [vmem:[#allocation74_spill] sm:$0xff] }
 0x26f   : > { %v4192_v11 = vpack.c.bf16 %v8291_v57, %v8290_v52  ;;  %v4222_v61 = vpack.c.bf16 %v8293_v4, %v8292_v5  ;;  %v4224_v16 = vpack.c.bf16 %v8295_v0, %v8294_v9  ;;  %v8296_v58 = vld [vmem:[#allocation67_spill] sm:$0xff]  ;;  %v8298_v19 = vld [vmem:[#allocation76_spill] sm:$0xff]  ;;  %v8300_v22 = vld [vmem:[#allocation69_spill] sm:$0xff] }
 0x270   : > { %4187 = vmatpush1.bf16.msra.mxu0 %v4186_v48  ;;  %v8297_v59 = vld [vmem:[#allocation71_spill] sm:$0xff]  ;;  %v8299_v20 = vld [vmem:[#allocation80_spill] sm:$0xff]  ;;  %v8301_v23 = vld [vmem:[#allocation73_spill] sm:$0xff] }
 0x271   : > { %4189 = vmatprep.subr.bf16.mxu0 %v4188_v51  ;;  %4219 = vmatpush1.bf16.msra.mxu1 %v4218_v60  ;;  %v4194_v18 = vpack.c.bf16 %v8297_v59, %v8296_v58  ;;  %v4196_v21 = vpack.c.bf16 %v8299_v20, %v8298_v19  ;;  %v4226_v24 = vpack.c.bf16 %v8301_v23, %v8300_v22  ;;  %v8302_v25 = vld [vmem:[#allocation78_spill] sm:$0xff]  ;;  %v8304_v28 = vld [vmem:[#allocation75_spill] sm:$0xff]  ;;  %v8306_v31 = vld [vmem:[#allocation84_spill] sm:$0xff] }
 0x272   : > { %4221 = vmatprep.subr.bf16.mxu1 %v4220_v54  ;;  %v8303_v26 = vld [vmem:[#allocation82_spill] sm:$0xff]  ;;  %v8305_v29 = vld [vmem:[#allocation79_spill] sm:$0xff]  ;;  %v8307_v32 = vld [vmem:[#allocation88_spill] sm:$0xff] }
 0x273   : > { %v4228_v27 = vpack.c.bf16 %v8303_v26, %v8302_v25  ;;  %v4198_v30 = vpack.c.bf16 %v8305_v29, %v8304_v28  ;;  %v4200_v33 = vpack.c.bf16 %v8307_v32, %v8306_v31  ;;  %v8308_v34 = vld [vmem:[#allocation77_spill] sm:$0xff]  ;;  %v8310_v37 = vld [vmem:[#allocation86_spill] sm:$0xff]  ;;  %v8312_v40 = vld [vmem:[#allocation83_spill] sm:$0xff] }
 0x274   : > { %4191 = vmatpush1.bf16.msra.mxu0 %v4190_v7  ;;  %v8309_v35 = vld [vmem:[#allocation81_spill] sm:$0xff]  ;;  %v8311_v38 = vld [vmem:[#allocation90_spill] sm:$0xff]  ;;  %v8313_v41 = vld [vmem:[#allocation87_spill] sm:$0xff] }
 0x275   : > { %4193 = vmatprep.subr.bf16.mxu0 %v4192_v11  ;;  %4223 = vmatpush1.bf16.msra.mxu1 %v4222_v61  ;;  %v4230_v36 = vpack.c.bf16 %v8309_v35, %v8308_v34  ;;  %v4232_v39 = vpack.c.bf16 %v8311_v38, %v8310_v37  ;;  %v4202_v42 = vpack.c.bf16 %v8313_v41, %v8312_v40  ;;  %v8314_v43 = vld [vmem:[#allocation92_spill] sm:$0xff]  ;;  %v8316_v47 = vld [vmem:[#allocation85_spill] sm:$0xff]  ;;  %v8318_v50 = vld [vmem:[#allocation94_spill] sm:$0xff] }
 0x276   : > { %4225 = vmatprep.subr.bf16.mxu1 %v4224_v16  ;;  %v8315_v44 = vld [vmem:[#allocation96_spill] sm:$0xff]  ;;  %v8317_v48 = vld [vmem:[#allocation89_spill] sm:$0xff]  ;;  %v8319_v51 = vld [vmem:[#allocation98_spill] sm:$0xff] }
 0x277   : > { %v4204_v45 = vpack.c.bf16 %v8315_v44, %v8314_v43  ;;  %v4234_v49 = vpack.c.bf16 %v8317_v48, %v8316_v47  ;;  %v4236_v53 = vpack.c.bf16 %v8319_v51, %v8318_v50  ;;  %v8320_v55 = vld [vmem:[#allocation91_spill] sm:$0xff]  ;;  %v8322_v17 = vld [vmem:[#allocation93_spill] sm:$0xff]  ;;  %v1082_v63 = vld [vmem:[%s1080_s24 + $0x8] sm:$0xff] }
 0x278   : > { %4195 = vmatpush1.bf16.msra.mxu0 %v4194_v18  ;;  %v8321_v60 = vld [vmem:[#allocation95_spill] sm:$0xff]  ;;  %v8323_v62 = vld [vmem:[#allocation97_spill] sm:$0xff]  ;;  %v1084_v61 = vld [vmem:[%s1080_s24 + $0x18] sm:$0xff] }
 0x279   : > { %4197 = vmatprep.subr.bf16.mxu0 %v4196_v21  ;;  %4227 = vmatpush1.bf16.msra.mxu1 %v4226_v24  ;;  %v4206_v2 = vpack.c.bf16 %v8321_v60, %v8320_v55  ;;  %v4238_v3 = vpack.c.bf16 %v8323_v62, %v8322_v17  ;;  %v1081_v54 = vld [vmem:[%s1080_s24] sm:$0xff]  ;;  %v1083_v9 = vld [vmem:[%s1080_s24 + $0x10] sm:$0xff]  ;;  %v1307_v41 = vld [vmem:[%s7992_s10 + $0x28] sm:$0xff] (%p1071_p1) }
 0x27a   : > { %4229 = vmatprep.subr.bf16.mxu1 %v4228_v27  ;;  %v1567_v34 = vld [vmem:[%s7989_s2] sm:$0xff] (%p1071_p1)  ;;  %v1308_v44 = vld [vmem:[%s7992_s10 + $0x30] sm:$0xff] (%p1071_p1) }
 0x27b   :  { %v1302_v35 = vld [vmem:[%s7992_s10] sm:$0xff] (%p1071_p1)  ;;  %v1568_v37 = vcvt.s32.f32 (%p1071_p1), %v1567_v34  ;;  %v1312_v51 = vld [vmem:[%s7992_s10 + $0x50] sm:$0xff] (%p1071_p1)  ;;  %v1287_v34 = vld [vmem:[%s7991_s9 + $0x48] sm:$0xff] (%p1071_p1) }
 0x27c   : > { %4199 = vmatpush1.bf16.msra.mxu0 %v4198_v30  ;;  %v1306_v40 = vld [vmem:[%s7992_s10 + $0x20] sm:$0xff] (%p1071_p1)  ;;  %v1316_v62 = vld [vmem:[%s7992_s10 + $0x70] sm:$0xff] (%p1071_p1) }
 0x27d   : > { %4201 = vmatprep.subr.bf16.mxu0 %v4200_v33  ;;  %4231 = vmatpush1.bf16.msra.mxu1 %v4230_v36  ;;  %v1303_v36 = vld [vmem:[%s7992_s10 + $0x8] sm:$0xff] (%p1071_p1)  ;;  %v1310_v48 = vld [vmem:[%s7992_s10 + $0x40] sm:$0xff] (%p1071_p1) }
 0x27e   : > { %4233 = vmatprep.subr.bf16.mxu1 %v4232_v39  ;;  %v4240_v38 = vpack.c.bf16 (%p1071_p1), %v1303_v36, %v1302_v35  ;;  %v1314_v60 = vld [vmem:[%s7992_s10 + $0x60] sm:$0xff] (%p1071_p1)  ;;  %v6433_v36 = vld [vmem:[%s7994_s12 + $0x48] sm:$0xff] (%p1071_p1) }
 0x27f   :  { %v6428_v35 = vld [vmem:[%s7994_s12 + $0x40] sm:$0xff] (%p1071_p1)  ;;  %8333 = vst [vmem:[#allocation17_spill] sm:$0xff] (%p1071_p1), %v6433_v36 }
 0x280   : > { %4203 = vmatpush1.bf16.msra.mxu0 %v4202_v42  ;;  %v4248_v42 = vpack.c.bf16 (%p1071_p1), %v1307_v41, %v1306_v40  ;;  %8332 = vst [vmem:[#allocation16_spill] sm:$0xff] (%p1071_p1), %v6428_v35  ;;  %v1289_v40 = vld [vmem:[%s7991_s9 + $0x58] sm:$0xff] (%p1071_p1)  ;;  %v6447_v41 = vld [vmem:[%s7994_s12 + $0x50] sm:$0xff] (%p1071_p1) }
 0x281   : > { %4205 = vmatprep.subr.bf16.mxu0 %v4204_v45  ;;  %4235 = vmatpush1.bf16.msra.mxu1 %v4234_v49  ;;  %v1309_v45 = vld [vmem:[%s7992_s10 + $0x38] sm:$0xff] (%p1071_p1)  ;;  %v1311_v49 = vld [vmem:[%s7992_s10 + $0x48] sm:$0xff] (%p1071_p1)  ;;  %8334 = vst [vmem:[#allocation18_spill] sm:$0xff] (%p1071_p1), %v6447_v41 }
 0x282   : > { %4237 = vmatprep.subr.bf16.mxu1 %v4236_v53  ;;  %v4252_v47 = vpack.c.bf16 (%p1071_p1), %v1309_v45, %v1308_v44  ;;  %v4256_v50 = vpack.c.bf16 (%p1071_p1), %v1311_v49, %v1310_v48  ;;  %v1313_v53 = vld [vmem:[%s7992_s10 + $0x58] sm:$0xff] (%p1071_p1)  ;;  %v1290_v44 = vld [vmem:[%s7991_s9 + $0x60] sm:$0xff] (%p1071_p1)  ;;  %v6471_v49 = vld [vmem:[%s7994_s12 + $0x68] sm:$0xff] (%p1071_p1) }
 0x283   :  { %v4260_v55 = vpack.c.bf16 (%p1071_p1), %v1313_v53, %v1312_v51  ;;  %v6466_v48 = vld [vmem:[%s7994_s12 + $0x60] sm:$0xff] (%p1071_p1)  ;;  %8337 = vst [vmem:[#allocation21_spill] sm:$0xff] (%p1071_p1), %v6471_v49  ;;  %v1292_v51 = vld [vmem:[%s7991_s9 + $0x70] sm:$0xff] (%p1071_p1) }
 0x284   : > { %4207 = vmatpush1.bf16.msra.mxu0 %v4206_v2  ;;  %v1315_v2 = vld [vmem:[%s7992_s10 + $0x68] sm:$0xff] (%p1071_p1)  ;;  %8336 = vst [vmem:[#allocation20_spill] sm:$0xff] (%p1071_p1), %v6466_v48  ;;  %v4323_v53 = vpack.c.bf16 (%p1071_p1), %v6471_v49, %v6466_v48 }
 0x285   : > { %4239 = vmatpush1.bf16.msra.mxu1 %v4238_v3  ;;  %4241 = vmatprep.subr.bf16.mxu0 (%p1071_p1), %v4240_v38  ;;  %v4264_v17 = vpack.c.bf16 (%p1071_p1), %v1315_v2, %v1314_v60  ;;  %v1317_v3 = vld [vmem:[%s7992_s10 + $0x78] sm:$0xff] (%p1071_p1)  ;;  %v6485_v60 = vld [vmem:[%s7994_s12 + $0x70] sm:$0xff] (%p1071_p1) }
 0x286   :  { %8338 = vst [vmem:[#allocation22_spill] sm:$0xff] (%p1071_p1), %v6485_v60  ;;  %v6490_v2 = vld [vmem:[%s7994_s12 + $0x78] sm:$0xff] (%p1071_p1) }
 0x287   : > { %1150 = vmatmul.mubr.f32.vlgmr.msra.gmra.mrb[0].mxu0 %v4774_v56 }
 0x288   : > { %1221 = vmatmul.mubr.f32.vlgmr.msra.gmra.mrb[0].mxu1 %v4774_v56  ;;  %4243 = vmatpush3.bf16.msra.mxu0 (%p1071_p1), %v4240_v38 }
 0x28a   :  { %1569 = vxpose.xlu0.b32.start.end [1/1] (short) (narrow) (%p1071_p1), %v1568_v37, 8 }
 0x2e7   : > { %v1256_v24 = vpop.permute.xlu0 %1255 }
 0x2e8   : > { %vm1257_vm3 = vcmp.eq.s32.totalorder %v1256_v24, 1 }
 0x2eb   : > { %v1264_v32 = vpop.permute.xlu0 %1263 }
 0x35a   : > { %v1151_v10 = vpop.f32.mrb[0].mxu0 }
 0x35b   : > { %v1152_v7 = vadd.f32 %v1151_v10, %v1081_v54  ;;  %v1153_v13 = vpop.f32.mrb[1].mxu0  ;;  %v1222_v57 = vpop.f32.mrb[0].mxu1  ;;  %v4268_v54 = vpack.c.bf16 (%p1071_p1), %v1317_v3, %v1316_v62  ;;  %v1279_v10 = vld [vmem:[%s7991_s9 + $0x8] sm:$0xff] (%p1071_p1)  ;;  %v4326_v62 = vpack.c.bf16 (%p1071_p1), %v6490_v2, %v6485_v60 }
 0x35c   : > { %v1154_v52 = vadd.f32 %v1153_v13, %v1082_v63  ;;  %v1224_v5 = vpop.f32.mrb[1].mxu1  ;;  %v1223_v16 = vadd.f32 %v1222_v57, %v1083_v9  ;;  %v1278_v63 = vld [vmem:[%s7991_s9] sm:$0xff] (%p1071_p1)  ;;  %v1280_v13 = vld [vmem:[%s7991_s9 + $0x10] sm:$0xff] (%p1071_p1)  ;;  %v1271_v3 = vld [vmem:[#allocation4 + $0x8] sm:$0xff] (%p1071_p1) }
 0x35d   : > { %v3746_v11 = vmul.f32 -1.442695, %v1152_v7  ;;  %v1225_v6 = vadd.f32 %v1224_v5, %v1084_v61  ;;  %v4272_v7 = vpack.c.bf16 (%p1071_p1), %v1279_v10, %v1278_v63  ;;  %v6358_v57 = vld [vmem:[%s7994_s12] sm:$0xff] (%p1071_p1)  ;;  %v6368_v5 = vld [vmem:[%s7994_s12 + $0x10] sm:$0xff] (%p1071_p1)  ;;  %v1273_v63 = vld [vmem:[#allocation4 + $0x18] sm:$0xff] (%p1071_p1) }
 0x35e   : > { %v3747_v4 = vmul.f32 -1.442695, %v1154_v52  ;;  %v1281_v52 = vld [vmem:[%s7991_s9 + $0x18] sm:$0xff] (%p1071_p1)  ;;  %8324 = vst [vmem:[#allocation8_spill] sm:$0xff] (%p1071_p1), %v6358_v57  ;;  %8326 = vst [vmem:[#allocation10_spill] sm:$0xff] (%p1071_p1), %v6368_v5  ;;  %v1274_v10 = vld [vmem:[#allocation4 + $0x20] sm:$0xff] (%p1071_p1) }
 0x35f   : > { %4429 = vpow2.f32 %v3746_v11  ;;  %v3748_v0 = vmul.f32 -1.442695, %v1225_v6  ;;  %v6363_v11 = vld [vmem:[%s7994_s12 + $0x8] sm:$0xff] (%p1071_p1)  ;;  %v6376_v6 = vld [vmem:[%s7994_s12 + $0x18] sm:$0xff] (%p1071_p1) }
 0x360   : > { %4431 = vpow2.f32 %v3747_v4  ;;  %8325 = vst [vmem:[#allocation9_spill] sm:$0xff] (%p1071_p1), %v6363_v11  ;;  %v4793_v4 = vmov (%p1071_p1), 0.0|0.0   ;;  %v4305_v61 = vpack.c.bf16 (%p1071_p1), %v6363_v11, %v6358_v57  ;;  %8327 = vst [vmem:[#allocation11_spill] sm:$0xff] (%p1071_p1), %v6376_v6 }
 0x361   : > { %4433 = vpow2.f32 %v3748_v0  ;;  %4304 = vmatprep.subr.bf16.mxu1 (%p1071_p1), %v4793_v4  ;;  %v4276_v0 = vpack.c.bf16 (%p1071_p1), %v1281_v52, %v1280_v13  ;;  %v1276_v13 = vld [vmem:[#allocation4 + $0x30] sm:$0xff] (%p1071_p1)  ;;  %v1277_v52 = vld [vmem:[#allocation4 + $0x38] sm:$0xff] (%p1071_p1) }
 0x362   : > { %4435 = vtanh.f32 %v1223_v16  ;;  %v1282_v16 = vld [vmem:[%s7991_s9 + $0x20] sm:$0xff] (%p1071_p1)  ;;  %4306 = vmatpush3.bf16.msra.mxu1 (%p1071_p1), %v4305_v61  ;;  %v1585_v61 = vpop.trf.xlu0 (%p1071_p1) }
 0x363   :  { %4307 = vmatprep.subr.bf16.mxu1 (%p1071_p1), %v4793_v4 }
 0x369   : > { %v4430_v58 = vpop.eup %4429 }
 0x36a   : > { %v4432_v59 = vpop.eup %4431  ;;  %v1230_v18 = vadd.f32 1.0, %v4430_v58 }
 0x36b   : > { %v1236_v19 = vadd.f32 1.0, %v4432_v59  ;;  %v4434_v20 = vpop.eup %4433  ;;  %v4308_v59 = vpack.c.bf16 (%p1071_p1), %v6376_v6, %v6368_v5 }
 0x36c   : > { %4437 = vrcp.f32 %v1230_v18  ;;  %v4436_v21 = vpop.eup %4435  ;;  %v1243_v23 = vadd.f32 1.0, %v4434_v20  ;;  %v1283_v18 = vld [vmem:[%s7991_s9 + $0x28] sm:$0xff] (%p1071_p1) }
 0x36d   : > { %4439 = vrcp.f32 %v1236_v19  ;;  %v6390_v19 = vld [vmem:[%s7994_s12 + $0x20] sm:$0xff] (%p1071_p1)  ;;  %v6395_v20 = vld [vmem:[%s7994_s12 + $0x28] sm:$0xff] (%p1071_p1)  ;;  %4309 = vmatpush3.bf16.msra.mxu1 (%p1071_p1), %v4308_v59 }
 0x36e   : > { %4441 = vrcp.f32 %v1243_v23  ;;  %8328 = vst [vmem:[#allocation12_spill] sm:$0xff] (%p1071_p1), %v6390_v19  ;;  %8329 = vst [vmem:[#allocation13_spill] sm:$0xff] (%p1071_p1), %v6395_v20  ;;  %v1284_v23 = vld [vmem:[%s7991_s9 + $0x30] sm:$0xff] (%p1071_p1)  ;;  %4310 = vmatprep.subr.bf16.mxu1 (%p1071_p1), %v4793_v4  ;;  %v8340_v59 = vld [vmem:[#allocation99_spill] sm:$0xff] (%p1071_p1) }
 0x376   : > { %v4438_v22 = vpop.eup %4437 }
 0x377   : > { %v4440_v25 = vpop.eup %4439  ;;  %v1247_v26 = vmul.f32 %v4438_v22, %v4436_v21  ;;  %v4280_v22 = vpack.c.bf16 (%p1071_p1), %v1283_v18, %v1282_v16  ;;  %v1621_v16 = vrot.slane (%p1071_p1), %v1585_v61, %v6000_v1  ;;  %v8009_v18 = vsub.s32 (%p1071_p1), 4, %v8340_v59 }
 0x378   : > { %v1246_v27 = vmul.f32 %v4770_v15, %v4440_v25  ;;  %v4442_v29 = vpop.eup %4441  ;;  %v4311_v25 = vpack.c.bf16 (%p1071_p1), %v6395_v20, %v6390_v19 }
 0x37a   : > { %v1248_v28 = vadd.f32 %v1247_v26, %v1246_v27  ;;  %v1285_v26 = vld [vmem:[%s7991_s9 + $0x38] sm:$0xff] (%p1071_p1)  ;;  %v6409_v27 = vld [vmem:[%s7994_s12 + $0x30] sm:$0xff] (%p1071_p1)  ;;  %4312 = vmatpush3.bf16.msra.mxu1 (%p1071_p1), %v4311_v25 }
 0x37b   :  { %8330 = vst [vmem:[#allocation14_spill] sm:$0xff] (%p1071_p1), %v6409_v27  ;;  %4313 = vmatprep.subr.bf16.mxu1 (%p1071_p1), %v4793_v4 }
 0x37c   : > { %4443 = vtanh.f32 %v1248_v28  ;;  %v1259_v15 = vsel %vm1257_vm3, %v1248_v28, %v4770_v15   ;;  %v6414_v28 = vld [vmem:[%s7994_s12 + $0x38] sm:$0xff] (%p1071_p1) }
 0x37d   :  { %v1305_v15 = vld [vmem:[%s7992_s10 + $0x18] sm:$0xff] (%p1071_p1)  ;;  %8331 = vst [vmem:[#allocation15_spill] sm:$0xff] (%p1071_p1), %v6414_v28 }
 0x386   : > { %v4444_v30 = vpop.eup %4443  ;;  %1073 = sbr.rel (!%p1071_p1) target bundleno = 611 (0x263), region = 109 }
 0x387   : > { %v1250_v31 = vmul.f32 %v4444_v30, %v4442_v29  ;;  %v4284_v30 = vpack.c.bf16 (%p1071_p1), %v1285_v26, %v1284_v23  ;;  %v8012_v26 = vsub.s32 (%p1071_p1), 7, %v8340_v59 }
 0x389   : > { %v1258_v56 = vsel %vm1257_vm3, %v1250_v31, %v4774_v56   ;;  %v1286_v31 = vld [vmem:[%s7991_s9 + $0x40] sm:$0xff] (%p1071_p1)  ;;  %vm1768_vm3 = vcmask (%p1071_p1), 1047559  }
 0x38a   : > { %v1266_v33 = vmul.f32 %v1264_v32, %v1258_v56  ;;  %v1304_v56 = vld [vmem:[%s7992_s10 + $0x10] sm:$0xff] (%p1071_p1)  ;;  %v4288_v38 = vpack.c.bf16 (%p1071_p1), %v1287_v34, %v1286_v31 }
 0x38b   :  { %v4244_v39 = vpack.c.bf16 (%p1071_p1), %v1305_v15, %v1304_v56  ;;  %v1288_v56 = vld [vmem:[%s7991_s9 + $0x50] sm:$0xff] (%p1071_p1)  ;;  %v1270_v15 = vld [vmem:[#allocation4] sm:$0xff] (%p1071_p1) }
 0x38c   : > { %1269 = vst [vmem:[%s1268_s3] sm:$0xff] %v1266_v33  ;;  %v4314_v33 = vpack.c.bf16 (%p1071_p1), %v6414_v28, %v6409_v27 }
 0x38d   :  { %4245 = vmatprep.subr.bf16.mxu0 %v4244_v39 }
 0x38e   :  { %4247 = vmatpush3.bf16.msra.mxu0 %v4244_v39  ;;  %4315 = vmatpush3.bf16.msra.mxu1 %v4314_v33  ;;  %v4317_v39 = vpack.c.bf16 %v6433_v36, %v6428_v35 }
 0x38f   :  { %4249 = vmatprep.subr.bf16.mxu0 %v4248_v42  ;;  %4316 = vmatprep.subr.bf16.mxu1 %v4793_v4 }
 0x392   :  { %4251 = vmatpush3.bf16.msra.mxu0 %v4248_v42  ;;  %v6452_v42 = vld [vmem:[%s7994_s12 + $0x58] sm:$0xff]  ;;  %4318 = vmatpush3.bf16.msra.mxu1 %v4317_v39 }
 0x393   :  { %v1294_v43 = vld [vmem:[#allocation5] sm:$0xff]  ;;  %4253 = vmatprep.subr.bf16.mxu0 %v4252_v47  ;;  %v1295_v9 = vld [vmem:[#allocation5 + $0x8] sm:$0xff]  ;;  %v1296_v58 = vld [vmem:[#allocation5 + $0x10] sm:$0xff]  ;;  %8335 = vst [vmem:[#allocation19_spill] sm:$0xff] %v6452_v42  ;;  %v4320_v45 = vpack.c.bf16 %v6452_v42, %v6447_v41  ;;  %4319 = vmatprep.subr.bf16.mxu1 %v4793_v4 }
 0x394   :  { %3875 = vmatprep.mubr.f32.mxu0 %v1294_v43  ;;  %v1297_v21 = vld [vmem:[#allocation5 + $0x18] sm:$0xff]  ;;  %v1298_v24 = vld [vmem:[#allocation5 + $0x20] sm:$0xff]  ;;  %v1299_v29 = vld [vmem:[#allocation5 + $0x28] sm:$0xff]  ;;  %v4292_v43 = vpack.c.bf16 %v1289_v40, %v1288_v56 }
 0x395   :  { %v1300_v32 = vld [vmem:[#allocation5 + $0x30] sm:$0xff]  ;;  %v1301_v37 = vld [vmem:[#allocation5 + $0x38] sm:$0xff] }
 0x396   :  { %4255 = vmatpush3.bf16.msra.mxu0 %v4252_v47  ;;  %v1291_v47 = vld [vmem:[%s7991_s9 + $0x68] sm:$0xff]  ;;  %4321 = vmatpush3.bf16.msra.mxu1 %v4320_v45 }
 0x397   :  { %4257 = vmatprep.subr.bf16.mxu0 %v4256_v50  ;;  %4322 = vmatprep.subr.bf16.mxu1 %v4793_v4 }
 0x39a   :  { %4259 = vmatpush3.bf16.msra.mxu0 %v4256_v50  ;;  %v4296_v50 = vpack.c.bf16 %v1291_v47, %v1290_v44  ;;  %4324 = vmatpush3.bf16.msra.mxu1 %v4323_v53 }
 0x39b   :  { %4261 = vmatprep.subr.bf16.mxu0 %v4260_v55  ;;  %4325 = vmatprep.subr.bf16.mxu1 %v4793_v4  ;;  %v8339_v4 = vmov 0.0  }
 0x39c   :  { %3963 = vmatprep.mubr.msk.f32.mxu1 %vm4794_vm4, %v8339_v4 }
 0x39e   :  { %4263 = vmatpush3.bf16.msra.mxu0 %v4260_v55  ;;  %v1293_v55 = vld [vmem:[%s7991_s9 + $0x78] sm:$0xff]  ;;  %4327 = vmatpush3.bf16.msra.mxu1 %v4326_v62 }
 0x39f   :  { %4265 = vmatprep.subr.bf16.mxu0 %v4264_v17 }
 0x3a2   :  { %4267 = vmatpush3.bf16.msra.mxu0 %v4264_v17  ;;  %v4300_v17 = vpack.c.bf16 %v1293_v55, %v1292_v51 }
 0x3a3   :  { %4269 = vmatprep.subr.bf16.mxu0 %v4268_v54 }
 0x3a6   :  { %4271 = vmatpush3.bf16.msra.mxu0 %v4268_v54  ;;  %v1272_v54 = vld [vmem:[#allocation4 + $0x10] sm:$0xff] }
 0x3a7   :  { %4273 = vmatprep.subr.bf16.mxu0 %v4272_v7 }
 0x3a9   :  { %3876 = vmatmul.mubr.f32.vlgmr.msra.gmra.mrb[0].mxu0 %v1295_v9  ;;  %v1614_v9 = vrot.slane %v1585_v61, %v6003_v12 }
 0x3aa   :  { %4275 = vmatpush3.bf16.msra.mxu0 %v4272_v7  ;;  %3878 = vmatprep.mubr.f32.mxu0 %v1296_v58  ;;  %v1275_v7 = vld [vmem:[#allocation4 + $0x28] sm:$0xff]  ;;  %v1628_v58 = vrot.slane %v1585_v61, %v6006_v14 }
 0x3ab   :  { %4277 = vmatprep.subr.bf16.mxu0 %v4276_v0  ;;  %1616 = vbcast.lane.b32.xlu1 %v1614_v9, 256 }
 0x3ad   :  { %3879 = vmatmul.mubr.f32.gmra.mrb[2].mxu0 %v1297_v21  ;;  %v1635_v21 = vrot.slane %v1585_v61, %v8009_v18 }
 0x3ae   :  { %4279 = vmatpush3.bf16.msra.mxu0 %v4276_v0  ;;  %3881 = vmatprep.mubr.f32.mxu0 %v1298_v24  ;;  %v1607_v0 = vrot.slane %v1585_v61, %v5994_v8  ;;  %v8011_v24 = vsub.s32 6, %v8340_v59 }
 0x3af   :  { %4281 = vmatprep.subr.bf16.mxu0 %v4280_v22  ;;  %1623 = vbcast.lane.b32.xlu1 %v1621_v16, 256 }
 0x3b0   :  { %1609 = vbcast.lane.b32.xlu0 %v1607_v0, 256  ;;  %v1649_v25 = vrot.slane %v1585_v61, %v8011_v24 }
 0x3b1   :  { %3882 = vmatmul.mubr.f32.gmra.mrb[4].mxu0 %v1299_v29  ;;  %v1656_v29 = vrot.slane %v1585_v61, %v8012_v26 }
 0x3b2   :  { %4283 = vmatpush3.bf16.msra.mxu0 %v4280_v22  ;;  %3884 = vmatprep.mubr.f32.mxu0 %v1300_v32  ;;  %v8010_v22 = vsub.s32 5, %v8340_v59 }
 0x3b3   :  { %4285 = vmatprep.subr.bf16.mxu0 %v4284_v30  ;;  %1630 = vbcast.lane.b32.xlu1 %v1628_v58, 256 }
 0x3b4   :  { %v1642_v23 = vrot.slane %v1585_v61, %v8010_v22 }
 0x3b5   :  { %3885 = vmatmul.mubr.f32.gmra.mrb[6].mxu0 %v1301_v37  ;;  %v4795_v37 = vmov 1.0  }
 0x3b6   :  { %4287 = vmatpush3.bf16.msra.mxu0 %v4284_v30  ;;  %3919 = vmatprep.mubr.f32.mxu0 %v1270_v15  ;;  %v8341_v30 = vlaneseq }
 0x3b7   :  { %4289 = vmatprep.subr.bf16.mxu0 %v4288_v38  ;;  %1637 = vbcast.lane.b32.xlu1 %v1635_v21, 256 }
 0x3b8   :  { %v6514_v31 = vand.u32 127, %v8341_v30 }
 0x3ba   :  { %4291 = vmatpush3.bf16.msra.mxu0 %v4288_v38  ;;  %v6517_v32 = vcvt.s32.f32 %v6514_v31 }
 0x3bb   :  { %4293 = vmatprep.subr.bf16.mxu0 %v4292_v43  ;;  %1644 = vbcast.lane.b32.xlu1 %v1642_v23, 256 }
 0x3be   :  { %4295 = vmatpush3.bf16.msra.mxu0 %v4292_v43  ;;  %v3751_v43 = vld [vmem:[%s7993_s11] ss:$0 sm:$0xff]  ;;  %s6607_s11 = smov 1  }
 0x3bf   :  { %4297 = vmatprep.subr.bf16.mxu0 %v4296_v50  ;;  %1651 = vbcast.lane.b32.xlu1 %v1649_v25, 256 }
 0x3c2   :  { %4299 = vmatpush3.bf16.msra.mxu0 %v4296_v50 }
 0x3c3   :  { %4301 = vmatprep.subr.bf16.mxu0 %v4300_v17  ;;  %1658 = vbcast.lane.b32.xlu1 %v1656_v29, 256 }
 0x3c6   :  { %4303 = vmatpush3.bf16.msra.mxu0 %v4300_v17 }
 0x3c9   :  { %3920 = vmatmul.mubr.f32.vlgmr.msra.gmra.mrb[0].mxu0 %v1271_v3 }
 0x3ca   :  { %3922 = vmatprep.mubr.f32.mxu0 %v1272_v54 }
 0x3cd   :  { %3923 = vmatmul.mubr.f32.gmra.mrb[2].mxu0 %v1273_v63 }
 0x3ce   :  { %3925 = vmatprep.mubr.f32.mxu0 %v1274_v10 }
 0x3d1   :  { %3926 = vmatmul.mubr.f32.gmra.mrb[4].mxu0 %v1275_v7 }
 0x3d2   :  { %3928 = vmatprep.mubr.f32.mxu0 %v1276_v13 }
 0x3d5   :  { %3929 = vmatmul.mubr.f32.gmra.mrb[6].mxu0 %v1277_v52 }
 0x41d   :  { %v1617_v33 = vpop.permute.xlu1 %1616 }
 0x41e   :  { %vm1661_vm6 = vcmp.eq.f32.partialorder %v6517_v32, %v1617_v33 }
 0x41f   :  { %v3753_v50 = vsel %vm1661_vm6, 1.0, %v8339_v4 }
 0x421   :  { %v1624_v38 = vpop.permute.xlu1 %1623 }
 0x422   :  { %v1610_v34 = vpop.permute.xlu0 %1609  ;;  %vm1662_vm7 = vcmp.eq.f32.partialorder %v6517_v32, %v1624_v38 }
 0x423   :  { %vm1660_vm5 = vcmp.eq.f32.partialorder %v6517_v32, %v1610_v34  ;;  %v3754_v7 = vsel %vm1662_vm7, 1.0, %v8339_v4 }
 0x424   :  { %3964 = vmatmul.mubr.msk.f32.vlgmr.msra.gmra.mrb[0].mxu1 %vm1660_vm5, %v4795_v37  ;;  %v3752_v53 = vsel %vm1660_vm5, 1.0, %v8339_v4  ;;  %vm2009_vm5 = vcmask 64512  }
 0x425   :  { %3966 = vmatprep.mubr.msk.f32.mxu1 %vm4794_vm4, %v8339_v4  ;;  %v1631_v56 = vpop.permute.xlu1 %1630 }
 0x426   :  { %vm1663_vm8 = vcmp.eq.f32.partialorder %v6517_v32, %v1631_v56 }
 0x427   :  { %v3755_v63 = vsel %vm1663_vm8, 1.0, %v8339_v4 }
 0x428   :  { %3967 = vmatmul.mubr.msk.f32.gmra.mrb[2].mxu1 %vm1661_vm6, %v4795_v37 }
 0x429   :  { %3969 = vmatprep.mubr.msk.f32.mxu1 %vm4794_vm4, %v8339_v4  ;;  %v1638_v15 = vpop.permute.xlu1 %1637 }
 0x42a   :  { %vm1664_vm9 = vcmp.eq.f32.partialorder %v6517_v32, %v1638_v15  ;;  %v4796_v15 = vmov 0  }
 0x42b   :  { %v3756_v30 = vsel %vm1664_vm9, 1.0, %v8339_v4  ;;  %4445 = vset.pattern.permute.xlu0 %v4796_v15 }
 0x42c   :  { %3970 = vmatmul.mubr.msk.f32.gmra.mrb[4].mxu1 %vm1662_vm7, %v4795_v37  ;;  %vm2014_vm7 = vcmask 56320  }
 0x42d   :  { %3972 = vmatprep.mubr.msk.f32.mxu1 %vm4794_vm4, %v8339_v4  ;;  %v1645_v39 = vpop.permute.xlu1 %1644 }
 0x42e   :  { %vm1665_vm10 = vcmp.eq.f32.partialorder %v6517_v32, %v1645_v39 }
 0x42f   :  { %v3757_v16 = vsel %vm1665_vm10, 1.0, %v8339_v4 }
 0x430   :  { %3973 = vmatmul.mubr.msk.f32.gmra.mrb[6].mxu1 %vm1663_vm8, %v4795_v37 }
 0x431   :  { %3975 = vmatprep.mubr.msk.f32.mxu1 %vm4794_vm4, %v8339_v4  ;;  %v1652_v40 = vpop.permute.xlu1 %1651 }
 0x432   :  { %vm1666_vm11 = vcmp.eq.f32.partialorder %v6517_v32, %v1652_v40 }
 0x433   :  { %v3758_v38 = vsel %vm1666_vm11, 1.0, %v8339_v4 }
 0x434   :  { %3976 = vmatmul.mubr.msk.f32.gmra.mrb[8].mxu1 %vm1664_vm9, %v4795_v37 }
 0x435   :  { %3978 = vmatprep.mubr.msk.f32.mxu1 %vm4794_vm4, %v8339_v4 }
 0x438   :  { %3979 = vmatmul.mubr.msk.f32.gmra.mrb[10].mxu1 %vm1665_vm10, %v4795_v37 }
 0x439   :  { %3981 = vmatprep.mubr.msk.f32.mxu1 %vm4794_vm4, %v8339_v4 }
 0x43c   :  { %3982 = vmatmul.mubr.msk.f32.gmra.mrb[12].mxu1 %vm1666_vm11, %v4795_v37  ;;  %v1659_v37 = vpop.permute.xlu1 %1658 }
 0x43d   :  { %vm1667_vm12 = vcmp.eq.f32.partialorder %v6517_v32, %v1659_v37 }
 0x43e   :  { %v3759_v39 = vsel %vm1667_vm12, 1.0, %v8339_v4 }
 0x49c   :  { %v3921_v44 = vpop.f32.mrb[0].mxu0 }
 0x49d   :  { %v1536_v45 = vadd.f32 %v3921_v44, %v3751_v43  ;;  %v1489_v47 = vpop.f32.mrb[1].mxu0 }
 0x49e   :  { %v6558_v51 = vadd.f32 %v3751_v43, %v1489_v47  }
 0x49f   :  { %1544 = vst [vmem:[#allocation6 + $0x8] sm:$0xff] %v1536_v45  ;;  %v1693_v55 = vmul.f32 %v3753_v50, %v1536_v45 }
 0x4a0   :  { %1543 = vst [vmem:[#allocation6] sm:$0xff] %v6558_v51  ;;  %v3924_v17 = vpop.f32.mrb[2].mxu0  ;;  %v1692_v62 = vmul.f32 %v3752_v53, %v6558_v51 }
 0x4a1   :  { %v1538_v3 = vadd.f32 %v3924_v17, %v3751_v43  ;;  %v1499_v54 = vpop.f32.mrb[3].mxu0  ;;  %1702 = vadd.xlane.f32.xlu0 %v1693_v55 }
 0x4a2   :  { %v1537_v10 = vadd.f32 %v3751_v43, %v1499_v54  ;;  %1700 = vadd.xlane.f32.xlu1 %v1692_v62 }
 0x4a3   :  { %1546 = vst [vmem:[#allocation6 + $0x18] sm:$0xff] %v1538_v3  ;;  %v1695_v13 = vmul.f32 %v3755_v63, %v1538_v3 }
 0x4a4   :  { %1545 = vst [vmem:[#allocation6 + $0x10] sm:$0xff] %v1537_v10  ;;  %v3927_v52 = vpop.f32.mrb[4].mxu0  ;;  %v1694_v61 = vmul.f32 %v3754_v7, %v1537_v10 }
 0x4a5   :  { %v1540_v9 = vadd.f32 %v3927_v52, %v3751_v43  ;;  %v1509_v0 = vpop.f32.mrb[5].mxu0  ;;  %1706 = vadd.xlane.f32.xlu0 %v1695_v13 }
 0x4a6   :  { %v1539_v58 = vadd.f32 %v3751_v43, %v1509_v0  ;;  %1704 = vadd.xlane.f32.xlu1 %v1694_v61 }
 0x4a7   :  { %1548 = vst [vmem:[#allocation6 + $0x28] sm:$0xff] %v1540_v9  ;;  %v1697_v21 = vmul.f32 %v3757_v16, %v1540_v9 }
 0x4a8   :  { %1547 = vst [vmem:[#allocation6 + $0x20] sm:$0xff] %v1539_v58  ;;  %v3930_v23 = vpop.f32.mrb[6].mxu0  ;;  %v1696_v34 = vmul.f32 %v3756_v30, %v1539_v58 }
 0x4a9   :  { %v1542_v25 = vadd.f32 %v3930_v23, %v3751_v43  ;;  %v1519_v29 = vpop.f32.mrb[7].mxu0  ;;  %1710 = vadd.xlane.f32.xlu0 %v1697_v21 }
 0x4aa   :  { %v1541_v33 = vadd.f32 %v3751_v43, %v1519_v29 }
 0x4ab   :  { %1550 = vst [vmem:[#allocation6 + $0x38] sm:$0xff] %v1542_v25  ;;  %v1699_v44 = vmul.f32 %v3759_v39, %v1542_v25 }
 0x4ac   :  { %1549 = vst [vmem:[#allocation6 + $0x30] sm:$0xff] %v1541_v33  ;;  %v1698_v56 = vmul.f32 %v3758_v38, %v1541_v33 }
 0x4ad   :  { %1708 = vadd.xlane.f32.xlu0 %v1696_v34 }
 0x4b1   :  { %1712 = vadd.xlane.f32.xlu0 %v1698_v56 }
 0x4b5   :  { %1714 = vadd.xlane.f32.xlu0 %v1699_v44 }
 0x4cb   :  { %1999 = vperm.xlu0 %4445, %v5348_v46  }
 0x4f7   :  { %v1869_v43 = vpop.f32.mrb[0].mxu1 }
 0x4f8   :  { %v1903_v45 = vmul.f32 %v3753_v50, %v1869_v43  ;;  %v3965_v47 = vpop.f32.mrb[1].mxu1 }
 0x4fa   :  { %1910 = vadd.xlane.f32.xlu1 %v1903_v45 }
 0x4fb   :  { %v1874_v53 = vpop.f32.mrb[2].mxu1 }
 0x4fc   :  { %v1904_v55 = vmul.f32 %v3754_v7, %v1874_v53  ;;  %v3968_v40 = vpop.f32.mrb[3].mxu1 }
 0x4fe   :  { %1912 = vadd.xlane.f32.xlu1 %v1904_v55 }
 0x4ff   :  { %v1879_v17 = vpop.f32.mrb[4].mxu1 }
 0x500   :  { %v1905_v32 = vmul.f32 %v3755_v63, %v1879_v17  ;;  %v3971_v62 = vpop.f32.mrb[5].mxu1 }
 0x502   :  { %1914 = vadd.xlane.f32.xlu1 %v1905_v32 }
 0x503   :  { %v1884_v3 = vpop.f32.mrb[6].mxu1 }
 0x504   :  { %v1906_v54 = vmul.f32 %v3756_v30, %v1884_v3  ;;  %v3974_v10 = vpop.f32.mrb[7].mxu1  ;;  %v1726_v30 = vsub.s32 %v6514_v31, %v8340_v59 }
 0x506   :  { %1916 = vadd.xlane.f32.xlu1 %v1906_v54 }
 0x507   :  { %v1889_v13 = vpop.f32.mrb[8].mxu1 }
 0x508   :  { %v1907_v52 = vmul.f32 %v3757_v16, %v1889_v13  ;;  %v3977_v61 = vpop.f32.mrb[9].mxu1 }
 0x50a   :  { %1918 = vadd.xlane.f32.xlu1 %v1907_v52 }
 0x50b   :  { %v1894_v9 = vpop.f32.mrb[10].mxu1 }
 0x50c   :  { %v1908_v50 = vmul.f32 %v3758_v38, %v1894_v9  ;;  %v3980_v0 = vpop.f32.mrb[11].mxu1 }
 0x50e   :  { %1920 = vadd.xlane.f32.xlu1 %v1908_v50 }
 0x50f   :  { %v1899_v58 = vpop.f32.mrb[12].mxu1 }
 0x510   :  { %v1909_v7 = vmul.f32 %v3759_v39, %v1899_v58  ;;  %v3983_v21 = vpop.f32.mrb[13].mxu1 }
 0x512   :  { %1922 = vadd.xlane.f32.xlu1 %v1909_v7 }
 0x52e   :  { %v1703_v23 = vpop.xlane.xlu0 %1702 }
 0x52f   :  { %v1701_v29 = vpop.xlane.xlu1 %1700  ;;  %v1731_v16 = vrot.slane %v1703_v23, %v1726_v30 }
 0x530   :  { %v1727_v37 = vrot.slane %v1701_v29, %v1726_v30 }
 0x532   :  { %v1707_v63 = vpop.xlane.xlu0 %1706  ;;  %v1757_v44 = vsel %vm1756_vm13, %v1731_v16, %v1727_v37 }
 0x533   :  { %v1705_v34 = vpop.xlane.xlu1 %1704  ;;  %v1739_v43 = vrot.slane %v1707_v63, %v1726_v30 }
 0x534   :  { %v1735_v56 = vrot.slane %v1705_v34, %v1726_v30 }
 0x536   :  { %v1711_v25 = vpop.xlane.xlu0 %1710  ;;  %v1759_v39 = vsel %vm1758_vm14, %v1735_v56, %v1757_v44 }
 0x537   :  { %v1761_v47 = vsel %vm1760_vm15, %v1739_v43, %v1759_v39  ;;  %v1747_v55 = vrot.slane %v1711_v25, %v1726_v30  ;;  %v2004_v43 = vadd.s32 1, %v6514_v31 }
 0x53a   :  { %v1709_v33 = vpop.xlane.xlu0 %1708 }
 0x53b   :  { %v1743_v15 = vrot.slane %v1709_v33, %v1726_v30 }
 0x53d   :  { %v1763_v59 = vsel %vm1762_vm0, %v1743_v15, %v1761_v47 }
 0x53e   :  { %v1713_v38 = vpop.xlane.xlu0 %1712  ;;  %v1765_v17 = vsel %vm1764_vm1, %v1747_v55, %v1763_v59 }
 0x53f   :  { %v1751_v53 = vrot.slane %v1713_v38, %v1726_v30 }
 0x541   :  { %v1767_v32 = vsel %vm1766_vm2, %v1751_v53, %v1765_v17 }
 0x542   :  { %v1715_v45 = vpop.xlane.xlu0 %1714 }
 0x543   :  { %v1755_v40 = vrot.slane %v1715_v45, %v1726_v30 }
 0x545   :  { %v1769_v62 = vsel %vm1768_vm3, %v1755_v40, %v1767_v32 }
 0x546   :  { %1771 = vxpose.xlu1.b32.start.end [1/1] (short) (narrow) %v1769_v62, 8 }
 0x54a   :  { %v2000_v56 = vpop.permute.xlu0 %1999 }
 0x54b   :  { %vm2001_vm4 = vcmp.lt.s32.totalorder %v6514_v31, %v2000_v56  ;;  %vm2005_vm6 = vcmp.lt.s32.totalorder %v2004_v43, %v2000_v56 }
 0x54c   :  { %v3767_v38 = vsel %vm2001_vm4, 1.0, %v8339_v4 }
 0x587   :  { %v1911_v3 = vpop.xlane.xlu1 %1910 }
 0x588   :  { %v1934_v50 = vrot.slane %v1911_v3, %v1726_v30 }
 0x58b   :  { %v1913_v54 = vpop.xlane.xlu1 %1912 }
 0x58c   :  { %v1938_v61 = vrot.slane %v1913_v54, %v1726_v30 }
 0x58e   :  { %v1959_v21 = vsel %vm1756_vm13, %v1938_v61, %v1934_v50 }
 0x58f   :  { %v1915_v10 = vpop.xlane.xlu1 %1914 }
 0x590   :  { %v1942_v9 = vrot.slane %v1915_v10, %v1726_v30 }
 0x592   :  { %v1960_v63 = vsel %vm1758_vm14, %v1942_v9, %v1959_v21 }
 0x593   :  { %v1917_v13 = vpop.xlane.xlu1 %1916 }
 0x594   :  { %v1946_v0 = vrot.slane %v1917_v13, %v1726_v30 }
 0x596   :  { %v1961_v25 = vsel %vm1760_vm15, %v1946_v0, %v1960_v63 }
 0x597   :  { %v1919_v52 = vpop.xlane.xlu1 %1918 }
 0x598   :  { %v1950_v7 = vrot.slane %v1919_v52, %v1726_v30 }
 0x59a   :  { %v1962_v33 = vsel %vm1762_vm0, %v1950_v7, %v1961_v25 }
 0x59b   :  { %v1921_v58 = vpop.xlane.xlu1 %1920 }
 0x59c   :  { %v1954_v23 = vrot.slane %v1921_v58, %v1726_v30 }
 0x59e   :  { %v1963_v16 = vsel %vm1764_vm1, %v1954_v23, %v1962_v33 }
 0x59f   :  { %v1923_v29 = vpop.xlane.xlu1 %1922 }
 0x5a0   :  { %v1958_v34 = vrot.slane %v1923_v29, %v1726_v30  ;;  %v3768_v30 = vsel %vm2005_vm6, 1.0, %v8339_v4 }
 0x5a2   :  { %v1964_v37 = vsel %vm1766_vm2, %v1958_v34, %v1963_v16 }
 0x5a3   :  { %1966 = vxpose.xlu0.b32.start.end [1/1] (short) (narrow) %v1964_v37, 8 }
 0x5c6   :  { %v1787_v44 = vpop.trf.xlu1 }
 0x5c7   :  { %v2008_v39 = vmul.f32 %v3767_v38, %v1787_v44 }
 0x5c9   :  { %v2010_v15 = vsel %vm2009_vm5, %v2008_v39, 0.0 }
 0x5ca   :  { %2011 = vadd.xlane.f32.xlu1 %v2010_v15 }
 0x623   :  { %v1982_v45 = vpop.trf.xlu0 }
 0x624   :  { %v2013_v47 = vmul.f32 %v3768_v30, %v1982_v45 }
 0x626   :  { %v2015_v59 = vsel %vm2014_vm7, %v2013_v47, 0.0 }
 0x627   :  { %2016 = vadd.xlane.f32.xlu0 %v2015_v59 }
 0x657   :  { %v2012_v53 = vpop.xlane.xlu1 %2011 }
 0x6b4   :  { %v2017_v55 = vpop.xlane.xlu0 %2016 }
 0x6b5   :  { %v6602_v40 = vadd.f32 %v2017_v55, %v2012_v53 }
 0x6b7   :  { %8342 = vst [vmem:[#allocation23_spill] sm:$0xff] %v6602_v40 }
 0x6b8 LB: > { %v8343_v60 = vld [vmem:[#allocation22_spill] sm:$0xff]  ;;  %v8344_v36 = vld [vmem:[#allocation17_spill] sm:$0xff]  ;;  %v8345_v35 = vld [vmem:[#allocation16_spill] sm:$0xff]  ;;  %8359 = vst [vmem:[#allocation104_spill] sm:$0xff] %v4782_v51  ;;  %v4797_v25 = vmov 1966171168   ;;  %s4786_s11 = sphi %s6607_s11, %s2025_s11   ;;  %v4782_v51 = vphi %v6558_v51, %v8548_v51  }
 0x6b9   : > { %v8346_v28 = vld [vmem:[#allocation15_spill] sm:$0xff]  ;;  %v8347_v27 = vld [vmem:[#allocation14_spill] sm:$0xff]  ;;  %v8348_v20 = vld [vmem:[#allocation13_spill] sm:$0xff]  ;;  %v2697_v29 = vunpack.c.l.s4 %v4797_v25  ;;  %s3769_s18 = sshll.u32 %s4786_s11, 3 }
 0x6ba   : > { %v8349_v19 = vld [vmem:[#allocation12_spill] sm:$0xff]  ;;  %v8350_v6 = vld [vmem:[#allocation11_spill] sm:$0xff]  ;;  %v8351_v5 = vld [vmem:[#allocation10_spill] sm:$0xff]  ;;  %s2028_s19 = scalar_lea.vmem [#allocation6], %s3769_s18 }
 0x6bb   : > { %v8352_v57 = vld [vmem:[#allocation8_spill] sm:$0xff]  ;;  %v8353_v11 = vld [vmem:[#allocation9_spill] sm:$0xff]  ;;  %v8357_v42 = vld [vmem:[#allocation19_spill] sm:$0xff]  ;;  %v2698_v16 = vunpack.c.0.s8 %v2697_v29 }
 0x6bc   : > { %v8354_v8 = vld [vmem:[#allocation100_spill] sm:$0xff]  ;;  %v8355_v49 = vld [vmem:[#allocation21_spill] sm:$0xff]  ;;  %v8358_v41 = vld [vmem:[#allocation18_spill] sm:$0xff] }
 0x6bd   : > { %v8356_v48 = vld [vmem:[#allocation20_spill] sm:$0xff]  ;;  %v2033_v4 = vrot.slane %v4782_v51, %v8354_v8  ;;  %v8360_v12 = vld [vmem:[#allocation102_spill] sm:$0xff]  ;;  %v8361_v1 = vld [vmem:[#allocation101_spill] sm:$0xff] }
 0x6be   : > { %v2100_v31 = vrot.slane %v4782_v51, %v8360_v12  ;;  %v6621_v17 = vrot.slane %v4782_v51, %v8361_v1  ;;  %v8362_v14 = vld [vmem:[#allocation103_spill] sm:$0xff] }
 0x6bf   : > { %2043 = vbcast.lane.b32.xlu1 %v2033_v4, 272  ;;  %2035 = vbcast.lane.b32.xlu0 %v2033_v4, 256  ;;  %v6633_v32 = vrot.slane %v4782_v51, %v8362_v14  ;;  %v8363_v62 = vld [vmem:[#allocation99_spill] sm:$0xff] }
 0x6c0   : > { %v8364_v18 = vsub.s32 4, %v8363_v62  ;;  %v8365_v22 = vsub.s32 5, %v8363_v62  ;;  %v8366_v24 = vsub.s32 6, %v8363_v62  ;;  %v8367_v26 = vsub.s32 7, %v8363_v62  ;;  %v6717_v15 = vld [vmem:[%s2028_s19] sm:$0xff] }
 0x6c1   : > { %v6711_v38 = vsub.s32 %v2698_v16, %v8363_v62 }
 0x6c2   : > { %v6640_v3 = vrot.slane %v4782_v51, %v8364_v18  ;;  %v6647_v54 = vrot.slane %v4782_v51, %v8365_v22  ;;  %v6656_v10 = vrot.slane %v4782_v51, %v8366_v24  ;;  %v6665_v13 = vrot.slane %v4782_v51, %v8367_v26 }
 0x6c3   : > { %2047 = vbcast.lane.b32.xlu1 %v2033_v4, 280  ;;  %2039 = vbcast.lane.b32.xlu0 %v2033_v4, 264  ;;  %v2702_v43 = vrot.slane %v6717_v15, %v6711_v38 }
 0x6c5   : > { %v6726_v47 = vrot.slane %v2702_v43, %v6711_v38  ;;  %v2710_v29 = vcombine.high %v2702_v43, %v2702_v43 }
 0x6c7   : > { %2055 = vbcast.lane.b32.xlu1 %v2033_v4, 296  ;;  %2051 = vbcast.lane.b32.xlu0 %v2033_v4, 288 }
 0x6cb   : > { %2063 = vbcast.lane.b32.xlu1 %v2033_v4, 312  ;;  %2059 = vbcast.lane.b32.xlu0 %v2033_v4, 304 }
 0x6cf   : > { %2071 = vbcast.lane.b32.xlu1 %v2033_v4, 328  ;;  %2067 = vbcast.lane.b32.xlu0 %v2033_v4, 320 }
 0x6d3   : > { %2079 = vbcast.lane.b32.xlu1 %v2033_v4, 344  ;;  %2075 = vbcast.lane.b32.xlu0 %v2033_v4, 336 }
 0x6d7   : > { %2087 = vbcast.lane.b32.xlu1 %v2033_v4, 360  ;;  %2083 = vbcast.lane.b32.xlu0 %v2033_v4, 352 }
 0x6db   : > { %2095 = vbcast.lane.b32.xlu1 %v2033_v4, 376  ;;  %2091 = vbcast.lane.b32.xlu0 %v2033_v4, 368  ;;  %v6733_v4 = vrot.slane %v6726_v47, %v8354_v8 }
 0x6df   : > { %2106 = vbcast.lane.b32.xlu1 %v2100_v31, 264  ;;  %2102 = vbcast.lane.b32.xlu0 %v2100_v31, 256 }
 0x6e3   : > { %2114 = vbcast.lane.b32.xlu1 %v2100_v31, 280  ;;  %2110 = vbcast.lane.b32.xlu0 %v2100_v31, 272 }
 0x6e7   : > { %2122 = vbcast.lane.b32.xlu1 %v2100_v31, 296  ;;  %2118 = vbcast.lane.b32.xlu0 %v2100_v31, 288 }
 0x6eb   : > { %2130 = vbcast.lane.b32.xlu1 %v2100_v31, 312  ;;  %2126 = vbcast.lane.b32.xlu0 %v2100_v31, 304 }
 0x6ef   : > { %2138 = vbcast.lane.b32.xlu1 %v2100_v31, 328  ;;  %2134 = vbcast.lane.b32.xlu0 %v2100_v31, 320 }
 0x6f3   : > { %2146 = vbcast.lane.b32.xlu1 %v2100_v31, 344  ;;  %2142 = vbcast.lane.b32.xlu0 %v2100_v31, 336 }
 0x6f7   : > { %2154 = vbcast.lane.b32.xlu1 %v2100_v31, 360  ;;  %2150 = vbcast.lane.b32.xlu0 %v2100_v31, 352 }
 0x6fb   : > { %2162 = vbcast.lane.b32.xlu1 %v2100_v31, 376  ;;  %2158 = vbcast.lane.b32.xlu0 %v2100_v31, 368 }
 0x6ff   : > { %2173 = vbcast.lane.b32.xlu1 %v6621_v17, 264  ;;  %2169 = vbcast.lane.b32.xlu0 %v6621_v17, 256 }
 0x703   : > { %2181 = vbcast.lane.b32.xlu1 %v6621_v17, 280  ;;  %2177 = vbcast.lane.b32.xlu0 %v6621_v17, 272 }
 0x707   : > { %2189 = vbcast.lane.b32.xlu1 %v6621_v17, 296  ;;  %2185 = vbcast.lane.b32.xlu0 %v6621_v17, 288 }
 0x70b   : > { %2197 = vbcast.lane.b32.xlu1 %v6621_v17, 312  ;;  %2193 = vbcast.lane.b32.xlu0 %v6621_v17, 304 }
 0x70f   : > { %2240 = vbcast.lane.b32.xlu1 %v6633_v32, 264  ;;  %2236 = vbcast.lane.b32.xlu0 %v6633_v32, 256 }
 0x713   : > { %2307 = vbcast.lane.b32.xlu1 %v6640_v3, 264  ;;  %2303 = vbcast.lane.b32.xlu0 %v6640_v3, 256 }
 0x717   : > { %2370 = vbcast.lane.b32.xlu1 %v6647_v54, 256  ;;  %2244 = vbcast.lane.b32.xlu0 %v6633_v32, 272 }
 0x71b   : > { %2311 = vbcast.lane.b32.xlu1 %v6640_v3, 272  ;;  %2374 = vbcast.lane.b32.xlu0 %v6647_v54, 264 }
 0x71f   : > { %2441 = vbcast.lane.b32.xlu1 %v6656_v10, 264  ;;  %2437 = vbcast.lane.b32.xlu0 %v6656_v10, 256 }
 0x723   : > { %2378 = vbcast.lane.b32.xlu1 %v6647_v54, 272  ;;  %2248 = vbcast.lane.b32.xlu0 %v6633_v32, 280 }
 0x727   : > { %2508 = vbcast.lane.b32.xlu1 %v6665_v13, 264  ;;  %2504 = vbcast.lane.b32.xlu0 %v6665_v13, 256 }
 0x72b   : > { %2445 = vbcast.lane.b32.xlu1 %v6656_v10, 272  ;;  %2315 = vbcast.lane.b32.xlu0 %v6640_v3, 280 }
 0x72f   : > { %2382 = vbcast.lane.b32.xlu1 %v6647_v54, 280  ;;  %2252 = vbcast.lane.b32.xlu0 %v6633_v32, 288 }
 0x731   : > { %v2044_v52 = vpop.permute.xlu1 %2043  ;;  %v2036_v61 = vpop.permute.xlu0 %2035 }
 0x732   : > { %v2566_v31 = vadd.f32 %v2036_v61, %v8352_v57  ;;  %v6748_v61 = vrot.slane %v2710_v29, %v6711_v38 }
 0x733   : > { %2319 = vbcast.lane.b32.xlu1 %v6640_v3, 288  ;;  %2512 = vbcast.lane.b32.xlu0 %v6665_v13, 272 }
 0x734   : > { %v6743_v18 = vadd.f32 %v6733_v4, %v2566_v31  ;;  %v6765_v29 = vrot.slane %v6748_v61, %v8354_v8 }
 0x735   : > { %v6675_v9 = vpop.permute.xlu1 %2047  ;;  %v2040_v50 = vpop.permute.xlu0 %2039 }
 0x736   : > { %v2567_v55 = vadd.f32 %v2040_v50, %v8353_v11  ;;  %v2568_v50 = vadd.f32 %v2044_v52, %v8351_v5  ;;  %8369 = vst [vmem:[#allocation106_spill] sm:$0xff] %v6743_v18  ;;  %v2569_v52 = vadd.f32 %v6675_v9, %v8350_v6 }
 0x737   : > { %2256 = vbcast.lane.b32.xlu1 %v6633_v32, 296  ;;  %2449 = vbcast.lane.b32.xlu0 %v6656_v10, 280 }
 0x738   : > { %v6737_v16 = vadd.f32 %v6733_v4, %v2567_v55  ;;  %v6755_v55 = vadd.f32 %v6733_v4, %v2568_v50  ;;  %v6774_v50 = vadd.f32 %v6733_v4, %v2569_v52 }
 0x739   : > { %v6679_v0 = vpop.permute.xlu1 %2055  ;;  %v6681_v58 = vpop.permute.xlu0 %2051 }
 0x73a   : > { %8368 = vst [vmem:[#allocation105_spill] sm:$0xff] %v6737_v16  ;;  %v2912_v43 = vmax.f32 %v6743_v18, %v6737_v16  ;;  %8370 = vst [vmem:[#allocation107_spill] sm:$0xff] %v6755_v55  ;;  %v2570_v40 = vadd.f32 %v6681_v58, %v8349_v19  ;;  %v2571_v58 = vadd.f32 %v6679_v0, %v8348_v20 }
 0x73b   : > { %2516 = vbcast.lane.b32.xlu1 %v6665_v13, 280  ;;  %2386 = vbcast.lane.b32.xlu0 %v6647_v54, 288  ;;  %8371 = vst [vmem:[#allocation108_spill] sm:$0xff] %v6774_v50 }
 0x73c   : > { %v2913_v14 = vmax.f32 %v2912_v43, %v6755_v55  ;;  %v6797_v55 = vadd.f32 %v6733_v4, %v2570_v40  ;;  %v2740_v40 = vcombine.high %v6726_v47, %v6726_v47  ;;  %v6814_v0 = vadd.f32 %v6733_v4, %v2571_v58 }
 0x73d   : > { %v6685_v7 = vpop.permute.xlu1 %2063  ;;  %v6687_v21 = vpop.permute.xlu0 %2059 }
 0x73e   : > { %v2914_v43 = vmax.f32 %v2913_v14, %v6774_v50  ;;  %8375 = vst [vmem:[#allocation112_spill] sm:$0xff] %v6797_v55  ;;  %8377 = vst [vmem:[#allocation114_spill] sm:$0xff] %v6814_v0  ;;  %v2572_v18 = vadd.f32 %v6687_v21, %v8347_v27 }
 0x73f   : > { %2453 = vbcast.lane.b32.xlu1 %v6656_v10, 288  ;;  %2323 = vbcast.lane.b32.xlu0 %v6640_v3, 296 }
 0x740   : > { %v2915_v14 = vmax.f32 %v2914_v43, %v6797_v55  ;;  %v6831_v55 = vrot.slane %v2740_v40, %v8354_v8  ;;  %v6834_v21 = vadd.f32 %v6733_v4, %v2572_v18 }
 0x741   : > { %v6691_v23 = vpop.permute.xlu1 %2071  ;;  %v6693_v63 = vpop.permute.xlu0 %2067 }
 0x742   : > { %8379 = vst [vmem:[#allocation116_spill] sm:$0xff] %v6834_v21 }
 0x743   : > { %2390 = vbcast.lane.b32.xlu1 %v6647_v54, 296  ;;  %2260 = vbcast.lane.b32.xlu0 %v6633_v32, 304 }
 0x745   : > { %v6697_v33 = vpop.permute.xlu1 %2079  ;;  %v6699_v34 = vpop.permute.xlu0 %2075 }
 0x747   : > { %2327 = vbcast.lane.b32.xlu1 %v6640_v3, 304  ;;  %2520 = vbcast.lane.b32.xlu0 %v6665_v13, 288 }
 0x749   : > { %v6704_v37 = vpop.permute.xlu1 %2087  ;;  %v6706_v56 = vpop.permute.xlu0 %2083 }
 0x74b   : > { %2264 = vbcast.lane.b32.xlu1 %v6633_v32, 312  ;;  %2457 = vbcast.lane.b32.xlu0 %v6656_v10, 296 }
 0x74d   : > { %v6713_v44 = vpop.permute.xlu1 %2095  ;;  %v6715_v39 = vpop.permute.xlu0 %2091 }
 0x74f   : > { %2524 = vbcast.lane.b32.xlu1 %v6665_v13, 296  ;;  %2394 = vbcast.lane.b32.xlu0 %v6647_v54, 304 }
 0x751   : > { %v2107_v30 = vpop.permute.xlu1 %2106  ;;  %v2103_v45 = vpop.permute.xlu0 %2102 }
 0x752   : > { %v2583_v1 = vadd.f32 %v2107_v30, %v8353_v11  ;;  %v2582_v12 = vadd.f32 %v2103_v45, %v8352_v57 }
 0x753   : > { %2331 = vbcast.lane.b32.xlu1 %v6640_v3, 312  ;;  %2201 = vbcast.lane.b32.xlu0 %v6621_v17, 320 }
 0x754   : > { %v6783_v30 = vadd.f32 %v6765_v29, %v2583_v1  ;;  %v6786_v45 = vadd.f32 %v6765_v29, %v2582_v12 }
 0x755   : > { %v2115_v59 = vpop.permute.xlu1 %2114  ;;  %v2111_v53 = vpop.permute.xlu0 %2110 }
 0x756   : > { %v2584_v9 = vadd.f32 %v2111_v53, %v8351_v5  ;;  %8372 = vst [vmem:[#allocation109_spill] sm:$0xff] %v6783_v30  ;;  %8373 = vst [vmem:[#allocation110_spill] sm:$0xff] %v6786_v45  ;;  %v2585_v53 = vadd.f32 %v2115_v59, %v8350_v6  ;;  %v2933_v12 = vmax.f32 %v6786_v45, %v6783_v30 }
 0x757   : > { %2268 = vbcast.lane.b32.xlu1 %v6633_v32, 320  ;;  %2461 = vbcast.lane.b32.xlu0 %v6656_v10, 304 }
 0x758   : > { %v6792_v52 = vadd.f32 %v6765_v29, %v2584_v9  ;;  %v6807_v59 = vadd.f32 %v6765_v29, %v2585_v53 }
 0x759   : > { %v2123_v62 = vpop.permute.xlu1 %2122  ;;  %v2119_v25 = vpop.permute.xlu0 %2118 }
 0x75a   : > { %8374 = vst [vmem:[#allocation111_spill] sm:$0xff] %v6792_v52  ;;  %8376 = vst [vmem:[#allocation113_spill] sm:$0xff] %v6807_v59  ;;  %v2934_v9 = vmax.f32 %v2933_v12, %v6792_v52  ;;  %v2586_v50 = vadd.f32 %v2119_v25, %v8349_v19  ;;  %v2916_v12 = vmax.f32 %v2915_v14, %v6814_v0 }
 0x75b   : > { %2528 = vbcast.lane.b32.xlu1 %v6665_v13, 304  ;;  %2398 = vbcast.lane.b32.xlu0 %v6647_v54, 312  ;;  %v2587_v25 = vadd.f32 %v2123_v62, %v8348_v20  ;;  %v2573_v62 = vadd.f32 %v6685_v7, %v8346_v28 }
 0x75c   : > { %v2935_v47 = vmax.f32 %v2934_v9, %v6807_v59  ;;  %v6828_v58 = vadd.f32 %v6765_v29, %v2586_v50  ;;  %v2917_v9 = vmax.f32 %v2916_v12, %v6834_v21  ;;  %v2574_v12 = vadd.f32 %v6693_v63, %v8345_v35 }
 0x75d   : > { %v6745_v22 = vpop.permute.xlu1 %2130  ;;  %v2127_v24 = vpop.permute.xlu0 %2126  ;;  %v6844_v40 = vadd.f32 %v6765_v29, %v2587_v25 }
 0x75e   : > { %8378 = vst [vmem:[#allocation115_spill] sm:$0xff] %v6828_v58  ;;  %v2936_v18 = vmax.f32 %v2935_v47, %v6828_v58  ;;  %v2588_v0 = vadd.f32 %v2127_v24, %v8347_v27  ;;  %v2589_v21 = vadd.f32 %v6745_v22, %v8346_v28  ;;  %v2575_v22 = vadd.f32 %v6691_v23, %v8344_v36 }
 0x75f   : > { %2335 = vbcast.lane.b32.xlu1 %v6640_v3, 320  ;;  %2205 = vbcast.lane.b32.xlu0 %v6621_v17, 328 }
 0x760   : > { %v6872_v58 = vadd.f32 %v6765_v29, %v2588_v0 }
 0x761   : > { %v6759_v31 = vpop.permute.xlu1 %2138  ;;  %v6761_v26 = vpop.permute.xlu0 %2134 }
 0x763   : > { %2272 = vbcast.lane.b32.xlu1 %v6633_v32, 328  ;;  %2465 = vbcast.lane.b32.xlu0 %v6656_v10, 312 }
 0x765   : > { %v6778_v51 = vpop.permute.xlu1 %2146  ;;  %v6780_v46 = vpop.permute.xlu0 %2142 }
 0x767   : > { %2532 = vbcast.lane.b32.xlu1 %v6665_v13, 312  ;;  %2402 = vbcast.lane.b32.xlu0 %v6647_v54, 320 }
 0x769   : > { %v6799_v1 = vpop.permute.xlu1 %2154  ;;  %v6801_v16 = vpop.permute.xlu0 %2150 }
 0x76b   : > { %2339 = vbcast.lane.b32.xlu1 %v6640_v3, 328  ;;  %2209 = vbcast.lane.b32.xlu0 %v6621_v17, 336 }
 0x76d   : > { %v6820_v43 = vpop.permute.xlu1 %2162  ;;  %v6822_v53 = vpop.permute.xlu0 %2158 }
 0x76f   : > { %2276 = vbcast.lane.b32.xlu1 %v6633_v32, 336  ;;  %2469 = vbcast.lane.b32.xlu0 %v6656_v10, 320 }
 0x771   : > { %v2174_v52 = vpop.permute.xlu1 %2173  ;;  %v2170_v30 = vpop.permute.xlu0 %2169 }
 0x772   : > { %v2599_v14 = vadd.f32 %v2174_v52, %v8353_v11  ;;  %v2598_v50 = vadd.f32 %v2170_v30, %v8352_v57  ;;  %v6857_v52 = vadd.f32 %v6733_v4, %v2573_v62  ;;  %v2937_v62 = vmax.f32 %v2936_v18, %v6844_v40 }
 0x773   : > { %2536 = vbcast.lane.b32.xlu1 %v6665_v13, 320  ;;  %2406 = vbcast.lane.b32.xlu0 %v6647_v54, 328  ;;  %v6885_v18 = vadd.f32 %v6733_v4, %v2574_v12 }
 0x774   : > { %v6849_v59 = vadd.f32 %v6831_v55, %v2599_v14  ;;  %v6852_v45 = vadd.f32 %v6831_v55, %v2598_v50  ;;  %8382 = vst [vmem:[#allocation119_spill] sm:$0xff] %v6857_v52  ;;  %v2695_v14 = vcombine.high %v6717_v15, %v6717_v15  ;;  %v2918_v50 = vmax.f32 %v2917_v9, %v6857_v52 }
 0x775   : > { %v2182_v7 = vpop.permute.xlu1 %2181  ;;  %v2178_v30 = vpop.permute.xlu0 %2177  ;;  %v6897_v52 = vadd.f32 %v6765_v29, %v2589_v21  ;;  %v2938_v23 = vmax.f32 %v2937_v62, %v6872_v58  ;;  %v2576_v62 = vadd.f32 %v6699_v34, %v8358_v41  ;;  %v2591_v34 = vadd.f32 %v6759_v31, %v8344_v36 }
 0x776   : > { %8380 = vst [vmem:[#allocation117_spill] sm:$0xff] %v6849_v59  ;;  %8381 = vst [vmem:[#allocation118_spill] sm:$0xff] %v6852_v45  ;;  %v2954_v24 = vmax.f32 %v6852_v45, %v6849_v59  ;;  %v2601_v25 = vadd.f32 %v2182_v7, %v8350_v6  ;;  %v2600_v47 = vadd.f32 %v2178_v30, %v8351_v5 }
 0x777   : > { %2343 = vbcast.lane.b32.xlu1 %v6640_v3, 336  ;;  %v6893_v59 = vrot.slane %v2695_v14, %v6711_v38  ;;  %v2919_v45 = vmax.f32 %v2918_v50, %v6885_v18  ;;  %2213 = vbcast.lane.b32.xlu0 %v6621_v17, 344  ;;  %v6912_v50 = vadd.f32 %v6733_v4, %v2575_v22 }
 0x778   : > { %v6876_v63 = vadd.f32 %v6831_v55, %v2601_v25  ;;  %v6879_v7 = vadd.f32 %v6831_v55, %v2600_v47  ;;  %v2742_v47 = vcombine.high %v6748_v61, %v6748_v61  ;;  %v6945_v31 = vadd.f32 %v6733_v4, %v2576_v62 }
 0x779   : > { %v2190_v15 = vpop.permute.xlu1 %2189  ;;  %v2186_v9 = vpop.permute.xlu0 %2185  ;;  %v2920_v22 = vmax.f32 %v2919_v45, %v6912_v50 }
 0x77a   : > { %8383 = vst [vmem:[#allocation120_spill] sm:$0xff] %v6876_v63  ;;  %8384 = vst [vmem:[#allocation121_spill] sm:$0xff] %v6879_v7  ;;  %v2603_v0 = vadd.f32 %v2190_v15, %v8348_v20  ;;  %v2602_v30 = vadd.f32 %v2186_v9, %v8349_v19  ;;  %v2955_v25 = vmax.f32 %v2954_v24, %v6879_v7 }
 0x77b   : > { %v2590_v15 = vadd.f32 %v6761_v26, %v8345_v35  ;;  %2280 = vbcast.lane.b32.xlu1 %v6633_v32, 344  ;;  %2473 = vbcast.lane.b32.xlu0 %v6656_v10, 328  ;;  %8390 = vst [vmem:[#allocation127_spill] sm:$0xff] %v6945_v31 }
 0x77c   : > { %v6901_v12 = vadd.f32 %v6831_v55, %v2602_v30  ;;  %v6907_v61 = vadd.f32 %v6831_v55, %v2603_v0  ;;  %v2956_v24 = vmax.f32 %v2955_v25, %v6876_v63  ;;  %v2577_v0 = vadd.f32 %v6697_v33, %v8357_v42 }
 0x77d   : > { %v2198_v14 = vpop.permute.xlu1 %2197  ;;  %v2194_v21 = vpop.permute.xlu0 %2193  ;;  %v6922_v25 = vrot.slane %v2742_v47, %v8354_v8  ;;  %v6926_v63 = vrot.slane %v6893_v59, %v6711_v38  ;;  %v6936_v33 = vadd.f32 %v6765_v29, %v2590_v15 }
 0x77e   : > { %8385 = vst [vmem:[#allocation122_spill] sm:$0xff] %v6901_v12  ;;  %8386 = vst [vmem:[#allocation123_spill] sm:$0xff] %v6907_v61  ;;  %v2605_v9 = vadd.f32 %v2198_v14, %v8346_v28  ;;  %v2604_v26 = vadd.f32 %v2194_v21, %v8347_v27  ;;  %v2957_v30 = vmax.f32 %v2956_v24, %v6901_v12 }
 0x77f   : > { %v2939_v14 = vmax.f32 %v2938_v23, %v6897_v52  ;;  %8388 = vst [vmem:[#allocation125_spill] sm:$0xff] %v6936_v33  ;;  %2540 = vbcast.lane.b32.xlu1 %v6665_v13, 328  ;;  %v6950_v15 = vadd.f32 %v6733_v4, %v2577_v0  ;;  %2410 = vbcast.lane.b32.xlu0 %v6647_v54, 336 }
 0x780   : > { %v6933_v21 = vadd.f32 %v6831_v55, %v2604_v26  ;;  %v6940_v47 = vadd.f32 %v6831_v55, %v2605_v9  ;;  %v2958_v24 = vmax.f32 %v2957_v30, %v6907_v61  ;;  %v6957_v9 = vrot.slane %v6926_v63, %v8354_v8 }
 0x781   : > { %v2241_v45 = vpop.permute.xlu1 %2240  ;;  %v2237_v12 = vpop.permute.xlu0 %2236  ;;  %v2921_v30 = vmax.f32 %v2920_v22, %v6945_v31  ;;  %v6961_v61 = vadd.f32 %v6765_v29, %v2591_v34  ;;  %v2940_v0 = vmax.f32 %v2939_v14, %v6936_v33  ;;  %v2593_v34 = vadd.f32 %v6778_v51, %v8357_v42 }
 0x782   : > { %8387 = vst [vmem:[#allocation124_spill] sm:$0xff] %v6933_v21  ;;  %8389 = vst [vmem:[#allocation126_spill] sm:$0xff] %v6940_v47  ;;  %v2615_v23 = vadd.f32 %v2241_v45, %v8353_v11  ;;  %v2614_v26 = vadd.f32 %v2237_v12, %v8352_v57  ;;  %v6953_v7 = vmax.f32 %v2958_v24, %v6933_v21 }
 0x783   : > { %v2592_v24 = vadd.f32 %v6780_v46, %v8358_v41  ;;  %2347 = vbcast.lane.b32.xlu1 %v6640_v3, 344  ;;  %v2922_v46 = vmax.f32 %v2921_v30, %v6950_v15  ;;  %2217 = vbcast.lane.b32.xlu0 %v6621_v17, 352 }
 0x784   : > { %v6964_v62 = vadd.f32 %v6922_v25, %v2615_v23  ;;  %v6967_v12 = vadd.f32 %v6922_v25, %v2614_v26  ;;  %v2578_v23 = vadd.f32 %v6706_v56, %v8356_v48  ;;  %v2941_v56 = vmax.f32 %v2940_v0, %v6961_v61 }
 0x785   : > { %v2308_v45 = vpop.permute.xlu1 %2307  ;;  %v2304_v22 = vpop.permute.xlu0 %2303  ;;  %v6993_v33 = vadd.f32 %v6765_v29, %v2592_v24  ;;  %v2711_v0 = vcombine.high %v6893_v59, %v6893_v59  ;;  %v2580_v59 = vadd.f32 %v6715_v39, %v8343_v60 }
 0x786   : > { %8391 = vst [vmem:[#allocation128_spill] sm:$0xff] %v6964_v62  ;;  %8392 = vst [vmem:[#allocation129_spill] sm:$0xff] %v6967_v12  ;;  %v2975_v26 = vmax.f32 %v6967_v12, %v6964_v62  ;;  %v2631_v14 = vadd.f32 %v2308_v45, %v8353_v11  ;;  %v2630_v21 = vadd.f32 %v2304_v22, %v8352_v57 }
 0x787   : > { %2284 = vbcast.lane.b32.xlu1 %v6633_v32, 352  ;;  %v2579_v22 = vadd.f32 %v6704_v37, %v8355_v49  ;;  %v2942_v62 = vmax.f32 %v2941_v56, %v6993_v33  ;;  %v2594_v12 = vadd.f32 %v6801_v16, %v8356_v48  ;;  %2477 = vbcast.lane.b32.xlu0 %v6656_v10, 336 }
 0x788   : > { %v6984_v41 = vadd.f32 %v6957_v9, %v2631_v14  ;;  %v6987_v31 = vadd.f32 %v6957_v9, %v2630_v21  ;;  %v7000_v21 = vadd.f32 %v6733_v4, %v2578_v23  ;;  %v7008_v14 = vadd.f32 %v6765_v29, %v2593_v34 }
 0x789   : > { %v2371_v45 = vpop.permute.xlu1 %2370  ;;  %v2245_v30 = vpop.permute.xlu0 %2244  ;;  %v7015_v42 = vadd.f32 %v6733_v4, %v2579_v22  ;;  %v2741_v34 = vcombine.high %v6926_v63, %v6926_v63  ;;  %v2581_v16 = vadd.f32 %v6713_v44, %v6490_v2  ;;  %v2595_v22 = vadd.f32 %v6799_v1, %v8355_v49 }
 0x78a   : > { %8393 = vst [vmem:[#allocation130_spill] sm:$0xff] %v6984_v41  ;;  %8394 = vst [vmem:[#allocation131_spill] sm:$0xff] %v6987_v31  ;;  %v2996_v51 = vmax.f32 %v6987_v31, %v6984_v41  ;;  %v2923_v24 = vmax.f32 %v2922_v46, %v7000_v21  ;;  %v2739_v46 = vrot.slane %v2711_v0, %v6711_v38 }
 0x78b   : > { %2544 = vbcast.lane.b32.xlu1 %v6665_v13, 336  ;;  %v2943_v31 = vmax.f32 %v2942_v62, %v7008_v14  ;;  %v7030_v39 = vadd.f32 %v6765_v29, %v2594_v12  ;;  %v2616_v38 = vadd.f32 %v2245_v30, %v8351_v5  ;;  %v7034_v63 = vadd.f32 %v6733_v4, %v2580_v59 }
 0x78c   : > { %v2924_v56 = vmax.f32 %v2923_v24, %v7015_v42  ;;  %v2743_v41 = vcombine.high %v2739_v46, %v2739_v46  ;;  %2414 = vbcast.lane.b32.xlu0 %v6647_v54, 344  ;;  %v2596_v44 = vadd.f32 %v6822_v53, %v8343_v60  ;;  %v7041_v1 = vrot.slane %v2739_v46, %v8354_v8 }
 0x78d   : > { %v2312_v37 = vpop.permute.xlu1 %2311  ;;  %v2375_v23 = vpop.permute.xlu0 %2374  ;;  %v7044_v62 = vrot.slane %v2741_v34, %v8354_v8  ;;  %v7047_v12 = vadd.f32 %v6733_v4, %v2581_v16  ;;  %v2646_v24 = vadd.f32 %v2371_v45, %v8352_v57  ;;  %v7055_v49 = vadd.f32 %v6765_v29, %v2595_v22 }
 0x78e   : > { %v2925_v30 = vmax.f32 %v2924_v56, %v7034_v63  ;;  %v7052_v59 = vrot.slane %v2743_v41, %v8354_v8  ;;  %v2944_v53 = vmax.f32 %v2943_v31, %v7030_v39  ;;  %v2597_v46 = vadd.f32 %v6820_v43, %v6490_v2 }
 0x78f   : > { %2351 = vbcast.lane.b32.xlu1 %v6640_v3, 352  ;;  %v7061_v34 = vadd.f32 %v6922_v25, %v2616_v38  ;;  %v2632_v56 = vadd.f32 %v2312_v37, %v8351_v5  ;;  %v2647_v45 = vadd.f32 %v2375_v23, %v8353_v11  ;;  %v7069_v31 = vadd.f32 %v6765_v29, %v2596_v44 }
 0x790   : > { %2221 = vbcast.lane.b32.xlu0 %v6621_v17, 360  ;;  %v7075_v8 = vadd.f32 %v7041_v1, %v2646_v24  ;;  %v2945_v44 = vmax.f32 %v2944_v53, %v7055_v49 }
 0x791   : > { %v2442_v0 = vpop.permute.xlu1 %2441  ;;  %v2438_v48 = vpop.permute.xlu0 %2437  ;;  %8395 = vst [vmem:[#allocation132_spill] sm:$0xff] %v7061_v34  ;;  %v2976_v43 = vmax.f32 %v2975_v26, %v7061_v34  ;;  %v7078_v37 = vadd.f32 %v6957_v9, %v2632_v56  ;;  %v7081_v23 = vadd.f32 %v7041_v1, %v2647_v45 }
 0x792   : > { %v2663_v41 = vadd.f32 %v2442_v0, %v8353_v11  ;;  %v2662_v22 = vadd.f32 %v2438_v48, %v8352_v57  ;;  %8396 = vst [vmem:[#allocation133_spill] sm:$0xff] %v7075_v8 }
 0x793   : > { %2288 = vbcast.lane.b32.xlu1 %v6633_v32, 360  ;;  %8397 = vst [vmem:[#allocation134_spill] sm:$0xff] %v7078_v37  ;;  %8398 = vst [vmem:[#allocation135_spill] sm:$0xff] %v7081_v23  ;;  %v2997_v56 = vmax.f32 %v2996_v51, %v7078_v37  ;;  %v3017_v45 = vmax.f32 %v7075_v8, %v7081_v23  ;;  %v7114_v8 = vadd.f32 %v6765_v29, %v2597_v46 }
 0x794   : > { %v7084_v0 = vadd.f32 %v7044_v62, %v2663_v41  ;;  %v7088_v26 = vadd.f32 %v7044_v62, %v2662_v22  ;;  %2481 = vbcast.lane.b32.xlu0 %v6656_v10, 344 }
 0x795   : > { %v2379_v4 = vpop.permute.xlu1 %2378  ;;  %v2249_v16 = vpop.permute.xlu0 %2248 }
 0x796   : > { %v2648_v38 = vadd.f32 %v2379_v4, %v8351_v5  ;;  %8399 = vst [vmem:[#allocation136_spill] sm:$0xff] %v7084_v0  ;;  %8400 = vst [vmem:[#allocation137_spill] sm:$0xff] %v7088_v26  ;;  %v2617_v24 = vadd.f32 %v2249_v16, %v8350_v6  ;;  %v3038_v41 = vmax.f32 %v7088_v26, %v7084_v0 }
 0x797   : > { %2548 = vbcast.lane.b32.xlu1 %v6665_v13, 344 }
 0x798   : > { %v7091_v48 = vadd.f32 %v7041_v1, %v2648_v38  ;;  %v7103_v22 = vadd.f32 %v6922_v25, %v2617_v24  ;;  %v2926_v38 = vmax.f32 %v2925_v30, %v7047_v12  ;;  %2418 = vbcast.lane.b32.xlu0 %v6647_v54, 352 }
 0x799   : > { %v2509_v4 = vpop.permute.xlu1 %2508  ;;  %v2505_v34 = vpop.permute.xlu0 %2504 }
 0x79a   : > { %8401 = vst [vmem:[#allocation138_spill] sm:$0xff] %v7091_v48  ;;  %v2679_v53 = vadd.f32 %v2509_v4, %v8353_v11  ;;  %8402 = vst [vmem:[#allocation139_spill] sm:$0xff] %v7103_v22  ;;  %v2678_v16 = vadd.f32 %v2505_v34, %v8352_v57  ;;  %v7108_v51 = vmax.f32 %v3017_v45, %v7091_v48  ;;  %v8066_v57 = vmov 0  }
 0x79b   : > { %v2946_v4 = vmax.f32 %v2945_v44, %v7069_v31  ;;  %v2977_v11 = vmax.f32 %v2976_v43, %v7103_v22  ;;  %4446 = vset.pattern.permute.xlu0 %v8066_v57  ;;  %2355 = vbcast.lane.b32.xlu1 %v6640_v3, 360  ;;  %v2927_v43 = vrot.slane %v2926_v38, 4 }
 0x79c   : > { %v7111_v23 = vadd.f32 %v7052_v59, %v2679_v53  ;;  %v7119_v24 = vadd.f32 %v7052_v59, %v2678_v16  ;;  %2225 = vbcast.lane.b32.xlu0 %v6621_v17, 368 }
 0x79d   : > { %v2446_v0 = vpop.permute.xlu1 %2445  ;;  %v2316_v34 = vpop.permute.xlu0 %2315  ;;  %v2947_v53 = vmax.f32 %v2946_v4, %v7114_v8 }
 0x79e   : > { %8403 = vst [vmem:[#allocation140_spill] sm:$0xff] %v7111_v23  ;;  %8404 = vst [vmem:[#allocation141_spill] sm:$0xff] %v7119_v24  ;;  %v2664_v30 = vadd.f32 %v2446_v0, %v8351_v5  ;;  %v2633_v29 = vadd.f32 %v2316_v34, %v8350_v6  ;;  %v3059_v46 = vmax.f32 %v7119_v24, %v7111_v23 }
 0x79f   : > { %2292 = vbcast.lane.b32.xlu1 %v6633_v32, 368  ;;  %v2928_v23 = vmax.f32 %v2926_v38, %v2927_v43  ;;  %v2948_v24 = vrot.slane %v2947_v53, 4 }
 0x7a0   : > { %v7129_v44 = vadd.f32 %v7044_v62, %v2664_v30  ;;  %v7132_v45 = vadd.f32 %v6957_v9, %v2633_v29  ;;  %2485 = vbcast.lane.b32.xlu0 %v6656_v10, 352 }
 0x7a1   : > { %v2383_v16 = vpop.permute.xlu1 %2382  ;;  %v2253_v57 = vpop.permute.xlu0 %2252  ;;  %v2929_v38 = vrot.slane %v2928_v23, 2 }
 0x7a2   : > { %8405 = vst [vmem:[#allocation142_spill] sm:$0xff] %v7129_v44  ;;  %8406 = vst [vmem:[#allocation143_spill] sm:$0xff] %v7132_v45  ;;  %v3039_v0 = vmax.f32 %v3038_v41, %v7129_v44  ;;  %v2998_v34 = vmax.f32 %v2997_v56, %v7132_v45  ;;  %v2649_v26 = vadd.f32 %v2383_v16, %v8350_v6 }
 0x7a3   : > { %v2618_v30 = vadd.f32 %v2253_v57, %v8349_v19  ;;  %2552 = vbcast.lane.b32.xlu1 %v6665_v13, 352 }
 0x7a4   : > { %v7142_v29 = vadd.f32 %v7041_v1, %v2649_v26  ;;  %2422 = vbcast.lane.b32.xlu0 %v6647_v54, 360 }
 0x7a5   : > { %v7145_v4 = vadd.f32 %v6922_v25, %v2618_v30  ;;  %v2320_v48 = vpop.permute.xlu1 %2319  ;;  %v2513_v37 = vpop.permute.xlu0 %2512  ;;  %v2949_v30 = vmax.f32 %v2947_v53, %v2948_v24 }
 0x7a6   : > { %8407 = vst [vmem:[#allocation144_spill] sm:$0xff] %v7142_v29  ;;  %v3019_v56 = vmax.f32 %v7108_v51, %v7142_v29  ;;  %v2634_v41 = vadd.f32 %v2320_v48, %v8349_v19  ;;  %v2680_v57 = vadd.f32 %v2513_v37, %v8351_v5 }
 0x7a7   : > { %8408 = vst [vmem:[#allocation145_spill] sm:$0xff] %v7145_v4  ;;  %v2978_v26 = vmax.f32 %v2977_v11, %v7145_v4  ;;  %2359 = vbcast.lane.b32.xlu1 %v6640_v3, 368  ;;  %v2950_v24 = vrot.slane %v2949_v30, 2  ;;  %v8461_v4 = vld [vmem:[#allocation20_spill] sm:$0xff] }
 0x7a8   : > { %v7155_v43 = vadd.f32 %v6957_v9, %v2634_v41  ;;  %v7158_v16 = vadd.f32 %v7052_v59, %v2680_v57  ;;  %v2930_v41 = vmax.f32 %v2928_v23, %v2929_v38  ;;  %2229 = vbcast.lane.b32.xlu0 %v6621_v17, 376 }
 0x7a9   : > { %v2257_v44 = vpop.permute.xlu1 %2256  ;;  %v2450_v45 = vpop.permute.xlu0 %2449 }
 0x7aa   : > { %8409 = vst [vmem:[#allocation146_spill] sm:$0xff] %v7155_v43  ;;  %8410 = vst [vmem:[#allocation147_spill] sm:$0xff] %v7158_v16  ;;  %v7162_v51 = vmax.f32 %v2998_v34, %v7155_v43  ;;  %v7165_v48 = vmax.f32 %v3059_v46, %v7158_v16  ;;  %v2619_v11 = vadd.f32 %v2257_v44, %v8348_v20  ;;  %v2931_v38 = vrot.slane %v2930_v41, 1 }
 0x7ab   : > { %v2665_v37 = vadd.f32 %v2450_v45, %v8350_v6  ;;  %2296 = vbcast.lane.b32.xlu1 %v6633_v32, 376  ;;  %v2951_v16 = vmax.f32 %v2949_v30, %v2950_v24 }
 0x7ac   : > { %v7171_v57 = vadd.f32 %v6922_v25, %v2619_v11  ;;  %2489 = vbcast.lane.b32.xlu0 %v6656_v10, 360 }
 0x7ad   : > { %v7174_v53 = vadd.f32 %v7044_v62, %v2665_v37  ;;  %v2517_v5 = vpop.permute.xlu1 %2516  ;;  %v2387_v34 = vpop.permute.xlu0 %2386  ;;  %v2952_v24 = vrot.slane %v2951_v16, 1 }
 0x7ae   : > { %8411 = vst [vmem:[#allocation148_spill] sm:$0xff] %v7171_v57  ;;  %v2979_v46 = vmax.f32 %v2978_v26, %v7171_v57  ;;  %v2681_v44 = vadd.f32 %v2517_v5, %v8350_v6  ;;  %v2650_v45 = vadd.f32 %v2387_v34, %v8349_v19  ;;  %v7197_v34 = vmax.f32 %v2930_v41, %v2931_v38 }
 0x7af   : > { %8412 = vst [vmem:[#allocation149_spill] sm:$0xff] %v7174_v53  ;;  %v3040_v23 = vmax.f32 %v3039_v0, %v7174_v53  ;;  %2556 = vbcast.lane.b32.xlu1 %v6665_v13, 360  ;;  %v7224_v53 = vmax.f32 %v2951_v16, %v2952_v24 }
 0x7b0   : > { %v7183_v11 = vadd.f32 %v7052_v59, %v2681_v44  ;;  %v7186_v37 = vadd.f32 %v7041_v1, %v2650_v45  ;;  %8415 = vst [vmem:[#allocation152_spill] sm:$0xff] %v7197_v34  ;;  %2426 = vbcast.lane.b32.xlu0 %v6647_v54, 368 }
 0x7b1   : > { %v2454_v29 = vpop.permute.xlu1 %2453  ;;  %v2324_v17 = vpop.permute.xlu0 %2323 }
 0x7b2   : > { %8413 = vst [vmem:[#allocation150_spill] sm:$0xff] %v7183_v11  ;;  %8414 = vst [vmem:[#allocation151_spill] sm:$0xff] %v7186_v37  ;;  %v3061_v32 = vmax.f32 %v7165_v48, %v7183_v11  ;;  %v7192_v5 = vmax.f32 %v3019_v56, %v7186_v37  ;;  %v2666_v0 = vadd.f32 %v2454_v29, %v8349_v19  ;;  %v8424_v11 = vld [vmem:[#allocation110_spill] sm:$0xff] }
 0x7b3   : > { %v2635_v26 = vadd.f32 %v2324_v17, %v8348_v20  ;;  %2493 = vbcast.lane.b32.xlu1 %v6656_v10, 368  ;;  %v8418_v17 = vld [vmem:[#allocation106_spill] sm:$0xff] }
 0x7b4   : > { %v7200_v30 = vadd.f32 %v7044_v62, %v2666_v0  ;;  %v3080_v0 = vsub.f32 %v8418_v17, %v7197_v34  ;;  %2363 = vbcast.lane.b32.xlu0 %v6640_v3, 376  ;;  %v3096_v3 = vsub.f32 %v8424_v11, %v7224_v53 }
 0x7b5   : > { %v7203_v44 = vadd.f32 %v6957_v9, %v2635_v26  ;;  %v2391_v45 = vpop.permute.xlu1 %2390  ;;  %v2261_v48 = vpop.permute.xlu0 %2260 }
 0x7b6   : > { %8416 = vst [vmem:[#allocation153_spill] sm:$0xff] %v7200_v30  ;;  %v7207_v56 = vmax.f32 %v3040_v23, %v7200_v30  ;;  %v2651_v29 = vadd.f32 %v2391_v45, %v8348_v20  ;;  %v2620_v41 = vadd.f32 %v2261_v48, %v8347_v27  ;;  %v8421_v23 = vld [vmem:[#allocation105_spill] sm:$0xff] }
 0x7b7   : > { %8417 = vst [vmem:[#allocation154_spill] sm:$0xff] %v7203_v44  ;;  %v3000_v38 = vmax.f32 %v7162_v51, %v7203_v44  ;;  %v3081_v30 = vsub.f32 %v8421_v23, %v7197_v34  ;;  %8422 = vst [vmem:[#allocation105_spill] sm:$0xff] %v7224_v53  ;;  %2560 = vbcast.lane.b32.xlu1 %v6665_v13, 368  ;;  %v3208_v23 = vmul.f32 1.442695, %v3080_v0 }
 0x7b8   : > { %v7217_v26 = vadd.f32 %v7041_v1, %v2651_v29  ;;  %v7220_v6 = vadd.f32 %v6922_v25, %v2620_v41  ;;  %2430 = vbcast.lane.b32.xlu0 %v6647_v54, 376 }
 0x7b9   : > { %v2328_v45 = vpop.permute.xlu1 %2327  ;;  %v2521_v48 = vpop.permute.xlu0 %2520  ;;  %v3210_v24 = vmul.f32 1.442695, %v3081_v30  ;;  %4448 = vpow2.f32 %v3208_v23 }
 0x7ba   : > { %8419 = vst [vmem:[#allocation106_spill] sm:$0xff] %v7217_v26  ;;  %8420 = vst [vmem:[#allocation155_spill] sm:$0xff] %v7220_v6  ;;  %v3021_v51 = vmax.f32 %v7192_v5, %v7217_v26  ;;  %v7230_v17 = vmax.f32 %v2979_v46, %v7220_v6  ;;  %v2636_v29 = vadd.f32 %v2328_v45, %v8347_v27  ;;  %v3656_v26 = vstv %s4786_s11  ;;  %v8459_v6 = vld [vmem:[#allocation19_spill] sm:$0xff]  ;;  %s2025_s11 = sadd.s32 1, %s4786_s11  }
 0x7bb   : > { %v2682_v41 = vadd.f32 %v2521_v48, %v8349_v19  ;;  %2564 = vbcast.lane.b32.xlu1 %v6665_v13, 376  ;;  %v8426_v48 = vld [vmem:[#allocation107_spill] sm:$0xff]  ;;  %4450 = vpow2.f32 %v3210_v24  ;;  %p2022_p2 = scmp.ge.s32.totalorder %s2025_s11, 8  }
 0x7bc   : > { %v7236_v16 = vadd.f32 %v6957_v9, %v2636_v29  ;;  %v3082_v11 = vsub.f32 %v8426_v48, %v7197_v34  ;;  %v8427_v29 = vld [vmem:[#allocation109_spill] sm:$0xff]  ;;  %v8430_v13 = vld [vmem:[#allocation7_spill] sm:$0xff]  ;;  %2497 = vbcast.lane.b32.xlu0 %v6656_v10, 376  ;;  %vm3691_vm10 = vcmask (%p2022_p2), 7168  }
 0x7bd   : > { %v7241_v37 = vadd.f32 %v7052_v59, %v2682_v41  ;;  %v2265_v5 = vpop.permute.xlu1 %2264  ;;  %v2458_v46 = vpop.permute.xlu0 %2457  ;;  %v3097_v41 = vsub.f32 %v8427_v29, %v7224_v53  ;;  %vm3657_vm8 = vcmp.gt.s32.totalorder %v8430_v13, %v3656_v26  ;;  %v8431_v29 = vmov 0   ;;  %v8432_v26 = vld [vmem:[#allocation108_spill] sm:$0xff] }
 0x7be   : > { %8423 = vst [vmem:[#allocation156_spill] sm:$0xff] %v7236_v16  ;;  %v7246_v45 = vmax.f32 %v3000_v38, %v7236_v16  ;;  %v2621_v0 = vadd.f32 %v2265_v5, %v8346_v28  ;;  %v2667_v30 = vadd.f32 %v2458_v46, %v8348_v20  ;;  %v3240_v5 = vmul.f32 1.442695, %v3096_v3 }
 0x7bf   : > { %8425 = vst [vmem:[#allocation110_spill] sm:$0xff] %v7241_v37  ;;  %v7256_v19 = vmax.f32 %v3061_v32, %v7241_v37  ;;  %v3658_v37 = vsel %vm3657_vm8, 1, %v8431_v29  ;;  %v3083_v24 = vsub.f32 %v8432_v26, %v7197_v34  ;;  %v3212_v3 = vmul.f32 1.442695, %v3082_v11 }
 0x7c0   : > { %v7259_v54 = vadd.f32 %v6922_v25, %v2621_v0  ;;  %v7262_v38 = vadd.f32 %v7044_v62, %v2667_v30  ;;  %v3242_v30 = vmul.f32 1.442695, %v3097_v41  ;;  %4452 = vpow2.f32 %v3240_v5  ;;  %3660 = vperm.xlu0 %4446, %v3658_v37  }
 0x7c1   : > { %v2525_v46 = vpop.permute.xlu1 %2524  ;;  %v2395_v16 = vpop.permute.xlu0 %2394  ;;  %v3214_v26 = vmul.f32 1.442695, %v3083_v24 }
 0x7c2   : > { %8428 = vst [vmem:[#allocation107_spill] sm:$0xff] %v7259_v54  ;;  %8429 = vst [vmem:[#allocation109_spill] sm:$0xff] %v7262_v38  ;;  %v2981_v48 = vmax.f32 %v7230_v17, %v7259_v54  ;;  %v3042_v32 = vmax.f32 %v7207_v56, %v7262_v38  ;;  %v2683_v23 = vadd.f32 %v2525_v46, %v8348_v20  ;;  %v8435_v17 = vld [vmem:[#allocation111_spill] sm:$0xff]  ;;  %4454 = vpow2.f32 %v3242_v30 }
 0x7c3   : > { %v2652_v0 = vadd.f32 %v2395_v16, %v8347_v27  ;;  %v3098_v56 = vsub.f32 %v8435_v17, %v7224_v53  ;;  %4456 = vpow2.f32 %v3212_v3  ;;  %v8440_v30 = vmax.f32 %v6953_v7, %v6940_v47  ;;  %v8444_v7 = vld [vmem:[#allocation115_spill] sm:$0xff] }
 0x7c4   : > { %v7276_v13 = vadd.f32 %v7052_v59, %v2683_v23  ;;  %4458 = vpow2.f32 %v3214_v26 }
 0x7c5   : > { %v7279_v10 = vadd.f32 %v7041_v1, %v2652_v0  ;;  %v2332_v46 = vpop.permute.xlu1 %2331  ;;  %v2202_v20 = vpop.permute.xlu0 %2201  ;;  %v8436_v0 = vld [vmem:[#allocation112_spill] sm:$0xff]  ;;  %v3244_v38 = vmul.f32 1.442695, %v3098_v56 }
 0x7c6   : > { %8433 = vst [vmem:[#allocation108_spill] sm:$0xff] %v7276_v13  ;;  %v3063_v16 = vmax.f32 %v7256_v19, %v7276_v13  ;;  %v2637_v11 = vadd.f32 %v2332_v46, %v8346_v28  ;;  %v2606_v23 = vadd.f32 %v2202_v20, %v8345_v35  ;;  %v3084_v29 = vsub.f32 %v8436_v0, %v7197_v34  ;;  %v8439_v19 = vld [vmem:[#allocation113_spill] sm:$0xff]  ;;  %v4449_v20 = vpop.eup %4448  ;;  %v8441_v0 = vld [vmem:[#allocation114_spill] sm:$0xff] }
 0x7c7   : > { %8434 = vst [vmem:[#allocation157_spill] sm:$0xff] %v7279_v10  ;;  %v7286_v41 = vmax.f32 %v3021_v51, %v7279_v10  ;;  %v3099_v51 = vsub.f32 %v8439_v19, %v7224_v53  ;;  %v3085_v56 = vsub.f32 %v8441_v0, %v7197_v34  ;;  %4460 = vpow2.f32 %v3244_v38 }
 0x7c8   : > { %v7293_v5 = vadd.f32 %v6957_v9, %v2637_v11  ;;  %v7296_v17 = vadd.f32 %v6831_v55, %v2606_v23  ;;  %v4451_v23 = vpop.eup %4450  ;;  %v3216_v19 = vmul.f32 1.442695, %v3084_v29 }
 0x7c9   : > { %v2269_v46 = vpop.permute.xlu1 %2268  ;;  %v2462_v13 = vpop.permute.xlu0 %2461  ;;  %v3464_v54 = vadd.f32 %v4451_v23, %v4449_v20  ;;  %v3218_v38 = vmul.f32 1.442695, %v3085_v56  ;;  %v3102_v20 = vsub.f32 %v6872_v58, %v7224_v53 }
 0x7ca   : > { %8437 = vst [vmem:[#allocation111_spill] sm:$0xff] %v7293_v5  ;;  %8438 = vst [vmem:[#allocation112_spill] sm:$0xff] %v7296_v17  ;;  %v3002_v37 = vmax.f32 %v7246_v45, %v7293_v5  ;;  %v7306_v24 = vmax.f32 %v8440_v30, %v7296_v17  ;;  %v2622_v3 = vadd.f32 %v2269_v46, %v8345_v35  ;;  %v3246_v5 = vmul.f32 1.442695, %v3099_v51 }
 0x7cb   : > { %v2668_v11 = vadd.f32 %v2462_v13, %v8347_v27  ;;  %v3100_v30 = vsub.f32 %v8444_v7, %v7224_v53  ;;  %4462 = vpow2.f32 %v3216_v19  ;;  %v8448_v19 = vld [vmem:[#allocation119_spill] sm:$0xff] }
 0x7cc   : > { %v7313_v10 = vadd.f32 %v6922_v25, %v2622_v3  ;;  %v4453_v3 = vpop.eup %4452  ;;  %4464 = vpow2.f32 %v3246_v5 }
 0x7cd   : > { %v7316_v45 = vadd.f32 %v7044_v62, %v2668_v11  ;;  %v2529_v46 = vpop.permute.xlu1 %2528  ;;  %v2399_v44 = vpop.permute.xlu0 %2398  ;;  %v8445_v11 = vld [vmem:[#allocation116_spill] sm:$0xff]  ;;  %4466 = vpow2.f32 %v3218_v38  ;;  %v3088_v38 = vsub.f32 %v6885_v18, %v7197_v34 }
 0x7ce   : > { %8442 = vst [vmem:[#allocation113_spill] sm:$0xff] %v7313_v10  ;;  %v7321_v13 = vmax.f32 %v2981_v48, %v7313_v10  ;;  %v2684_v29 = vadd.f32 %v2529_v46, %v8347_v27  ;;  %v2653_v26 = vadd.f32 %v2399_v44, %v8346_v28  ;;  %v3086_v43 = vsub.f32 %v8445_v11, %v7197_v34  ;;  %v4455_v7 = vpop.eup %4454 }
 0x7cf   : > { %8443 = vst [vmem:[#allocation114_spill] sm:$0xff] %v7316_v45  ;;  %v7324_v0 = vmax.f32 %v3042_v32, %v7316_v45  ;;  %v3101_v32 = vsub.f32 %v6844_v40, %v7224_v53  ;;  %v3248_v46 = vmul.f32 1.442695, %v3100_v30  ;;  %v4457_v45 = vpop.eup %4456  ;;  %v3485_v5 = vadd.f32 %v4455_v7, %v4453_v3 }
 0x7d0   : > { %v7331_v51 = vadd.f32 %v7052_v59, %v2684_v29  ;;  %v7334_v48 = vadd.f32 %v7041_v1, %v2653_v26  ;;  %v3087_v29 = vsub.f32 %v8448_v19, %v7197_v34  ;;  %v3220_v26 = vmul.f32 1.442695, %v3086_v43  ;;  %v4459_v10 = vpop.eup %4458  ;;  %v8453_v43 = vld [vmem:[#allocation127_spill] sm:$0xff] }
 0x7d1   : > { %v2336_v44 = vpop.permute.xlu1 %2335  ;;  %v2206_v27 = vpop.permute.xlu0 %2205  ;;  %v3465_v40 = vadd.f32 %v4457_v45, %v3464_v54  ;;  %4468 = vpow2.f32 %v3248_v46 }
 0x7d2   : > { %8446 = vst [vmem:[#allocation115_spill] sm:$0xff] %v7331_v51  ;;  %8447 = vst [vmem:[#allocation116_spill] sm:$0xff] %v7334_v48  ;;  %v7339_v11 = vmax.f32 %v3063_v16, %v7331_v51  ;;  %v2638_v23 = vadd.f32 %v2336_v44, %v8345_v35  ;;  %v2607_v56 = vadd.f32 %v2206_v27, %v8344_v36  ;;  %v3250_v44 = vmul.f32 1.442695, %v3101_v32  ;;  %v4461_v3 = vpop.eup %4460 }
 0x7d3   : > { %v3222_v58 = vmul.f32 1.442695, %v3087_v29  ;;  %v3466_v7 = vadd.f32 %v4459_v10, %v3465_v40  ;;  %4470 = vpow2.f32 %v3220_v26  ;;  %v3486_v32 = vadd.f32 %v4461_v3, %v3485_v5 }
 0x7d4   : > { %v7348_v30 = vadd.f32 %v6957_v9, %v2638_v23  ;;  %v7351_v16 = vadd.f32 %v6831_v55, %v2607_v56  ;;  %v3103_v23 = vsub.f32 %v6897_v52, %v7224_v53  ;;  %4472 = vpow2.f32 %v3250_v44  ;;  %v8452_v44 = vld [vmem:[#allocation125_spill] sm:$0xff] }
 0x7d5   : > { %v2273_v51 = vpop.permute.xlu1 %2272  ;;  %v2466_v27 = vpop.permute.xlu0 %2465  ;;  %v3089_v40 = vsub.f32 %v6912_v50, %v7197_v34  ;;  %4474 = vpow2.f32 %v3222_v58  ;;  %v3090_v50 = vsub.f32 %v8453_v43, %v7197_v34 }
 0x7d6   : > { %8449 = vst [vmem:[#allocation119_spill] sm:$0xff] %v7348_v30  ;;  %8450 = vst [vmem:[#allocation158_spill] sm:$0xff] %v7351_v16  ;;  %v7356_v19 = vmax.f32 %v3002_v37, %v7348_v30  ;;  %v2623_v54 = vadd.f32 %v2273_v51, %v8344_v36  ;;  %v2669_v45 = vadd.f32 %v2466_v27, %v8346_v28  ;;  %v3252_v51 = vmul.f32 1.442695, %v3102_v20  ;;  %v4463_v27 = vpop.eup %4462 }
 0x7d7   : > { %v4465_v26 = vpop.eup %4464  ;;  %v3467_v5 = vadd.f32 %v4463_v27, %v3466_v7  ;;  %v3254_v3 = vmul.f32 1.442695, %v3103_v23  ;;  %v3226_v7 = vmul.f32 1.442695, %v3089_v40  ;;  %v3105_v23 = vsub.f32 %v6961_v61, %v7224_v53 }
 0x7d8   : > { %v7365_v46 = vadd.f32 %v6922_v25, %v2623_v54  ;;  %v7368_v37 = vadd.f32 %v7044_v62, %v2669_v45  ;;  %v3224_v54 = vmul.f32 1.442695, %v3088_v38  ;;  %v3487_v52 = vadd.f32 %v4465_v26, %v3486_v32  ;;  %v4467_v18 = vpop.eup %4466 }
 0x7d9   : > { %v2533_v56 = vpop.permute.xlu1 %2532  ;;  %v3104_v45 = vsub.f32 %v8452_v44, %v7224_v53  ;;  %4476 = vpow2.f32 %v3252_v51  ;;  %v3468_v58 = vadd.f32 %v4467_v18, %v3467_v5  ;;  %v2403_v38 = vpop.permute.xlu0 %2402  ;;  %v3228_v40 = vmul.f32 1.442695, %v3090_v50 }
 0x7da   : > { %8451 = vst [vmem:[#allocation159_spill] sm:$0xff] %v7368_v37  ;;  %v2685_v29 = vadd.f32 %v2533_v56, %v8346_v28  ;;  %4478 = vpow2.f32 %v3224_v54  ;;  %v3258_v50 = vmul.f32 1.442695, %v3105_v23 }
 0x7db   : > { %v4469_v10 = vpop.eup %4468  ;;  %4480 = vpow2.f32 %v3254_v3  ;;  %v3256_v51 = vmul.f32 1.442695, %v3104_v45  ;;  %v8455_v45 = vmax.f32 %v7286_v41, %v7334_v48  ;;  %v3092_v41 = vsub.f32 %v7000_v21, %v7197_v34 }
 0x7dc   : > { %v7380_v20 = vadd.f32 %v7052_v59, %v2685_v29  ;;  %v3488_v27 = vadd.f32 %v4469_v10, %v3487_v52  ;;  %v2654_v29 = vadd.f32 %v2403_v38, %v8345_v35  ;;  %v3091_v10 = vsub.f32 %v6950_v15, %v7197_v34 }
 0x7dd   : > { %v2340_v32 = vpop.permute.xlu1 %2339  ;;  %v4471_v44 = vpop.eup %4470  ;;  %4482 = vpow2.f32 %v3226_v7  ;;  %v3106_v15 = vsub.f32 %v6993_v33, %v7224_v53  ;;  %v8458_v33 = vmax.f32 %v7306_v24, %v7351_v16  ;;  %v3093_v38 = vsub.f32 %v7015_v42, %v7197_v34 }
 0x7de   : > { %v2639_v26 = vadd.f32 %v2340_v32, %v8344_v36  ;;  %v7393_v56 = vadd.f32 %v7041_v1, %v2654_v29  ;;  %v4473_v18 = vpop.eup %4472  ;;  %v3469_v5 = vadd.f32 %v4471_v44, %v3468_v58  ;;  %v2210_v54 = vpop.permute.xlu0 %2209  ;;  %v8456_v32 = vld [vmem:[#allocation18_spill] sm:$0xff]  ;;  %4484 = vpow2.f32 %v3256_v51 }
 0x7df   : > { %v3489_v61 = vadd.f32 %v4473_v18, %v3488_v27  ;;  %v2608_v29 = vadd.f32 %v2210_v54, %v8456_v32  ;;  %v4475_v7 = vpop.eup %4474  ;;  %4486 = vpow2.f32 %v3228_v40  ;;  %v3107_v51 = vsub.f32 %v7008_v14, %v7224_v53 }
 0x7e0   : > { %8454 = vst [vmem:[#allocation125_spill] sm:$0xff] %v7393_v56  ;;  %v7396_v43 = vadd.f32 %v6957_v9, %v2639_v26  ;;  %v7406_v3 = vmax.f32 %v8455_v45, %v7393_v56  ;;  %v3230_v26 = vmul.f32 1.442695, %v3091_v10  ;;  %v3470_v54 = vadd.f32 %v4475_v7, %v3469_v5 }
 0x7e1   : > { %v7400_v52 = vpop.permute.xlu1 %2276  ;;  %v7414_v58 = vadd.f32 %v6831_v55, %v2608_v29  ;;  %4488 = vpow2.f32 %v3258_v50  ;;  %v3260_v29 = vmul.f32 1.442695, %v3106_v15  ;;  %v3232_v5 = vmul.f32 1.442695, %v3092_v41 }
 0x7e2   : > { %v7418_v44 = vpop.permute.xlu0 %2469  ;;  %4490 = vpow2.f32 %v3230_v26  ;;  %v3262_v14 = vmul.f32 1.442695, %v3107_v51  ;;  %v3094_v50 = vsub.f32 %v7034_v63, %v7197_v34  ;;  %v3234_v56 = vmul.f32 1.442695, %v3093_v38 }
 0x7e3   : > { %8457 = vst [vmem:[#allocation127_spill] sm:$0xff] %v7414_v58  ;;  %v4477_v27 = vpop.eup %4476  ;;  %v7426_v23 = vmax.f32 %v8458_v33, %v7414_v58  ;;  %4492 = vpow2.f32 %v3260_v29  ;;  %v3095_v51 = vsub.f32 %v7047_v12, %v7197_v34 }
 0x7e4   : > { %v3490_v45 = vadd.f32 %v4477_v27, %v3489_v61  ;;  %v4479_v21 = vpop.eup %4478  ;;  %v3108_v27 = vsub.f32 %v7030_v39, %v7224_v53  ;;  %4494 = vpow2.f32 %v3232_v5 }
 0x7e5   : > { %v7420_v18 = vpop.permute.xlu1 %2536  ;;  %v4481_v10 = vpop.eup %4480  ;;  %v3471_v61 = vadd.f32 %v4479_v21, %v3470_v54  ;;  %v3109_v54 = vsub.f32 %v7055_v49, %v7224_v53  ;;  %4496 = vpow2.f32 %v3262_v14  ;;  %v3238_v12 = vmul.f32 1.442695, %v3095_v51 }
 0x7e6   : > { %v7432_v28 = vpop.permute.xlu0 %2406  ;;  %v3491_v24 = vadd.f32 %v4481_v10, %v3490_v45  ;;  %v3264_v45 = vmul.f32 1.442695, %v3108_v27  ;;  %4498 = vpow2.f32 %v3234_v56  ;;  %v3236_v10 = vmul.f32 1.442695, %v3094_v50 }
 0x7e7   : > { %v4483_v7 = vpop.eup %4482  ;;  %v3266_v49 = vmul.f32 1.442695, %v3109_v54  ;;  %v3111_v56 = vsub.f32 %v7114_v8, %v7224_v53 }
 0x7e8   : > { %v4485_v15 = vpop.eup %4484  ;;  %v3472_v26 = vadd.f32 %v4483_v7, %v3471_v61  ;;  %v3110_v61 = vsub.f32 %v7069_v31, %v7224_v53  ;;  %4500 = vpow2.f32 %v3264_v45 }
 0x7e9   : > { %v7434_v40 = vpop.permute.xlu1 %2343  ;;  %v3492_v41 = vadd.f32 %v4485_v15, %v3491_v24  ;;  %v4487_v39 = vpop.eup %4486  ;;  %4502 = vpow2.f32 %v3236_v10 }
 0x7ea   : > { %v7440_v33 = vpop.permute.xlu0 %2213  ;;  %v3473_v5 = vadd.f32 %v4487_v39, %v3472_v26  ;;  %4504 = vpow2.f32 %v3266_v49  ;;  %v3268_v50 = vmul.f32 1.442695, %v3110_v61 }
 0x7eb   : > { %v4489_v29 = vpop.eup %4488  ;;  %4506 = vpow2.f32 %v3238_v12 }
 0x7ec   : > { %v3493_v38 = vadd.f32 %v4489_v29, %v3492_v41  ;;  %v4491_v24 = vpop.eup %4490  ;;  %4508 = vpow2.f32 %v3268_v50  ;;  %v3270_v29 = vmul.f32 1.442695, %v3111_v56 }
 0x7ed   : > { %v7442_v42 = vpop.permute.xlu1 %2280  ;;  %v4493_v7 = vpop.eup %4492  ;;  %v3474_v15 = vadd.f32 %v4491_v24, %v3473_v5 }
 0x7ee   : > { %v7448_v21 = vpop.permute.xlu0 %2473  ;;  %v3494_v34 = vadd.f32 %v4493_v7, %v3493_v38  ;;  %v4495_v26 = vpop.eup %4494  ;;  %4510 = vpow2.f32 %v3270_v29 }
 0x7ef   : > { %v4497_v41 = vpop.eup %4496  ;;  %v3475_v54 = vadd.f32 %v4495_v26, %v3474_v15 }
 0x7f0   : > { %v3495_v39 = vadd.f32 %v4497_v41, %v3494_v34  ;;  %v4499_v48 = vpop.eup %4498 }
 0x7f1   : > { %v7450_v63 = vpop.permute.xlu1 %2540  ;;  %v3476_v51 = vadd.f32 %v4499_v48, %v3475_v54 }
 0x7f2   : > { %v7454_v27 = vpop.permute.xlu0 %2410  ;;  %v4501_v30 = vpop.eup %4500 }
 0x7f3   : > { %v3496_v5 = vadd.f32 %v4501_v30, %v3495_v39  ;;  %v4503_v8 = vpop.eup %4502 }
 0x7f4   : > { %v4505_v61 = vpop.eup %4504  ;;  %v3477_v49 = vadd.f32 %v4503_v8, %v3476_v51 }
 0x7f5   : > { %v7456_v14 = vpop.permute.xlu1 %2347  ;;  %v3497_v24 = vadd.f32 %v4505_v61, %v3496_v5  ;;  %v4507_v34 = vpop.eup %4506  ;;  %v2624_v61 = vadd.f32 %v7400_v52, %v8456_v32 }
 0x7f6   : > { %v2218_v31 = vpop.permute.xlu0 %2217  ;;  %v4509_v15 = vpop.eup %4508  ;;  %v3478_v56 = vadd.f32 %v4507_v34, %v3477_v49 }
 0x7f7   : > { %v3498_v50 = vadd.f32 %v4509_v15, %v3497_v24  ;;  %v7483_v57 = vadd.f32 %v6922_v25, %v2624_v61  ;;  %v2610_v22 = vadd.f32 %v2218_v31, %v8461_v4  ;;  %v8464_v31 = vmax.f32 %v7321_v13, %v7365_v46 }
 0x7f8   : > { %v4511_v53 = vpop.eup %4510  ;;  %v3479_v48 = vrot.slane %v3478_v56, 4 }
 0x7f9   : > { %v2285_v45 = vpop.permute.xlu1 %2284  ;;  %v3499_v30 = vadd.f32 %v4511_v53, %v3498_v50  ;;  %v2609_v53 = vadd.f32 %v7440_v33, %v8459_v6  ;;  %v2625_v50 = vadd.f32 %v7442_v42, %v8459_v6  ;;  %8460 = vst [vmem:[#allocation160_spill] sm:$0xff] %v7483_v57  ;;  %v8463_v42 = vld [vmem:[#allocation21_spill] sm:$0xff]  ;;  %v7504_v17 = vadd.f32 %v6831_v55, %v2610_v22 }
 0x7fa   : > { %v7460_v10 = vpop.permute.xlu0 %2477  ;;  %v3480_v8 = vadd.f32 %v3479_v48, %v3478_v56  ;;  %v2626_v56 = vadd.f32 %v2285_v45, %v8461_v4  ;;  %v2984_v45 = vmax.f32 %v8464_v31, %v7483_v57 }
 0x7fb   : > { %v3500_v29 = vrot.slane %v3499_v30, 4  ;;  %v7495_v33 = vadd.f32 %v6922_v25, %v2625_v50 }
 0x7fc   : > { %v3481_v34 = vrot.slane %v3480_v8, 2 }
 0x7fd   : > { %v7462_v38 = vpop.permute.xlu1 %2544  ;;  %v3501_v15 = vadd.f32 %v3500_v29, %v3499_v30  ;;  %v7492_v30 = vadd.f32 %v6831_v55, %v2609_v53  ;;  %8462 = vst [vmem:[#allocation161_spill] sm:$0xff] %v7495_v33  ;;  %v2985_v31 = vmax.f32 %v2984_v45, %v7495_v33 }
 0x7fe   : > { %v7464_v7 = vpop.permute.xlu0 %2414  ;;  %v3482_v58 = vadd.f32 %v3481_v34, %v3480_v8  ;;  %v7507_v8 = vadd.f32 %v6922_v25, %v2626_v56 }
 0x7ff   : > { %v3502_v16 = vrot.slane %v3501_v15, 2  ;;  %v2964_v13 = vmax.f32 %v7426_v23, %v7492_v30 }
 0x801   : > { %v7466_v12 = vpop.permute.xlu1 %2351  ;;  %v3503_v47 = vadd.f32 %v3502_v16, %v3501_v15  ;;  %v2965_v57 = vmax.f32 %v2964_v13, %v7504_v17  ;;  %v2986_v16 = vmax.f32 %v2985_v31, %v7507_v8 }
 0x802   : > { %v2222_v26 = vpop.permute.xlu0 %2221 }
 0x803   : > { %v2611_v29 = vadd.f32 %v2222_v26, %v8463_v42 }
 0x805   : > { %v2289_v41 = vpop.permute.xlu1 %2288  ;;  %v7519_v22 = vadd.f32 %v6831_v55, %v2611_v29  ;;  %v2655_v29 = vadd.f32 %v7432_v28, %v8344_v36 }
 0x806   : > { %v7468_v54 = vpop.permute.xlu0 %2481  ;;  %v2627_v61 = vadd.f32 %v2289_v41, %v8463_v42  ;;  %v3483_v41 = vrot.slane %v3482_v58, 1 }
 0x807   : > { %v2966_v13 = vmax.f32 %v2965_v57, %v7519_v22 }
 0x808   : > { %v7522_v56 = vadd.f32 %v6922_v25, %v2627_v61  ;;  %v2640_v61 = vadd.f32 %v7434_v40, %v8456_v32  ;;  %v3484_v33 = vadd.f32 %v3483_v41, %v3482_v58  ;;  %v2671_v40 = vadd.f32 %v7448_v21, %v8344_v36 }
 0x809   : > { %v7470_v39 = vpop.permute.xlu1 %2548 }
 0x80a   : > { %v7472_v51 = vpop.permute.xlu0 %2418  ;;  %v2987_v31 = vmax.f32 %v2986_v16, %v7522_v56  ;;  %4512 = vlog2.f32 %v3484_v33  ;;  %v2641_v33 = vadd.f32 %v7456_v14, %v8459_v6  ;;  %v2657_v14 = vadd.f32 %v7464_v7, %v8459_v6 }
 0x80c   : > { %v7609_v7 = vadd.f32 %v6957_v9, %v2641_v33 }
 0x80d   : > { %v7474_v5 = vpop.permute.xlu1 %2355 }
 0x80e   : > { %v2226_v49 = vpop.permute.xlu0 %2225 }
 0x80f   : > { %v2612_v34 = vadd.f32 %v2226_v49, %v8343_v60  ;;  %v2670_v49 = vadd.f32 %v7418_v44, %v8345_v35 }
 0x811   : > { %v2293_v24 = vpop.permute.xlu1 %2292  ;;  %v7531_v23 = vadd.f32 %v6831_v55, %v2612_v34 }
 0x812   : > { %v7487_v48 = vpop.permute.xlu0 %2485  ;;  %v2628_v53 = vadd.f32 %v2293_v24, %v8343_v60  ;;  %v2686_v24 = vadd.f32 %v7420_v18, %v8345_v35  ;;  %v3504_v18 = vrot.slane %v3503_v47, 1 }
 0x813   : > { %v2967_v58 = vmax.f32 %v2966_v13, %v7531_v23 }
 0x814   : > { %v7534_v15 = vadd.f32 %v6922_v25, %v2628_v53  ;;  %v7545_v53 = vadd.f32 %v7044_v62, %v2670_v49  ;;  %v7548_v28 = vadd.f32 %v7052_v59, %v2686_v24  ;;  %v2687_v49 = vadd.f32 %v7450_v63, %v8344_v36 }
 0x815   : > { %v7489_v52 = vpop.permute.xlu1 %2552  ;;  %v7566_v24 = vadd.f32 %v6957_v9, %v2640_v61  ;;  %v3505_v13 = vadd.f32 %v3504_v18, %v3503_v47  ;;  %v2656_v63 = vadd.f32 %v7454_v27, %v8456_v32  ;;  %v8468_v61 = vmax.f32 %v7339_v11, %v7380_v20 }
 0x816   : > { %v7511_v50 = vpop.permute.xlu0 %2422  ;;  %8465 = vst [vmem:[#allocation162_spill] sm:$0xff] %v7545_v53  ;;  %v2988_v41 = vmax.f32 %v2987_v31, %v7534_v15  ;;  %v2672_v18 = vadd.f32 %v7460_v10, %v8456_v32  ;;  %v7592_v27 = vadd.f32 %v7052_v59, %v2687_v49  ;;  %v2642_v11 = vadd.f32 %v7466_v12, %v8461_v4 }
 0x817   : > { %v3066_v47 = vmax.f32 %v8468_v61, %v7548_v28  ;;  %v8469_v10 = vmax.f32 %v7356_v19, %v7396_v43  ;;  %v7606_v49 = vadd.f32 %v7041_v1, %v2656_v63  ;;  %v2689_v12 = vadd.f32 %v7470_v39, %v8459_v6 }
 0x818   : > { %v7623_v63 = vadd.f32 %v7041_v1, %v2657_v14  ;;  %v7626_v33 = vadd.f32 %v6957_v9, %v2642_v11  ;;  %4514 = vlog2.f32 %v3505_v13 }
 0x819   : > { %v7513_v26 = vpop.permute.xlu1 %2359  ;;  %v7640_v11 = vadd.f32 %v7052_v59, %v2689_v12 }
 0x81a   : > { %v2230_v44 = vpop.permute.xlu0 %2229 }
 0x81b   : > { %v2613_v34 = vadd.f32 %v2230_v44, %v6490_v2  ;;  %v7561_v44 = vadd.f32 %v7041_v1, %v2655_v29 }
 0x81d   : > { %v2297_v45 = vpop.permute.xlu1 %2296  ;;  %v7555_v57 = vadd.f32 %v6831_v55, %v2613_v34  ;;  %v3025_v34 = vmax.f32 %v7406_v3, %v7561_v44 }
 0x81e   : > { %v2629_v35 = vadd.f32 %v2297_v45, %v6490_v2  ;;  %v2490_v29 = vpop.permute.xlu0 %2489 }
 0x81f   : > { %v2968_v21 = vmax.f32 %v2967_v58, %v7555_v57  ;;  %v3005_v58 = vmax.f32 %v8469_v10, %v7566_v24 }
 0x820   : > { %v7558_v16 = vadd.f32 %v6922_v25, %v2629_v35  ;;  %v8466_v35 = vmax.f32 %v7324_v0, %v7368_v37  ;;  %v7575_v25 = vadd.f32 %v7044_v62, %v2671_v40  ;;  %v2688_v0 = vadd.f32 %v7462_v38, %v8456_v32 }
 0x821   : > { %v2969_v31 = vrot.slane %v2968_v21, 4  ;;  %v2557_v40 = vpop.permute.xlu1 %2556  ;;  %v2673_v32 = vadd.f32 %v7468_v54, %v8459_v6  ;;  %v2658_v54 = vadd.f32 %v7472_v51, %v8461_v4  ;;  %v2643_v6 = vadd.f32 %v7474_v5, %v8463_v42 }
 0x822   : > { %v2989_v45 = vmax.f32 %v2988_v41, %v7558_v16  ;;  %v3045_v55 = vmax.f32 %v8466_v35, %v7545_v53  ;;  %8467 = vst [vmem:[#allocation163_spill] sm:$0xff] %v7575_v25  ;;  %v7614_v35 = vadd.f32 %v7044_v62, %v2672_v18  ;;  %v7617_v19 = vadd.f32 %v7052_v59, %v2688_v0  ;;  %v2427_v39 = vpop.permute.xlu0 %2426 }
 0x823   : > { %v2970_v38 = vmax.f32 %v2968_v21, %v2969_v31  ;;  %v7631_v61 = vadd.f32 %v7044_v62, %v2673_v32  ;;  %v2674_v18 = vadd.f32 %v7487_v48, %v8461_v4  ;;  %v7635_v31 = vpop.eup %4512  ;;  %v3006_v14 = vmax.f32 %v3005_v58, %v7609_v7 }
 0x824   : > { %v2990_v3 = vrot.slane %v2989_v45, 4  ;;  %v3046_v41 = vmax.f32 %v3045_v55, %v7575_v25  ;;  %8470 = vst [vmem:[#allocation164_spill] sm:$0xff] %v7614_v35  ;;  %v3067_v55 = vmax.f32 %v3066_v47, %v7592_v27  ;;  %8472 = vst [vmem:[#allocation166_spill] sm:$0xff] %v7635_v31  ;;  %v3026_v47 = vmax.f32 %v3025_v34, %v7606_v49 }
 0x825   : > { %v2971_v21 = vrot.slane %v2970_v38, 2  ;;  %8471 = vst [vmem:[#allocation165_spill] sm:$0xff] %v7631_v61  ;;  %v2494_v10 = vpop.permute.xlu1 %2493  ;;  %v7645_v36 = vadd.f32 %v7041_v1, %v2658_v54  ;;  %v7650_v34 = vadd.f32 %v6957_v9, %v2643_v6  ;;  %v2690_v58 = vadd.f32 %v7489_v52, %v8461_v4  ;;  %v8475_v52 = vld [vmem:[#allocation118_spill] sm:$0xff] }
 0x826   : > { %v2991_v0 = vmax.f32 %v2989_v45, %v2990_v3  ;;  %v3047_v5 = vmax.f32 %v3046_v41, %v7614_v35  ;;  %v3068_v32 = vmax.f32 %v3067_v55, %v7617_v19  ;;  %v3027_v45 = vmax.f32 %v3026_v47, %v7623_v63  ;;  %v2364_v47 = vpop.permute.xlu0 %2363 }
 0x827   : > { %v2972_v51 = vmax.f32 %v2970_v38, %v2971_v21  ;;  %v3007_v38 = vmax.f32 %v3006_v14, %v7626_v33  ;;  %v7656_v3 = vadd.f32 %v7044_v62, %v2674_v18  ;;  %v2659_v21 = vadd.f32 %v7511_v50, %v8463_v42 }
 0x828   : > { %v3048_v13 = vmax.f32 %v3047_v5, %v7631_v61  ;;  %v2992_v12 = vrot.slane %v2991_v0, 2  ;;  %v3069_v54 = vmax.f32 %v3068_v32, %v7640_v11  ;;  %v2644_v55 = vadd.f32 %v7513_v26, %v8343_v60  ;;  %v8477_v26 = vld [vmem:[#allocation121_spill] sm:$0xff] }
 0x829   : > { %v2973_v48 = vrot.slane %v2972_v51, 1  ;;  %8473 = vst [vmem:[#allocation167_spill] sm:$0xff] %v7656_v3  ;;  %v2675_v6 = vadd.f32 %v2490_v29, %v8463_v42  ;;  %v3028_v4 = vmax.f32 %v3027_v45, %v7645_v36  ;;  %v2691_v5 = vadd.f32 %v2557_v40, %v8463_v42  ;;  %v2561_v31 = vpop.permute.xlu1 %2560 }
 0x82a   : > { %v3008_v32 = vmax.f32 %v3007_v38, %v7650_v34  ;;  %v7674_v50 = vadd.f32 %v7052_v59, %v2690_v58  ;;  %v2660_v29 = vadd.f32 %v2427_v39, %v8343_v60  ;;  %v3049_v45 = vmax.f32 %v3048_v13, %v7656_v3  ;;  %v8478_v38 = vld [vmem:[#allocation120_spill] sm:$0xff]  ;;  %v7697_v13 = vpop.eup %4514 }
 0x82b   : > { %v7658_v41 = vmax.f32 %v2972_v51, %v2973_v48  ;;  %v8476_v51 = vld [vmem:[#allocation117_spill] sm:$0xff]  ;;  %v2993_v61 = vmax.f32 %v2991_v0, %v2992_v12  ;;  %v7683_v42 = vadd.f32 %v7041_v1, %v2659_v21  ;;  %v7686_v40 = vadd.f32 %v6957_v9, %v2644_v55  ;;  %v8481_v21 = vld [vmem:[#allocation122_spill] sm:$0xff] }
 0x82c   : > { %v7694_v0 = vadd.f32 %v7052_v59, %v2691_v5  ;;  %8480 = vst [vmem:[#allocation117_spill] sm:$0xff] %v7697_v13  ;;  %v3070_v12 = vmax.f32 %v3069_v54, %v7674_v50  ;;  %v8483_v5 = vld [vmem:[#allocation123_spill] sm:$0xff] }
 0x82d   : > { %8474 = vst [vmem:[#allocation168_spill] sm:$0xff] %v7658_v41  ;;  %v3112_v18 = vsub.f32 %v8475_v52, %v7658_v41  ;;  %v3113_v14 = vsub.f32 %v8476_v51, %v7658_v41  ;;  %v3114_v48 = vsub.f32 %v8477_v26, %v7658_v41  ;;  %v2676_v52 = vadd.f32 %v2494_v10, %v8343_v60  ;;  %v8489_v13 = vld [vmem:[#allocation127_spill] sm:$0xff] }
 0x82e   : > { %v2645_v51 = vadd.f32 %v2364_v47, %v6490_v2  ;;  %v3115_v58 = vsub.f32 %v8478_v38, %v7658_v41  ;;  %v7691_v26 = vadd.f32 %v7044_v62, %v2675_v6  ;;  %v2692_v10 = vadd.f32 %v2561_v31, %v8343_v60 }
 0x82f   : > { %v3272_v39 = vmul.f32 1.442695, %v3112_v18  ;;  %v3274_v35 = vmul.f32 1.442695, %v3113_v14  ;;  %v3116_v55 = vsub.f32 %v8481_v21, %v7658_v41  ;;  %v3276_v47 = vmul.f32 1.442695, %v3114_v48 }
 0x830   : > { %8479 = vst [vmem:[#allocation118_spill] sm:$0xff] %v7691_v26  ;;  %v7703_v38 = vadd.f32 %v7041_v1, %v2660_v29  ;;  %v2994_v6 = vrot.slane %v2993_v61, 1  ;;  %v7706_v18 = vadd.f32 %v7044_v62, %v2676_v52  ;;  %v7709_v14 = vadd.f32 %v6957_v9, %v2645_v51  ;;  %v8485_v52 = vld [vmem:[#allocation124_spill] sm:$0xff] }
 0x831   : > { %4516 = vpow2.f32 %v3272_v39  ;;  %v3029_v31 = vmax.f32 %v3028_v4, %v7683_v42  ;;  %v3117_v54 = vsub.f32 %v8483_v5, %v7658_v41  ;;  %v3278_v60 = vmul.f32 1.442695, %v3115_v58 }
 0x832   : > { %8482 = vst [vmem:[#allocation121_spill] sm:$0xff] %v7706_v18  ;;  %4518 = vpow2.f32 %v3274_v35  ;;  %v3009_v48 = vmax.f32 %v3008_v32, %v7686_v40  ;;  %v3050_v29 = vmax.f32 %v3049_v45, %v7691_v26  ;;  %v3071_v39 = vmax.f32 %v3070_v12, %v7694_v0  ;;  %v8486_v35 = vld [vmem:[#allocation126_spill] sm:$0xff] }
 0x833   : > { %v7718_v21 = vadd.f32 %v7052_v59, %v2692_v10  ;;  %v3118_v9 = vsub.f32 %v8485_v52, %v7658_v41  ;;  %4520 = vpow2.f32 %v3276_v47  ;;  %v3280_v51 = vmul.f32 1.442695, %v3116_v55  ;;  %v8487_v10 = vld [vmem:[#allocation112_spill] sm:$0xff]  ;;  %v8488_v52 = vld [vmem:[#allocation158_spill] sm:$0xff] }
 0x834   : > { %v7723_v4 = vmax.f32 %v3029_v31, %v7703_v38  ;;  %v3119_v58 = vsub.f32 %v8486_v35, %v7658_v41  ;;  %v7727_v5 = vmax.f32 %v2993_v61, %v2994_v6  ;;  %v7730_v32 = vmax.f32 %v3050_v29, %v7706_v18  ;;  %v2431_v31 = vpop.permute.xlu0 %2430  ;;  %v2565_v35 = vpop.permute.xlu1 %2564 }
 0x835   : > { %8484 = vst [vmem:[#allocation120_spill] sm:$0xff] %v7718_v21  ;;  %v3010_v45 = vmax.f32 %v3009_v48, %v7709_v14  ;;  %v3120_v12 = vsub.f32 %v8487_v10, %v7658_v41  ;;  %v3121_v47 = vsub.f32 %v8488_v52, %v7658_v41  ;;  %4522 = vpow2.f32 %v3278_v60 }
 0x836   : > { %v3282_v55 = vmul.f32 1.442695, %v3117_v54  ;;  %v3122_v26 = vsub.f32 %v8489_v13, %v7658_v41  ;;  %v3123_v61 = vsub.f32 %v7492_v30, %v7658_v41  ;;  %v3124_v6 = vsub.f32 %v7504_v17, %v7658_v41  ;;  %v8490_v30 = vld [vmem:[#allocation129_spill] sm:$0xff]  ;;  %v8491_v17 = vld [vmem:[#allocation128_spill] sm:$0xff] }
 0x837   : > { %v7744_v48 = vmax.f32 %v3071_v39, %v7718_v21  ;;  %v3125_v29 = vsub.f32 %v7519_v22, %v7658_v41  ;;  %v3126_v60 = vsub.f32 %v7531_v23, %v7658_v41  ;;  %4524 = vpow2.f32 %v3280_v51 }
 0x838   : > { %v3284_v54 = vmul.f32 1.442695, %v3118_v9  ;;  %v3127_v13 = vsub.f32 %v7555_v57, %v7658_v41  ;;  %v3128_v10 = vsub.f32 %v8490_v30, %v7727_v5  ;;  %v3129_v52 = vsub.f32 %v8491_v17, %v7727_v5  ;;  %v8492_v30 = vld [vmem:[#allocation132_spill] sm:$0xff] }
 0x839   : > { %v2661_v39 = vadd.f32 %v2431_v31, %v6490_v2  ;;  %4526 = vpow2.f32 %v3282_v55  ;;  %v3286_v18 = vmul.f32 1.442695, %v3119_v58  ;;  %v3288_v22 = vmul.f32 1.442695, %v3120_v12  ;;  %v8493_v58 = vld [vmem:[#allocation139_spill] sm:$0xff]  ;;  %v8494_v31 = vld [vmem:[#allocation145_spill] sm:$0xff] }
 0x83a   : > { %v3290_v3 = vmul.f32 1.442695, %v3121_v47  ;;  %v3292_v23 = vmul.f32 1.442695, %v3122_v26  ;;  %v3294_v51 = vmul.f32 1.442695, %v3123_v61  ;;  %v2693_v53 = vadd.f32 %v2565_v35, %v6490_v2 }
 0x83b   : > { %v4517_v25 = vpop.eup %4516  ;;  %v3296_v9 = vmul.f32 1.442695, %v3124_v6  ;;  %4528 = vpow2.f32 %v3284_v54  ;;  %v3298_v57 = vmul.f32 1.442695, %v3125_v29  ;;  %v7758_v41 = vmul.f32 1.442695, %v3126_v60 }
 0x83c   : > { %v4519_v37 = vpop.eup %4518  ;;  %v3130_v17 = vsub.f32 %v8492_v30, %v7727_v5  ;;  %v7762_v21 = vmul.f32 1.442695, %v3127_v13  ;;  %v3131_v12 = vsub.f32 %v8493_v58, %v7727_v5  ;;  %v3304_v47 = vmul.f32 1.442695, %v3128_v10  ;;  %v8495_v60 = vld [vmem:[#allocation148_spill] sm:$0xff]  ;;  %v8496_v13 = vld [vmem:[#allocation155_spill] sm:$0xff] }
 0x83d   : > { %v3506_v55 = vadd.f32 %v4519_v37, %v4517_v25  ;;  %v4521_v26 = vpop.eup %4520  ;;  %4530 = vpow2.f32 %v3286_v18  ;;  %v3132_v61 = vsub.f32 %v8494_v31, %v7727_v5  ;;  %v3306_v6 = vmul.f32 1.442695, %v3129_v52  ;;  %v8497_v31 = vld [vmem:[#allocation107_spill] sm:$0xff] }
 0x83e   : > { %v3011_v54 = vrot.slane %v3010_v45, 4  ;;  %4532 = vpow2.f32 %v3288_v22  ;;  %v3133_v35 = vsub.f32 %v8495_v60, %v7727_v5  ;;  %v3134_v30 = vsub.f32 %v8496_v13, %v7727_v5  ;;  %v8498_v22 = vld [vmem:[#allocation113_spill] sm:$0xff] }
 0x83f   : > { %v3507_v29 = vadd.f32 %v4521_v26, %v3506_v55  ;;  %v4523_v37 = vpop.eup %4522  ;;  %4534 = vpow2.f32 %v3290_v3  ;;  %v3308_v25 = vmul.f32 1.442695, %v3130_v17  ;;  %v7773_v10 = vadd.f32 %v7041_v1, %v2661_v39  ;;  %v8499_v1 = vld [vmem:[#allocation160_spill] sm:$0xff] }
 0x840   : > { %v3012_v58 = vmax.f32 %v3010_v45, %v3011_v54  ;;  %v3135_v52 = vsub.f32 %v8497_v31, %v7727_v5  ;;  %v3136_v55 = vsub.f32 %v8498_v22, %v7727_v5  ;;  %4536 = vpow2.f32 %v3304_v47  ;;  %v2498_v31 = vpop.permute.xlu0 %2497 }
 0x841   : > { %v3508_v18 = vadd.f32 %v4523_v37, %v3507_v29  ;;  %v4525_v26 = vpop.eup %4524  ;;  %v3137_v60 = vsub.f32 %v7365_v46, %v7727_v5  ;;  %4538 = vpow2.f32 %v3306_v6  ;;  %v3310_v13 = vmul.f32 1.442695, %v3131_v12  ;;  %v8500_v12 = vld [vmem:[#allocation161_spill] sm:$0xff] }
 0x842   : > { %v3013_v3 = vrot.slane %v3012_v58, 2  ;;  %4540 = vpow2.f32 %v3292_v23  ;;  %v3138_v39 = vsub.f32 %v8499_v1, %v7727_v5  ;;  %v3312_v17 = vmul.f32 1.442695, %v3132_v61 }
 0x843   : > { %v3509_v45 = vadd.f32 %v4525_v26, %v3508_v18  ;;  %v4527_v54 = vpop.eup %4526  ;;  %4542 = vpow2.f32 %v3308_v25  ;;  %v3031_v37 = vmax.f32 %v7723_v4, %v7773_v10  ;;  %v7786_v47 = vadd.f32 %v7052_v59, %v2693_v53 }
 0x844   : > { %v3014_v29 = vmax.f32 %v3012_v58, %v3013_v3  ;;  %4544 = vpow2.f32 %v3294_v51  ;;  %v3139_v23 = vsub.f32 %v8500_v12, %v7727_v5  ;;  %v3140_v6 = vsub.f32 %v7507_v8, %v7727_v5 }
 0x845   : > { %v3510_v46 = vadd.f32 %v4527_v54, %v3509_v45  ;;  %v4529_v18 = vpop.eup %4528  ;;  %v3141_v61 = vsub.f32 %v7522_v56, %v7727_v5  ;;  %4546 = vpow2.f32 %v3310_v13  ;;  %v3314_v25 = vmul.f32 1.442695, %v3133_v35 }
 0x846   : > { %v3015_v58 = vrot.slane %v3014_v29, 1  ;;  %4548 = vpow2.f32 %v3296_v9  ;;  %v3142_v59 = vsub.f32 %v7534_v15, %v7727_v5  ;;  %v2677_v53 = vadd.f32 %v2498_v31, %v6490_v2 }
 0x847   : > { %v3511_v4 = vadd.f32 %v4529_v18, %v3510_v46  ;;  %v4531_v51 = vpop.eup %4530  ;;  %4550 = vpow2.f32 %v3312_v17  ;;  %v3316_v22 = vmul.f32 1.442695, %v3134_v30  ;;  %v3032_v26 = vrot.slane %v3031_v37, 4 }
 0x848   : > { %v3073_v8 = vmax.f32 %v7744_v48, %v7786_v47  ;;  %v4533_v3 = vpop.eup %4532  ;;  %4552 = vpow2.f32 %v3298_v57  ;;  %v3143_v35 = vsub.f32 %v7558_v16, %v7727_v5  ;;  %v7801_v9 = vmax.f32 %v3014_v29, %v3015_v58 }
 0x849   : > { %v3512_v56 = vadd.f32 %v4531_v51, %v3511_v4  ;;  %v4535_v13 = vpop.eup %4534  ;;  %4554 = vpow2.f32 %v3314_v25  ;;  %v3318_v15 = vmul.f32 1.442695, %v3135_v52  ;;  %v3320_v45 = vmul.f32 1.442695, %v3136_v55  ;;  %v8501_v52 = vld [vmem:[#allocation131_spill] sm:$0xff] }
 0x84a   : > { %v3322_v1 = vmul.f32 1.442695, %v3137_v60  ;;  %v4537_v54 = vpop.eup %4536  ;;  %4556 = vpow2.f32 %v7758_v41  ;;  %v3324_v17 = vmul.f32 1.442695, %v3138_v39  ;;  %v7805_v48 = vadd.f32 %v7044_v62, %v2677_v53  ;;  %v8502_v60 = vld [vmem:[#allocation130_spill] sm:$0xff] }
 0x84b   : > { %v3513_v30 = vadd.f32 %v4533_v3, %v3512_v56  ;;  %v4539_v57 = vpop.eup %4538  ;;  %4558 = vpow2.f32 %v3316_v22  ;;  %v3326_v31 = vmul.f32 1.442695, %v3139_v23  ;;  %v3033_v46 = vmax.f32 %v3031_v37, %v3032_v26  ;;  %v8503_v62 = vld [vmem:[#allocation134_spill] sm:$0xff]  ;;  %v8504_v26 = vld [vmem:[#allocation143_spill] sm:$0xff] }
 0x84c   : > { %v3074_v16 = vrot.slane %v3073_v8, 4  ;;  %v4541_v29 = vpop.eup %4540  ;;  %v3527_v18 = vadd.f32 %v4539_v57, %v4537_v54  ;;  %v3144_v55 = vsub.f32 %v8501_v52, %v7801_v9  ;;  %v3145_v25 = vsub.f32 %v8502_v60, %v7801_v9 }
 0x84d   : > { %v3514_v12 = vadd.f32 %v4535_v13, %v3513_v30  ;;  %v4543_v41 = vpop.eup %4542  ;;  %4560 = vpow2.f32 %v3318_v15  ;;  %v3328_v39 = vmul.f32 1.442695, %v3140_v6  ;;  %v3330_v58 = vmul.f32 1.442695, %v3141_v61 }
 0x84e   : > { %v3146_v4 = vsub.f32 %v8503_v62, %v7801_v9  ;;  %v4545_v53 = vpop.eup %4544  ;;  %4562 = vpow2.f32 %v7762_v21  ;;  %v3528_v23 = vadd.f32 %v4543_v41, %v3527_v18  ;;  %v3052_v51 = vmax.f32 %v7730_v32, %v7805_v48  ;;  %v8505_v21 = vld [vmem:[#allocation146_spill] sm:$0xff] }
 0x84f   : > { %v3515_v37 = vadd.f32 %v4541_v29, %v3514_v12  ;;  %v4547_v22 = vpop.eup %4546  ;;  %4564 = vpow2.f32 %v3320_v45  ;;  %v3147_v3 = vsub.f32 %v8504_v26, %v7801_v9  ;;  %v3034_v56 = vrot.slane %v3033_v46, 2  ;;  %v8508_v26 = vld [vmem:[#allocation111_spill] sm:$0xff] }
 0x850   : > { %v3075_v13 = vmax.f32 %v3073_v8, %v3074_v16  ;;  %v4549_v6 = vpop.eup %4548  ;;  %4566 = vpow2.f32 %v3322_v1  ;;  %v3529_v61 = vadd.f32 %v4547_v22, %v3528_v23  ;;  %v3336_v15 = vmul.f32 1.442695, %v3144_v55  ;;  %v8506_v8 = vld [vmem:[#allocation154_spill] sm:$0xff] }
 0x851   : > { %v3338_v54 = vmul.f32 1.442695, %v3145_v25  ;;  %v4551_v30 = vpop.eup %4550  ;;  %v3516_v57 = vadd.f32 %v4545_v53, %v3515_v37  ;;  %4568 = vpow2.f32 %v3324_v17  ;;  %v3148_v29 = vsub.f32 %v8505_v21, %v7801_v9 }
 0x852   : > { %v3340_v12 = vmul.f32 1.442695, %v3146_v4  ;;  %v4553_v32 = vpop.eup %4552  ;;  %v3332_v18 = vmul.f32 1.442695, %v3142_v59  ;;  %v3530_v45 = vadd.f32 %v4551_v30, %v3529_v61  ;;  %4570 = vpow2.f32 %v3336_v15  ;;  %v8507_v4 = vld [vmem:[#allocation156_spill] sm:$0xff] }
 0x853   : > { %v3053_v52 = vrot.slane %v3052_v51, 4  ;;  %v4555_v60 = vpop.eup %4554  ;;  %v3149_v16 = vsub.f32 %v8506_v8, %v7801_v9  ;;  %4572 = vpow2.f32 %v3338_v54  ;;  %v3342_v1 = vmul.f32 1.442695, %v3147_v3 }
 0x854   : > { %v3035_v55 = vmax.f32 %v3033_v46, %v3034_v56  ;;  %v4557_v25 = vpop.eup %4556  ;;  %4574 = vpow2.f32 %v3326_v31  ;;  %v3334_v41 = vmul.f32 1.442695, %v3143_v35  ;;  %v3531_v17 = vadd.f32 %v4555_v60, %v3530_v45  ;;  %v8509_v31 = vld [vmem:[#allocation119_spill] sm:$0xff] }
 0x855   : > { %v3076_v62 = vrot.slane %v3075_v13, 2  ;;  %v4559_v53 = vpop.eup %4558  ;;  %v3517_v37 = vadd.f32 %v4549_v6, %v3516_v57  ;;  %v3150_v59 = vsub.f32 %v8507_v4, %v7801_v9  ;;  %4576 = vpow2.f32 %v3340_v12 }
 0x856   : > { %v3344_v23 = vmul.f32 1.442695, %v3148_v29  ;;  %4578 = vpow2.f32 %v3328_v39  ;;  %v3532_v22 = vadd.f32 %v4559_v53, %v3531_v17  ;;  %v3151_v61 = vsub.f32 %v8508_v26, %v7801_v9 }
 0x857   : > { %v7826_v15 = vmax.f32 %v3052_v51, %v3053_v52  ;;  %v4561_v46 = vpop.eup %4560  ;;  %v3152_v35 = vsub.f32 %v8509_v31, %v7801_v9  ;;  %4580 = vpow2.f32 %v3342_v1  ;;  %v3346_v3 = vmul.f32 1.442695, %v3149_v16 }
 0x858   : > { %v3036_v56 = vrot.slane %v3035_v55, 1  ;;  %v4563_v6 = vpop.eup %4562  ;;  %4582 = vpow2.f32 %v3330_v58  ;;  %v3533_v54 = vadd.f32 %v4561_v46, %v3532_v22  ;;  %v3153_v30 = vsub.f32 %v7396_v43, %v7801_v9 }
 0x859   : > { %v3154_v39 = vsub.f32 %v7566_v24, %v7801_v9  ;;  %v4565_v57 = vpop.eup %4564  ;;  %v3518_v21 = vadd.f32 %v4553_v32, %v3517_v37  ;;  %v3155_v51 = vsub.f32 %v7609_v7, %v7801_v9  ;;  %4584 = vpow2.f32 %v3344_v23 }
 0x85a   : > { %v3348_v29 = vmul.f32 1.442695, %v3150_v59  ;;  %v4567_v12 = vpop.eup %4566  ;;  %4586 = vpow2.f32 %v3332_v18  ;;  %v3534_v45 = vadd.f32 %v4565_v57, %v3533_v54  ;;  %v3350_v52 = vmul.f32 1.442695, %v3151_v61  ;;  %v8510_v59 = vld [vmem:[#allocation133_spill] sm:$0xff] }
 0x85b   : > { %v7836_v60 = vmax.f32 %v3035_v55, %v3036_v56  ;;  %v4569_v58 = vpop.eup %4568  ;;  %v3156_v43 = vsub.f32 %v7626_v33, %v7801_v9  ;;  %4588 = vpow2.f32 %v3346_v3  ;;  %v3352_v8 = vmul.f32 1.442695, %v3152_v35 }
 0x85c   : > { %v7840_v24 = vmax.f32 %v3075_v13, %v3076_v62  ;;  %v4571_v32 = vpop.eup %4570  ;;  %4590 = vpow2.f32 %v3334_v41  ;;  %v3535_v16 = vadd.f32 %v4567_v12, %v3534_v45  ;;  %v3157_v7 = vsub.f32 %v7650_v34, %v7801_v9  ;;  %v8511_v34 = vld [vmem:[#allocation135_spill] sm:$0xff] }
 0x85d   : > { %v3354_v1 = vmul.f32 1.442695, %v3153_v30  ;;  %v4573_v18 = vpop.eup %4572  ;;  %v3519_v17 = vadd.f32 %v4557_v25, %v3518_v21  ;;  %4592 = vpow2.f32 %v3348_v29  ;;  %v3356_v55 = vmul.f32 1.442695, %v3154_v39  ;;  %v8512_v25 = vld [vmem:[#allocation138_spill] sm:$0xff]  ;;  %v8514_v12 = vld [vmem:[#allocation151_spill] sm:$0xff] }
 0x85e   : > { %v3358_v53 = vmul.f32 1.442695, %v3155_v51  ;;  %v4575_v37 = vpop.eup %4574  ;;  %v3536_v4 = vadd.f32 %v4569_v58, %v3535_v16  ;;  %4594 = vpow2.f32 %v3350_v52  ;;  %v3548_v33 = vadd.f32 %v4573_v18, %v4571_v32 }
 0x85f   : > { %v3160_v13 = vsub.f32 %v8510_v59, %v7836_v60  ;;  %v4577_v62 = vpop.eup %4576  ;;  %v3158_v41 = vsub.f32 %v7686_v40, %v7801_v9  ;;  %4596 = vpow2.f32 %v3352_v8  ;;  %v3161_v23 = vsub.f32 %v8511_v34, %v7836_v60  ;;  %v8513_v40 = vld [vmem:[#allocation144_spill] sm:$0xff]  ;;  %v8516_v59 = vld [vmem:[#allocation157_spill] sm:$0xff] }
 0x860   : > { %v3162_v22 = vsub.f32 %v8512_v25, %v7836_v60  ;;  %v4579_v26 = vpop.eup %4578  ;;  %v3537_v61 = vadd.f32 %v4575_v37, %v3536_v4  ;;  %v3159_v46 = vsub.f32 %v7709_v14, %v7801_v9  ;;  %4598 = vpow2.f32 %v3354_v1  ;;  %v8515_v1 = vld [vmem:[#allocation106_spill] sm:$0xff] }
 0x861   : > { %v3549_v31 = vadd.f32 %v4577_v62, %v3548_v33  ;;  %v4581_v35 = vpop.eup %4580  ;;  %v3520_v3 = vadd.f32 %v4563_v6, %v3519_v17  ;;  %4600 = vpow2.f32 %v3356_v55  ;;  %v3360_v56 = vmul.f32 1.442695, %v3156_v43 }
 0x862   : > { %v3163_v54 = vsub.f32 %v8513_v40, %v7836_v60  ;;  %v4583_v30 = vpop.eup %4582  ;;  %4602 = vpow2.f32 %v3358_v53  ;;  %v3362_v39 = vmul.f32 1.442695, %v3157_v7  ;;  %v3368_v21 = vmul.f32 1.442695, %v3160_v13 }
 0x863   : > { %v3550_v57 = vadd.f32 %v4581_v35, %v3549_v31  ;;  %v4585_v51 = vpop.eup %4584  ;;  %v3538_v29 = vadd.f32 %v4579_v26, %v3537_v61  ;;  %v3164_v45 = vsub.f32 %v8514_v12, %v7836_v60  ;;  %v3370_v14 = vmul.f32 1.442695, %v3161_v23  ;;  %v8517_v23 = vld [vmem:[#allocation116_spill] sm:$0xff] }
 0x864   : > { %v3372_v52 = vmul.f32 1.442695, %v3162_v22  ;;  %v4587_v58 = vpop.eup %4586  ;;  %v3364_v8 = vmul.f32 1.442695, %v3158_v41  ;;  %4604 = vpow2.f32 %v3368_v21  ;;  %v3078_v43 = vrot.slane %v7840_v24, 1 }
 0x865   : > { %v3551_v6 = vadd.f32 %v4585_v51, %v3550_v57  ;;  %v4589_v32 = vpop.eup %4588  ;;  %v3521_v16 = vrot.slane %v3520_v3, 4  ;;  %v3165_v7 = vsub.f32 %v8515_v1, %v7836_v60  ;;  %4606 = vpow2.f32 %v3370_v14  ;;  %v8521_v1 = vld [vmem:[#allocation147_spill] sm:$0xff] }
 0x866   : > { %v3374_v18 = vmul.f32 1.442695, %v3163_v54  ;;  %v4591_v17 = vpop.eup %4590  ;;  %4608 = vpow2.f32 %v3360_v56  ;;  %v3366_v55 = vmul.f32 1.442695, %v3159_v46  ;;  %v3055_v37 = vrot.slane %v7826_v15, 2  ;;  %v8518_v46 = vld [vmem:[#allocation125_spill] sm:$0xff] }
 0x867   : > { %v3552_v53 = vadd.f32 %v4589_v32, %v3551_v6  ;;  %v4593_v4 = vpop.eup %4592  ;;  %v3539_v33 = vadd.f32 %v4583_v30, %v3538_v29  ;;  %v3166_v13 = vsub.f32 %v8516_v59, %v7836_v60  ;;  %4610 = vpow2.f32 %v3372_v52 }
 0x868   : > { %v3376_v62 = vmul.f32 1.442695, %v3164_v45  ;;  %v4595_v41 = vpop.eup %4594  ;;  %4612 = vpow2.f32 %v3362_v39  ;;  %v3167_v25 = vsub.f32 %v8517_v23, %v7836_v60  ;;  %v7867_v22 = vmax.f32 %v7840_v24, %v3078_v43 }
 0x869   : > { %v3553_v34 = vadd.f32 %v4593_v4, %v3552_v53  ;;  %v4597_v26 = vpop.eup %4596  ;;  %v7869_v61 = vadd.f32 %v3521_v16, %v3520_v3  ;;  %v3168_v31 = vsub.f32 %v8518_v46, %v7836_v60  ;;  %4614 = vpow2.f32 %v3374_v18 }
 0x86a   : > { %v3378_v35 = vmul.f32 1.442695, %v3165_v7  ;;  %v4599_v56 = vpop.eup %4598  ;;  %4616 = vpow2.f32 %v3364_v8  ;;  %v3169_v54 = vsub.f32 %v7561_v44, %v7836_v60  ;;  %v3170_v30 = vsub.f32 %v7606_v49, %v7836_v60  ;;  %v8519_v44 = vld [vmem:[#allocation141_spill] sm:$0xff]  ;;  %v8520_v49 = vld [vmem:[#allocation140_spill] sm:$0xff] }
 0x86b   : > { %v3554_v40 = vadd.f32 %v4595_v41, %v3553_v34  ;;  %v4601_v39 = vpop.eup %4600  ;;  %v3540_v24 = vadd.f32 %v4587_v58, %v3539_v33  ;;  %v3171_v3 = vsub.f32 %v7623_v63, %v7836_v60  ;;  %4618 = vpow2.f32 %v3376_v62 }
 0x86c   : > { %v3380_v57 = vmul.f32 1.442695, %v3166_v13  ;;  %v4603_v21 = vpop.eup %4602  ;;  %4620 = vpow2.f32 %v3366_v55  ;;  %v3172_v29 = vsub.f32 %v7645_v36, %v7836_v60  ;;  %v3382_v12 = vmul.f32 1.442695, %v3167_v25 }
 0x86d   : > { %v3555_v51 = vadd.f32 %v4597_v26, %v3554_v40  ;;  %4622 = vpow2.f32 %v3378_v35  ;;  %v3384_v45 = vmul.f32 1.442695, %v3168_v31  ;;  %v3192_v14 = vsub.f32 %v8519_v44, %v7867_v22  ;;  %v8523_v26 = vld [vmem:[#allocation110_spill] sm:$0xff] }
 0x86e   : > { %v3193_v52 = vsub.f32 %v8520_v49, %v7867_v22  ;;  %v4605_v58 = vpop.eup %4604  ;;  %v3173_v63 = vsub.f32 %v7683_v42, %v7836_v60  ;;  %v3174_v6 = vsub.f32 %v7703_v38, %v7836_v60  ;;  %v3386_v43 = vmul.f32 1.442695, %v3169_v54  ;;  %v8522_v42 = vld [vmem:[#allocation150_spill] sm:$0xff] }
 0x86f   : > { %v3556_v8 = vadd.f32 %v4599_v56, %v3555_v51  ;;  %v4607_v32 = vpop.eup %4606  ;;  %v3541_v36 = vadd.f32 %v4591_v17, %v3540_v24  ;;  %4624 = vpow2.f32 %v3380_v57  ;;  %v3388_v16 = vmul.f32 1.442695, %v3170_v30 }
 0x870   : > { %v3194_v7 = vsub.f32 %v8521_v1, %v7867_v22  ;;  %v4609_v18 = vpop.eup %4608  ;;  %v3175_v53 = vsub.f32 %v7773_v10, %v7836_v60  ;;  %4626 = vpow2.f32 %v3382_v12  ;;  %v3569_v4 = vadd.f32 %v4607_v32, %v4605_v58 }
 0x871   : > { %v3557_v55 = vadd.f32 %v4601_v39, %v3556_v8  ;;  %v4611_v33 = vpop.eup %4610  ;;  %4628 = vpow2.f32 %v3384_v45  ;;  %v3195_v38 = vsub.f32 %v8522_v42, %v7867_v22  ;;  %v3432_v59 = vmul.f32 1.442695, %v3192_v14  ;;  %v8524_v39 = vld [vmem:[#allocation108_spill] sm:$0xff] }
 0x872   : > { %v3434_v13 = vmul.f32 1.442695, %v3193_v52  ;;  %v4613_v17 = vpop.eup %4612  ;;  %4630 = vpow2.f32 %v3386_v43  ;;  %v3390_v41 = vmul.f32 1.442695, %v3171_v3  ;;  %v3570_v34 = vadd.f32 %v4611_v33, %v3569_v4 }
 0x873   : > { %v3558_v62 = vadd.f32 %v4603_v21, %v3557_v55  ;;  %v4615_v23 = vpop.eup %4614  ;;  %v3542_v25 = vrot.slane %v3541_v36, 4  ;;  %4632 = vpow2.f32 %v3388_v16  ;;  %v3196_v10 = vsub.f32 %v8523_v26, %v7867_v22 }
 0x874   : > { %v3436_v46 = vmul.f32 1.442695, %v3194_v7  ;;  %v4617_v31 = vpop.eup %4616  ;;  %v3392_v35 = vmul.f32 1.442695, %v3172_v29  ;;  %v3394_v56 = vmul.f32 1.442695, %v3173_v63  ;;  %v3571_v40 = vadd.f32 %v4615_v23, %v3570_v34 }
 0x875   : > { %4634 = vpow2.f32 %v3432_v59  ;;  %v4619_v54 = vpop.eup %4618  ;;  %v3559_v30 = vadd.f32 %v4609_v18, %v3558_v62  ;;  %v3197_v24 = vsub.f32 %v8524_v39, %v7867_v22  ;;  %v3438_v3 = vmul.f32 1.442695, %v3195_v38  ;;  %v8525_v29 = vld [vmem:[#allocation115_spill] sm:$0xff]  ;;  %v8526_v59 = vld [vmem:[#allocation120_spill] sm:$0xff] }
 0x876   : > { %4636 = vpow2.f32 %v3434_v13  ;;  %v4621_v57 = vpop.eup %4620  ;;  %v3396_v21 = vmul.f32 1.442695, %v3174_v6  ;;  %v3398_v51 = vmul.f32 1.442695, %v3175_v53  ;;  %v3572_v12 = vadd.f32 %v4619_v54, %v3571_v40  ;;  %v8528_v39 = vld [vmem:[#allocation136_spill] sm:$0xff] }
 0x877   : > { %4638 = vpow2.f32 %v3390_v41  ;;  %v4623_v45 = vpop.eup %4622  ;;  %v7899_v44 = vadd.f32 %v3542_v25, %v3541_v36  ;;  %v3198_v14 = vsub.f32 %v8525_v29, %v7867_v22  ;;  %v3440_v49 = vmul.f32 1.442695, %v3196_v10 }
 0x878   : > { %4640 = vpow2.f32 %v3436_v46  ;;  %v3573_v52 = vadd.f32 %v4623_v45, %v3572_v12  ;;  %v3199_v58 = vsub.f32 %v7380_v20, %v7867_v22  ;;  %v3200_v8 = vsub.f32 %v7548_v28, %v7867_v22 }
 0x879   : > { %4642 = vpow2.f32 %v3392_v35  ;;  %v4625_v63 = vpop.eup %4624  ;;  %v3560_v6 = vadd.f32 %v4613_v17, %v3559_v30  ;;  %v3442_v43 = vmul.f32 1.442695, %v3197_v24  ;;  %v3056_v32 = vmax.f32 %v7826_v15, %v3055_v37 }
 0x87a   : > { %4644 = vpow2.f32 %v3438_v3  ;;  %v4627_v36 = vpop.eup %4626  ;;  %v3574_v16 = vadd.f32 %v4625_v63, %v3573_v52  ;;  %v3201_v1 = vsub.f32 %v7592_v27, %v7867_v22  ;;  %v3202_v20 = vsub.f32 %v7617_v19, %v7867_v22  ;;  %v8529_v3 = vld [vmem:[#allocation142_spill] sm:$0xff]  ;;  %v8530_v52 = vld [vmem:[#allocation149_spill] sm:$0xff] }
 0x87b   : > { %4646 = vpow2.f32 %v3394_v56  ;;  %v4629_v7 = vpop.eup %4628  ;;  %v3203_v28 = vsub.f32 %v7640_v11, %v7867_v22  ;;  %v3444_v18 = vmul.f32 1.442695, %v3198_v14  ;;  %v3057_v55 = vrot.slane %v3056_v32, 1  ;;  %v8527_v56 = vld [vmem:[#allocation137_spill] sm:$0xff] }
 0x87c   : > { %4648 = vpow2.f32 %v3440_v49  ;;  %v4631_v53 = vpop.eup %4630  ;;  %v3575_v4 = vadd.f32 %v4627_v36, %v3574_v16  ;;  %v3204_v15 = vsub.f32 %v7674_v50, %v7867_v22  ;;  %v3205_v37 = vsub.f32 %v7694_v0, %v7867_v22 }
 0x87d   : > { %4650 = vpow2.f32 %v3396_v21  ;;  %v4633_v27 = vpop.eup %4632  ;;  %v3561_v33 = vadd.f32 %v4617_v31, %v3560_v6  ;;  %v3446_v19 = vmul.f32 1.442695, %v3199_v58  ;;  %v7920_v42 = vmax.f32 %v3056_v32, %v3057_v55  ;;  %v8531_v6 = vld [vmem:[#allocation153_spill] sm:$0xff] }
 0x87e   : > { %4652 = vpow2.f32 %v3442_v43  ;;  %v3576_v11 = vadd.f32 %v4629_v7, %v3575_v4  ;;  %v3206_v13 = vsub.f32 %v8526_v59, %v7867_v22  ;;  %v3207_v17 = vsub.f32 %v7786_v47, %v7867_v22  ;;  %v8532_v55 = vld [vmem:[#allocation109_spill] sm:$0xff] }
 0x87f   : > { %v4635_v38 = vpop.eup %4634  ;;  %4654 = vpow2.f32 %v3398_v51  ;;  %v3448_v50 = vmul.f32 1.442695, %v3200_v8  ;;  %v3450_v41 = vmul.f32 1.442695, %v3201_v1  ;;  %v3452_v0 = vmul.f32 1.442695, %v3202_v20 }
 0x880   : > { %v4637_v62 = vpop.eup %4636  ;;  %4656 = vpow2.f32 %v3444_v18  ;;  %v3577_v23 = vadd.f32 %v4631_v53, %v3576_v11  ;;  %v3454_v25 = vmul.f32 1.442695, %v3203_v28  ;;  %v3456_v26 = vmul.f32 1.442695, %v3204_v15 }
 0x881   : > { %v4639_v34 = vpop.eup %4638  ;;  %v3611_v10 = vadd.f32 %v4637_v62, %v4635_v38  ;;  %v3562_v31 = vadd.f32 %v4621_v57, %v3561_v33  ;;  %4658 = vpow2.f32 %v3446_v19  ;;  %v3458_v35 = vmul.f32 1.442695, %v3205_v37  ;;  %v8533_v38 = vld [vmem:[#allocation114_spill] sm:$0xff] }
 0x882   : > { %v4641_v46 = vpop.eup %4640  ;;  %v3176_v40 = vsub.f32 %v8527_v56, %v7920_v42  ;;  %v3578_v30 = vadd.f32 %v4633_v27, %v3577_v23  ;;  %v3177_v24 = vsub.f32 %v8528_v39, %v7920_v42  ;;  %v3178_v21 = vsub.f32 %v8529_v3, %v7920_v42 }
 0x883   : > { %v4643_v54 = vpop.eup %4642  ;;  %v3612_v47 = vadd.f32 %v4641_v46, %v3611_v10  ;;  %4660 = vpow2.f32 %v3448_v50  ;;  %v3460_v12 = vmul.f32 1.442695, %v3206_v13  ;;  %v3523_v45 = vrot.slane %v7869_v61, 2 }
 0x884   : > { %v4645_v51 = vpop.eup %4644  ;;  %v3544_v57 = vrot.slane %v7899_v44, 2  ;;  %v3579_v14 = vadd.f32 %v4639_v34, %v3578_v30  ;;  %4662 = vpow2.f32 %v3450_v41  ;;  %v3179_v58 = vsub.f32 %v8530_v52, %v7920_v42  ;;  %v8535_v34 = vld [vmem:[#allocation162_spill] sm:$0xff] }
 0x885   : > { %v4647_v29 = vpop.eup %4646  ;;  %v3613_v49 = vadd.f32 %v4645_v51, %v3612_v47  ;;  %v3563_v63 = vrot.slane %v3562_v31, 4  ;;  %4664 = vpow2.f32 %v3452_v0  ;;  %v3180_v43 = vsub.f32 %v8531_v6, %v7920_v42 }
 0x886   : > { %v4649_v8 = vpop.eup %4648  ;;  %v3400_v32 = vmul.f32 1.442695, %v3176_v40  ;;  %v3580_v16 = vadd.f32 %v4643_v54, %v3579_v14  ;;  %v3402_v20 = vmul.f32 1.442695, %v3177_v24  ;;  %v3404_v7 = vmul.f32 1.442695, %v3178_v21 }
 0x887   : > { %v4651_v36 = vpop.eup %4650  ;;  %v3614_v1 = vadd.f32 %v4649_v8, %v3613_v49  ;;  %v3462_v18 = vmul.f32 1.442695, %v3207_v17  ;;  %v3181_v53 = vsub.f32 %v8532_v55, %v7920_v42  ;;  %v3524_v4 = vadd.f32 %v3523_v45, %v7869_v61  ;;  %v8534_v61 = vld [vmem:[#allocation159_spill] sm:$0xff]  ;;  %v8537_v54 = vld [vmem:[#allocation164_spill] sm:$0xff] }
 0x888   : > { %v4653_v28 = vpop.eup %4652  ;;  %4666 = vpow2.f32 %v3400_v32  ;;  %v3581_v37 = vadd.f32 %v4647_v29, %v3580_v16  ;;  %v3406_v33 = vmul.f32 1.442695, %v3179_v58  ;;  %v3182_v11 = vsub.f32 %v8533_v38, %v7920_v42 }
 0x889   : > { %v4655_v15 = vpop.eup %4654  ;;  %v3615_v27 = vadd.f32 %v4653_v28, %v3614_v1  ;;  %4668 = vpow2.f32 %v3402_v20  ;;  %v3545_v59 = vadd.f32 %v3544_v57, %v7899_v44  ;;  %v3564_v13 = vadd.f32 %v3563_v63, %v3562_v31  ;;  %v8536_v44 = vld [vmem:[#allocation163_spill] sm:$0xff] }
 0x88a   : > { %v4657_v19 = vpop.eup %4656  ;;  %4670 = vpow2.f32 %v3454_v25  ;;  %v3582_v17 = vadd.f32 %v4651_v36, %v3581_v37  ;;  %v3408_v50 = vmul.f32 1.442695, %v3180_v43  ;;  %v3183_v0 = vsub.f32 %v8534_v61, %v7920_v42  ;;  %v8538_v36 = vld [vmem:[#allocation165_spill] sm:$0xff] }
 0x88b   : > { %v3616_v62 = vadd.f32 %v4657_v19, %v3615_v27  ;;  %4672 = vpow2.f32 %v3404_v7  ;;  %v4659_v41 = vpop.eup %4658  ;;  %v3184_v23 = vsub.f32 %v8535_v34, %v7920_v42  ;;  %v3525_v10 = vrot.slane %v3524_v4, 1 }
 0x88c   : > { %4674 = vpow2.f32 %v3456_v26  ;;  %v3583_v25 = vadd.f32 %v4655_v15, %v3582_v17  ;;  %v3410_v56 = vmul.f32 1.442695, %v3181_v53  ;;  %v3185_v31 = vsub.f32 %v8536_v44, %v7920_v42 }
 0x88d   : > { %v3617_v46 = vadd.f32 %v4659_v41, %v3616_v62  ;;  %4676 = vpow2.f32 %v3406_v33  ;;  %v4661_v40 = vpop.eup %4660  ;;  %v3186_v30 = vsub.f32 %v8537_v54, %v7920_v42  ;;  %v3412_v26 = vmul.f32 1.442695, %v3182_v11  ;;  %v8539_v33 = vld [vmem:[#allocation167_spill] sm:$0xff] }
 0x88e   : > { %4678 = vpow2.f32 %v3458_v35  ;;  %v4663_v47 = vpop.eup %4662  ;;  %v3584_v39 = vrot.slane %v3583_v25, 4  ;;  %v3565_v3 = vrot.slane %v3564_v13, 2  ;;  %v3414_v51 = vmul.f32 1.442695, %v3183_v0 }
 0x88f   : > { %v3618_v24 = vadd.f32 %v4661_v40, %v3617_v46  ;;  %4680 = vpow2.f32 %v3408_v50  ;;  %v4665_v21 = vpop.eup %4664  ;;  %v3416_v45 = vmul.f32 1.442695, %v3184_v23  ;;  %v3546_v57 = vrot.slane %v3545_v59, 1 }
 0x890   : > { %4682 = vpow2.f32 %v3460_v12  ;;  %v3566_v35 = vadd.f32 %v3565_v3, %v3564_v13  ;;  %v3585_v14 = vadd.f32 %v3584_v39, %v3583_v25  ;;  %v3418_v52 = vmul.f32 1.442695, %v3185_v31  ;;  %v8540_v13 = vld [vmem:[#allocation118_spill] sm:$0xff]  ;;  %v8542_v39 = vld [vmem:[#allocation117_spill] sm:$0xff] }
 0x891   : > { %v3619_v29 = vadd.f32 %v4663_v47, %v3618_v24  ;;  %4684 = vpow2.f32 %v3410_v56  ;;  %v3420_v58 = vmul.f32 1.442695, %v3186_v30  ;;  %v3187_v12 = vsub.f32 %v8538_v36, %v7920_v42 }
 0x892   : > { %v4667_v49 = vpop.eup %4666  ;;  %4686 = vpow2.f32 %v3462_v18  ;;  %v3567_v6 = vrot.slane %v3566_v35, 1  ;;  %v3586_v43 = vrot.slane %v3585_v14, 2  ;;  %v3526_v1 = vadd.f32 %v3525_v10, %v3524_v4  ;;  %v8541_v10 = vld [vmem:[#allocation121_spill] sm:$0xff] }
 0x893   : > { %v4669_v8 = vpop.eup %4668  ;;  %v3620_v63 = vadd.f32 %v4665_v21, %v3619_v29  ;;  %4688 = vpow2.f32 %v3412_v26  ;;  %v3547_v28 = vadd.f32 %v3546_v57, %v3545_v59  ;;  %v3188_v19 = vsub.f32 %v8539_v33, %v7920_v42  ;;  %v8543_v57 = vld [vmem:[#allocation166_spill] sm:$0xff] }
 0x894   : > { %v4671_v32 = vpop.eup %4670  ;;  %4690 = vpow2.f32 %v3414_v51  ;;  %v3590_v16 = vadd.f32 %v4669_v8, %v4667_v49  ;;  %v3587_v55 = vadd.f32 %v3586_v43, %v3585_v14  ;;  %v3568_v15 = vadd.f32 %v3567_v6, %v3566_v35 }
 0x895   : > { %v4673_v20 = vpop.eup %4672  ;;  %v3621_v7 = vadd.f32 %v4671_v32, %v3620_v63  ;;  %4692 = vpow2.f32 %v3416_v45  ;;  %v3189_v4 = vsub.f32 %v8540_v13, %v7920_v42  ;;  %v3422_v50 = vmul.f32 1.442695, %v3187_v12  ;;  %v8545_v12 = vld [vmem:[#allocation152_spill] sm:$0xff] }
 0x896   : > { %v4675_v18 = vpop.eup %4674  ;;  %4694 = vpow2.f32 %v3418_v52  ;;  %v3591_v53 = vadd.f32 %v4673_v20, %v3590_v16  ;;  %v3588_v38 = vrot.slane %v3587_v55, 1  ;;  %v3190_v25 = vsub.f32 %v8541_v10, %v7920_v42 }
 0x897   : > { %v4677_v37 = vpop.eup %4676  ;;  %v3622_v27 = vadd.f32 %v4675_v18, %v3621_v7  ;;  %4696 = vpow2.f32 %v3420_v58  ;;  %v3424_v46 = vmul.f32 1.442695, %v3188_v19  ;;  %v3191_v54 = vsub.f32 %v7805_v48, %v7920_v42  ;;  %v8544_v48 = vld [vmem:[#allocation105_spill] sm:$0xff] }
 0x898   : > { %v4679_v11 = vpop.eup %4678  ;;  %v3592_v17 = vadd.f32 %v4677_v37, %v3591_v53  ;;  %4698 = vlog2.f32 %v3526_v1  ;;  %v3589_v41 = vadd.f32 %v3588_v38, %v3587_v55  ;;  %v3426_v30 = vmul.f32 1.442695, %v3189_v4 }
 0x899   : > { %v4681_v62 = vpop.eup %4680  ;;  %v3623_v59 = vadd.f32 %v4679_v11, %v3622_v27  ;;  %4700 = vlog2.f32 %v3547_v28  ;;  %v3635_v24 = vmul.f32 0.6931472, %v8542_v39  ;;  %v3428_v21 = vmul.f32 1.442695, %v3190_v25  ;;  %v8546_v28 = vld [vmem:[#allocation168_spill] sm:$0xff]  ;;  %v3661_v39 = vpop.permute.xlu0 %3660 }
 0x89a   : > { %v4683_v61 = vpop.eup %4682  ;;  %v3593_v0 = vadd.f32 %v4681_v62, %v3592_v17  ;;  %4702 = vlog2.f32 %v3568_v15  ;;  %v3633_v29 = vmul.f32 0.6931472, %v8543_v57  ;;  %v3430_v14 = vmul.f32 1.442695, %v3191_v54 }
 0x89b   : > { %v4685_v34 = vpop.eup %4684  ;;  %v3624_v23 = vadd.f32 %v4683_v61, %v3623_v59  ;;  %4704 = vlog2.f32 %v3589_v41  ;;  %v3649_v8 = vadd.f32 %v3635_v24, %v8544_v48  ;;  %vm3662_vm9 = vcmp.eq.s32.totalorder %v3661_v39, 1  ;;  %v8549_v48 = vld [vmem:[#allocation23_spill] sm:$0xff] (%p2022_p2) }
 0x89c   : > { %v4687_v56 = vpop.eup %4686  ;;  %v3594_v40 = vadd.f32 %v4685_v34, %v3593_v0  ;;  %4706 = vpow2.f32 %v3422_v50  ;;  %v3648_v16 = vadd.f32 %v3633_v29, %v8545_v12 }
 0x89d   : > { %v4689_v44 = vpop.eup %4688  ;;  %v3625_v31 = vadd.f32 %v4687_v56, %v3624_v23  ;;  %4708 = vpow2.f32 %v3424_v46 }
 0x89e   : > { %v4691_v26 = vpop.eup %4690  ;;  %v3595_v47 = vadd.f32 %v4689_v44, %v3594_v40  ;;  %4710 = vpow2.f32 %v3426_v30  ;;  %v3671_v37 = vsel %vm1756_vm13, %v3649_v8, %v3648_v16 }
 0x89f   : > { %v4693_v3 = vpop.eup %4692  ;;  %v3626_v49 = vrot.slane %v3625_v31, 4  ;;  %4712 = vpow2.f32 %v3428_v21 }
 0x8a0   : > { %v4695_v51 = vpop.eup %4694  ;;  %v3596_v45 = vadd.f32 %v4691_v26, %v3595_v47  ;;  %4714 = vpow2.f32 %v3430_v14 }
 0x8a1   : > { %v4697_v35 = vpop.eup %4696  ;;  %v3627_v20 = vadd.f32 %v3626_v49, %v3625_v31 }
 0x8a2   : > { %v4699_v52 = vpop.eup %4698  ;;  %v3597_v58 = vadd.f32 %v4693_v3, %v3596_v45  ;;  %v8547_v45 = vld [vmem:[#allocation104_spill] sm:$0xff] }
 0x8a3   : > { %v4701_v63 = vpop.eup %4700  ;;  %v3637_v6 = vmul.f32 0.6931472, %v4699_v52  ;;  %v3628_v17 = vrot.slane %v3627_v20, 2 }
 0x8a4   : > { %v4703_v43 = vpop.eup %4702  ;;  %v3598_v32 = vadd.f32 %v4695_v51, %v3597_v58  ;;  %v3639_v36 = vmul.f32 0.6931472, %v4701_v63 }
 0x8a5   : > { %v4705_v1 = vpop.eup %4704  ;;  %v3641_v7 = vmul.f32 0.6931472, %v4703_v43  ;;  %v3650_v55 = vadd.f32 %v3637_v6, %v8546_v28  ;;  %v3629_v0 = vadd.f32 %v3628_v17, %v3627_v20 }
 0x8a6   : > { %v3599_v18 = vadd.f32 %v4697_v35, %v3598_v32  ;;  %v3643_v53 = vmul.f32 0.6931472, %v4705_v1  ;;  %v3651_v15 = vadd.f32 %v3639_v36, %v7727_v5  ;;  %v4707_v27 = vpop.eup %4706 }
 0x8a7   : > { %v3652_v33 = vadd.f32 %v3641_v7, %v7801_v9  ;;  %v3672_v19 = vsel %vm1758_vm14, %v3650_v55, %v3671_v37  ;;  %v4709_v4 = vpop.eup %4708  ;;  %v3630_v10 = vrot.slane %v3629_v0, 1 }
 0x8a8   : > { %v3600_v38 = vadd.f32 %v4707_v27, %v3599_v18  ;;  %v3653_v11 = vadd.f32 %v3643_v53, %v7836_v60  ;;  %v3673_v13 = vsel %vm1760_vm15, %v3651_v15, %v3672_v19  ;;  %v4711_v5 = vpop.eup %4710 }
 0x8a9   : > { %v3674_v62 = vsel %vm1762_vm0, %v3652_v33, %v3673_v13  ;;  %v4713_v61 = vpop.eup %4712  ;;  %v3631_v60 = vadd.f32 %v3630_v10, %v3629_v0 }
 0x8aa   : > { %v3601_v59 = vadd.f32 %v4709_v4, %v3600_v38  ;;  %v3675_v50 = vsel %vm1764_vm1, %v3653_v11, %v3674_v62  ;;  %v4715_v9 = vpop.eup %4714 }
 0x8ab   : > { %4716 = vlog2.f32 %v3631_v60 }
 0x8ac   : > { %v3602_v41 = vadd.f32 %v4711_v5, %v3601_v59 }
 0x8ae   : > { %v3603_v34 = vadd.f32 %v4713_v61, %v3602_v41 }
 0x8b0   : > { %v3604_v23 = vadd.f32 %v4715_v9, %v3603_v34 }
 0x8b2   : > { %v3605_v25 = vrot.slane %v3604_v23, 4 }
 0x8b4   : > { %v3606_v46 = vadd.f32 %v3605_v25, %v3604_v23 }
 0x8b5   : > { %v4717_v54 = vpop.eup %4716 }
 0x8b6   : > { %v3607_v56 = vrot.slane %v3606_v46, 2  ;;  %v3647_v30 = vmul.f32 0.6931472, %v4717_v54 }
 0x8b8   : > { %v3608_v40 = vadd.f32 %v3607_v56, %v3606_v46  ;;  %v3655_v24 = vadd.f32 %v3647_v30, %v7867_v22 }
 0x8ba   : > { %v3609_v44 = vrot.slane %v3608_v40, 1 }
 0x8bc   : > { %v3610_v31 = vadd.f32 %v3609_v44, %v3608_v40 }
 0x8be   : > { %4718 = vlog2.f32 %v3610_v31 }
 0x8c8   : > { %v4719_v26 = vpop.eup %4718 }
 0x8c9   : > { %v3645_v47 = vmul.f32 0.6931472, %v4719_v26 }
 0x8ca   :  { %2024 = sbr.rel (!%p2022_p2) target bundleno = 1720 (0x6b8), region = 120 }
 0x8cb   : > { %v3654_v3 = vadd.f32 %v3645_v47, %v7920_v42 }
 0x8cd   : > { %v3676_v21 = vsel %vm1766_vm2, %v3654_v3, %v3675_v50 }
 0x8ce   : > { %v3677_v51 = vsel %vm1768_vm3, %v3655_v24, %v3676_v21 }
 0x8cf   : > { %v3679_v57 = vsel %vm3662_vm9, %v3677_v51, %v8547_v45  }
 0x8d0   : > { %v8548_v51 = vmov %v3679_v57  ;;  %3680 = vmax.xlane.f32.xlu0 (%p2022_p2), %v3679_v57 }
 0x95d   :  { %v3681_v29 = vpop.xlane.xlu0 %3680 }
 0x95e   :  { %v3682_v22 = vsub.f32 %v3679_v57, %v3681_v29 }
 0x960   :  { %v3683_v35 = vmul.f32 1.442695, %v3682_v22 }
 0x962   :  { %4720 = vpow2.f32 %v3683_v35 }
 0x96c   :  { %v4721_v42 = vpop.eup %4720 }
 0x96d   :  { %3685 = vadd.xlane.f32.xlu0 %v4721_v42 }
 0x9fa   :  { %v3686_v14 = vpop.xlane.xlu0 %3685 }
 0x9fb   :  { %4722 = vlog2.f32 %v3686_v14 }
 0xa05   :  { %v4723_v49 = vpop.eup %4722 }
 0xa06   :  { %v3688_v52 = vmul.f32 0.6931472, %v4723_v49 }
 0xa08   :  { %v3689_v58 = vadd.f32 %v3688_v52, %v3681_v29 }
 0xa0a   :  { %v3690_v8 = vsub.f32 %v3689_v58, %v8549_v48 }
 0xa0c   :  { %3692 = vst.msk [vmem:[%s7995_s13] sm:$0xff] %vm3691_vm10, %v3690_v8 }

</bundles_post_ra>
